<compile_context>
chip_gen: v7x
topology: tpu7x:2x2x1
jax: 0.10.0
libtpu: 0.0.40
codegen_flags: <defaults>
</compile_context>

<pallas_src>
import math
import numpy as np
import jax
import jax.numpy as jnp
from jax.experimental import pallas as pl
from jax.experimental.pallas import tpu as pltpu


# ------------- fused kernel: input proj + BiLSTM recurrence + hidden2tag + Viterbi -------------
def bilstm_crf_core(x_cat, w_cat, bias_c, whh_c, w1, w2, btag, trans_t, start, stop,
                    *, S, B, H, T):
    SB = S * B

    def kernel(x_ref, wcat_ref, bias_ref, whh_ref, w1_ref, w2_ref, btag_ref,
               trt_ref, start_ref, stop_ref, tags_ref, feats_ref,
               gx_scr, hf_scr, hb_scr):
        # ---- fused input projection: fwd gates of time k and bwd gates of time S-1-k
        #      land in the same row block k (bwd time reversal already folded into x_cat).
        gx_scr[...] = (jnp.dot(x_ref[...], wcat_ref[...],
                               preferred_element_type=jnp.float32) + bias_ref[...])

        whh = whh_ref[...]                                      # (2H, 8H) block-diagonal

        # ---- bidirectional recurrence, fully unrolled (S is static & small) ----
        h = jnp.zeros((B, 2 * H), jnp.float32)                  # [h_fwd | h_bwd]
        c = jnp.zeros((B, 2 * H), jnp.float32)
        for k in range(S):                                      # static unroll
            g_x = gx_scr[pl.ds(k * B, B), :]                    # single (B, 8H) load, no select
            gates = g_x + jnp.dot(h, whh, preferred_element_type=jnp.float32)
            sig = jax.nn.sigmoid(gates)                         # one EUP pass over all 8H lanes
            i_g = sig[:, 0:2 * H]
            f_g = sig[:, 2 * H:4 * H]
            o_g = sig[:, 6 * H:8 * H]
            g_g = jnp.tanh(gates[:, 4 * H:6 * H])
            c = f_g * c + i_g * g_g
            h = o_g * jnp.tanh(c)
            # Full-width stores (no lane slicing / rotate):
            #   hf_scr row block k       -> fwd half valid for time k
            #   hb_scr row block S-1-k   -> bwd half valid for time S-1-k
            hf_scr[pl.ds(k * B, B), :] = h
            hb_scr[pl.ds((S - 1 - k) * B, B), :] = h

        # ---- hidden2tag hoisted out of the Viterbi loop: two flat batched matmuls.
        #      w1 = [[wtag_f],[0]] picks the fwd half, w2 = [[0],[wtag_b]] picks the bwd half.
        feats_flat = (jnp.dot(hf_scr[...], w1_ref[...], preferred_element_type=jnp.float32)
                      + jnp.dot(hb_scr[...], w2_ref[...], preferred_element_type=jnp.float32)
                      + btag_ref[...])                          # (S*B, T)
        feats_ref[...] = feats_flat                             # single slab store

        # ---- Viterbi forward pass (unrolled); backpointers kept in registers ----
        trans_b = trt_ref[...][None, :, :]                      # (1, T_to, T_from)
        iota3 = jax.lax.broadcasted_iota(jnp.int32, (B, T, T), 2)
        iota_bt = jax.lax.broadcasted_iota(jnp.int32, (B, T), 1)

        v = feats_flat[0:B, :] + start_ref[...]
        paths = []
        for i in range(1, S):                                   # static unroll
            scores = v[:, None, :] + trans_b                    # (B, T_to, T_from)
            max_val = jnp.max(scores, axis=-1)                  # (B, T)
            bp = jnp.min(jnp.where(scores >= max_val[:, :, None], iota3, T), axis=-1)
            paths.append(bp)
            v = max_val + feats_flat[i * B:(i + 1) * B, :]

        # ---- Viterbi backtrace (unrolled); tags assembled in registers, one store ----
        vf = v + stop_ref[...]
        best = jnp.max(vf, axis=-1, keepdims=True)
        tag = jnp.min(jnp.where(vf >= best, iota_bt, T), axis=-1, keepdims=True)    # (B, 1)

        col_iota = jax.lax.broadcasted_iota(jnp.int32, (B, S), 1)
        tags_acc = jnp.where(col_iota == (S - 1), tag, jnp.zeros((B, S), jnp.int32))
        for i in range(S - 1, 0, -1):                           # static unroll
            bp = paths[i - 1]
            tag = jnp.sum(jnp.where(iota_bt == tag, bp, 0), axis=-1, keepdims=True)
            tags_acc = jnp.where(col_iota == (i - 1), tag, tags_acc)
        tags_ref[...] = tags_acc

    # TODO(synk): for v7x, add a batch grid axis (dimension_semantics=("parallel",)) once B is
    # large enough to split across the 2 TensorCores; at B=2 a grid-less call is best.
    return pl.pallas_call(
        kernel,
        out_shape=(jax.ShapeDtypeStruct((B, S), jnp.int32),
                   jax.ShapeDtypeStruct((SB, T), jnp.float32)),
        scratch_shapes=[pltpu.VMEM((SB, 8 * H), jnp.float32),   # gx (both directions)
                        pltpu.VMEM((SB, 2 * H), jnp.float32),   # h in fwd time order
                        pltpu.VMEM((SB, 2 * H), jnp.float32)],  # h in bwd time order
        compiler_params=pltpu.CompilerParams(vmem_limit_bytes=32 * 1024 * 1024),
    )(x_cat, w_cat, bias_c, whh_c, w1, w2, btag, trans_t, start, stop)


# --------------------------- one-time weight packing ---------------------------
def prepare_params(params):
    E = params["wih_f"].shape[1]
    H = params["whh_f"].shape[1]
    T = params["w_tag"].shape[0]

    # Input-projection weights of BOTH directions as one (2E, 8H) block matrix.
    # Columns are gate-interleaved: [i_f i_b f_f f_b g_f g_b o_f o_b], each H wide
    # (PyTorch gate order i, f, g, o).  Rows 0:E act on x[t] (fwd), rows E:2E on x[S-1-t] (bwd).
    w_cat = jnp.zeros((2, E, 4, 2, H), jnp.float32)
    w_cat = w_cat.at[0, :, :, 0, :].set(params["wih_f"].T.reshape(E, 4, H))
    w_cat = w_cat.at[1, :, :, 1, :].set(params["wih_b"].T.reshape(E, 4, H))
    w_cat = w_cat.reshape(2 * E, 8 * H)

    # Hidden->gates as one block-diagonal (2H, 8H) matrix in the same column layout.
    whh_c = jnp.zeros((2, H, 4, 2, H), jnp.float32)
    whh_c = whh_c.at[0, :, :, 0, :].set(params["whh_f"].T.reshape(H, 4, H))
    whh_c = whh_c.at[1, :, :, 1, :].set(params["whh_b"].T.reshape(H, 4, H))
    whh_c = whh_c.reshape(2 * H, 8 * H)

    bias_c = jnp.stack([(params["bih_f"] + params["bhh_f"]).reshape(4, H),
                        (params["bih_b"] + params["bhh_b"]).reshape(4, H)],
                       axis=1).reshape(1, 8 * H)

    # hidden2tag split into zero-padded halves so full-width h stores can be used directly.
    wtag_t = params["w_tag"].T                                   # (2H, T)
    zeros_ht = jnp.zeros((H, T), jnp.float32)
    w1 = jnp.concatenate([wtag_t[:H], zeros_ht], axis=0)         # picks fwd hidden
    w2 = jnp.concatenate([zeros_ht, wtag_t[H:]], axis=0)         # picks bwd hidden

    return {
        "embedding": params["embedding"],
        "w_cat": w_cat, "whh_c": whh_c, "bias_c": bias_c,
        "w1": w1, "w2": w2,
        "btag": params["b_tag"].reshape(1, T),
        "trans_t": params["transitions"].T,
        "start": params["start_transitions"].reshape(1, T),
        "stop": params["stop_transitions"].reshape(1, T),
    }


# --------------------------- full forward ---------------------------
def bilstm_crf_forward(prep, sentence):
    # TODO(synk): embedding gather kept in plain JAX (could use scalar-prefetch + pl.Element).
    emb = prep["embedding"][sentence].astype(jnp.float32)        # (B, S, E)
    B, S, E = emb.shape
    H = prep["whh_c"].shape[0] // 2
    T = prep["btag"].shape[1]

    emb_tm = jnp.transpose(emb, (1, 0, 2))                       # time-major (S, B, E)
    # Fold the backward direction's time reversal here (one cheap XLA flip + concat), so the
    # kernel's recurrence reads exactly one gx row per step with no per-step select.
    x_cat = jnp.concatenate([emb_tm, emb_tm[::-1]], axis=-1).reshape(S * B, 2 * E)

    tags, feats_flat = bilstm_crf_core(
        x_cat, prep["w_cat"], prep["bias_c"], prep["whh_c"], prep["w1"], prep["w2"],
        prep["btag"], prep["trans_t"], prep["start"], prep["stop"],
        S=S, B=B, H=H, T=T)
    feats = jnp.transpose(feats_flat.reshape(S, B, T), (1, 0, 2))   # (B, S, T)
    return tags, feats


# --------------------------- pure-JAX reference ---------------------------
def _lstm_reference(x, Wih, Whh, bih, bhh):
    B, S, E = x.shape
    Hh = Whh.shape[1]

    def step(carry, xt):
        h, c = carry
        gates = xt @ Wih.T + bih + h @ Whh.T + bhh
        i = jax.nn.sigmoid(gates[:, :Hh])
        f = jax.nn.sigmoid(gates[:, Hh:2 * Hh])
        g = jnp.tanh(gates[:, 2 * Hh:3 * Hh])
        o = jax.nn.sigmoid(gates[:, 3 * Hh:])
        c = f * c + i * g
        h = o * jnp.tanh(c)
        return (h, c), h

    init = (jnp.zeros((B, Hh), jnp.float32), jnp.zeros((B, Hh), jnp.float32))
    _, hs = jax.lax.scan(step, init, jnp.transpose(x, (1, 0, 2)))
    return jnp.transpose(hs, (1, 0, 2))


def feats_reference(params, sentence):
    emb = params["embedding"][sentence].astype(jnp.float32)
    hf = _lstm_reference(emb, params["wih_f"], params["whh_f"],
                         params["bih_f"], params["bhh_f"])
    hb = _lstm_reference(emb[:, ::-1], params["wih_b"], params["whh_b"],
                         params["bih_b"], params["bhh_b"])[:, ::-1]
    lstm_out = jnp.concatenate([hf, hb], axis=-1)
    return lstm_out @ params["w_tag"].T + params["b_tag"]


def viterbi_reference(feats, trans, start, stop):
    B, S, T = feats.shape
    v = feats[:, 0] + start[None, :]
    paths = []
    for i in range(1, S):
        scores = v[:, :, None] + trans[None, :, :]
        paths.append(jnp.argmax(scores, axis=1))
        v = jnp.max(scores, axis=1) + feats[:, i]
    tag = jnp.argmax(v + stop[None, :], axis=1)
    tags = [tag]
    for idx in reversed(paths):
        tag = jnp.take_along_axis(idx, tag[:, None], axis=1)[:, 0]
        tags.append(tag)
    tags.reverse()
    return jnp.stack(tags, axis=1)


# --------------------------- main ---------------------------
if __name__ == "__main__":
    VOCAB, EMB, HID, TAGS = 20, 16, 32, 5        # hidden_dim=32 -> 16 per direction
    B, S = 2, 8
    H = HID // 2

    key = jax.random.PRNGKey(0)
    ks = jax.random.split(key, 14)
    k_lstm = 1.0 / math.sqrt(H)
    k_lin = 1.0 / math.sqrt(HID)
    xavier_std = math.sqrt(2.0 / (TAGS + TAGS))

    params = {
        "embedding": jax.random.normal(ks[0], (VOCAB, EMB), jnp.float32),
        "wih_f": jax.random.uniform(ks[1], (4 * H, EMB), jnp.float32, -k_lstm, k_lstm),
        "whh_f": jax.random.uniform(ks[2], (4 * H, H), jnp.float32, -k_lstm, k_lstm),
        "bih_f": jax.random.uniform(ks[3], (4 * H,), jnp.float32, -k_lstm, k_lstm),
        "bhh_f": jax.random.uniform(ks[4], (4 * H,), jnp.float32, -k_lstm, k_lstm),
        "wih_b": jax.random.uniform(ks[5], (4 * H, EMB), jnp.float32, -k_lstm, k_lstm),
        "whh_b": jax.random.uniform(ks[6], (4 * H, H), jnp.float32, -k_lstm, k_lstm),
        "bih_b": jax.random.uniform(ks[7], (4 * H,), jnp.float32, -k_lstm, k_lstm),
        "bhh_b": jax.random.uniform(ks[8], (4 * H,), jnp.float32, -k_lstm, k_lstm),
        "w_tag": jax.random.uniform(ks[9], (TAGS, HID), jnp.float32, -k_lin, k_lin),
        "b_tag": jax.random.uniform(ks[10], (TAGS,), jnp.float32, -k_lin, k_lin),
        "transitions": jax.random.normal(ks[11], (TAGS, TAGS), jnp.float32) * xavier_std,
        "start_transitions": jnp.full((TAGS,), -10000.0, jnp.float32),
        "stop_transitions": jnp.full((TAGS,), -10000.0, jnp.float32),
    }

    sentence = jax.random.randint(ks[12], (B, S), 0, VOCAB, dtype=jnp.int32)

    prep = prepare_params(params)                 # one-time weight packing (outside forward)
    forward = jax.jit(bilstm_crf_forward)

    tags, feats = forward(prep, sentence)
    tags = jax.block_until_ready(tags)
    feats = jax.block_until_ready(feats)

    # Sanity checks vs pure-JAX reference.
    f_ref = feats_reference(params, sentence)
    np.testing.assert_allclose(np.asarray(feats), np.asarray(f_ref), rtol=1e-4, atol=1e-4)
    t_ref = viterbi_reference(feats, params["transitions"],
                              params["start_transitions"], params["stop_transitions"])
    assert np.array_equal(np.asarray(tags), np.asarray(t_ref)), "viterbi mismatch"
    assert tags.shape == (B, S)

    print("KERNEL_OK")
</pallas_src>

<mosaic_0001>
module attributes {stable_mosaic.version = 11 : i64} {
  func.func @kernel(%arg0: memref<16x32xf32, #tpu.memory_space<vmem>>, %arg1: memref<32x128xf32, #tpu.memory_space<vmem>>, %arg2: memref<1x128xf32, #tpu.memory_space<vmem>>, %arg3: memref<32x128xf32, #tpu.memory_space<vmem>>, %arg4: memref<32x5xf32, #tpu.memory_space<vmem>>, %arg5: memref<32x5xf32, #tpu.memory_space<vmem>>, %arg6: memref<1x5xf32, #tpu.memory_space<vmem>>, %arg7: memref<5x5xf32, #tpu.memory_space<vmem>>, %arg8: memref<1x5xf32, #tpu.memory_space<vmem>>, %arg9: memref<1x5xf32, #tpu.memory_space<vmem>>, %arg10: memref<2x8xi32, #tpu.memory_space<vmem>>, %arg11: memref<16x5xf32, #tpu.memory_space<vmem>>, %arg12: memref<16x128xf32, #tpu.memory_space<vmem>>, %arg13: memref<16x32xf32, #tpu.memory_space<vmem>>, %arg14: memref<16x32xf32, #tpu.memory_space<vmem>>) attributes {dimension_semantics = [], scalar_prefetch = 0 : i64, scratch_operands = 3 : i64, tpu.core_type = #tpu.core_type<tc>} {
    %c0 = arith.constant 0 : index
    %c0_0 = arith.constant 0 : index
    %0 = vector.load %arg0[%c0, %c0_0] : memref<16x32xf32, #tpu.memory_space<vmem>>, vector<16x32xf32>
    %c0_1 = arith.constant 0 : index
    %c0_2 = arith.constant 0 : index
    %1 = vector.load %arg1[%c0_1, %c0_2] : memref<32x128xf32, #tpu.memory_space<vmem>>, vector<32x128xf32>
    %cst = arith.constant dense<0.000000e+00> : vector<16x128xf32>
    %2 = tpu.matmul %0, %1, %cst {dimension_numbers = #tpu.dot_dimension_numbers<[1], [0], [0], [1], [0, 0, 1, 1], [], []>} : vector<16x32xf32>, vector<32x128xf32>, vector<16x128xf32> -> vector<16x128xf32>
    %c0_3 = arith.constant 0 : index
    %c0_4 = arith.constant 0 : index
    %3 = vector.load %arg2[%c0_3, %c0_4] : memref<1x128xf32, #tpu.memory_space<vmem>>, vector<1x128xf32>
    %4 = vector.broadcast %3 : vector<1x128xf32> to vector<16x128xf32>
    %5 = arith.addf %2, %4 : vector<16x128xf32>
    %c0_5 = arith.constant 0 : index
    %c0_6 = arith.constant 0 : index
    %6 = vector.load %arg12[%c0_5, %c0_6] : memref<16x128xf32, #tpu.memory_space<vmem>>, vector<16x128xf32>
    tpu.vector_store %arg12[%c0_5, %c0_6], %5 {strides = array<i32>} : memref<16x128xf32, #tpu.memory_space<vmem>>, vector<16x128xf32>,
    %c0_7 = arith.constant 0 : index
    %c0_8 = arith.constant 0 : index
    %7 = vector.load %arg3[%c0_7, %c0_8] : memref<32x128xf32, #tpu.memory_space<vmem>>, vector<32x128xf32>
    %cst_9 = arith.constant 0.000000e+00 : f32
    %8 = vector.broadcast %cst_9 : f32 to vector<2x32xf32>
    %cst_10 = arith.constant 0.000000e+00 : f32
    %9 = vector.broadcast %cst_10 : f32 to vector<2x32xf32>
    %c0_11 = arith.constant 0 : index
    %c0_12 = arith.constant 0 : index
    %10 = vector.load %arg12[%c0_11, %c0_12] : memref<16x128xf32, #tpu.memory_space<vmem>>, vector<2x128xf32>
    %cst_13 = arith.constant dense<0.000000e+00> : vector<2x128xf32>
    %11 = tpu.matmul %8, %7, %cst_13 {dimension_numbers = #tpu.dot_dimension_numbers<[1], [0], [0], [1], [0, 0, 1, 1], [], []>} : vector<2x32xf32>, vector<32x128xf32>, vector<2x128xf32> -> vector<2x128xf32>
    %12 = arith.addf %10, %11 : vector<2x128xf32>
    %13 = arith.negf %12 : vector<2x128xf32>
    %14 = math.exp %13 : vector<2x128xf32>
    %cst_14 = arith.constant 1.000000e+00 : f32
    %15 = vector.broadcast %cst_14 : f32 to vector<2x128xf32>
    %16 = arith.addf %15, %14 : vector<2x128xf32>
    %17 = arith.divf %15, %16 : vector<2x128xf32>
    %18 = vector.extract_strided_slice %17 {offsets = [0, 0], sizes = [2, 32], strides = [1, 1]} : vector<2x128xf32> to vector<2x32xf32>
    %19 = vector.extract_strided_slice %17 {offsets = [0, 32], sizes = [2, 32], strides = [1, 1]} : vector<2x128xf32> to vector<2x32xf32>
    %20 = vector.extract_strided_slice %17 {offsets = [0, 96], sizes = [2, 32], strides = [1, 1]} : vector<2x128xf32> to vector<2x32xf32>
    %21 = vector.extract_strided_slice %12 {offsets = [0, 64], sizes = [2, 32], strides = [1, 1]} : vector<2x128xf32> to vector<2x32xf32>
    %22 = math.tanh %21 : vector<2x32xf32>
    %23 = arith.mulf %19, %9 : vector<2x32xf32>
    %24 = arith.mulf %18, %22 : vector<2x32xf32>
    %25 = arith.addf %23, %24 : vector<2x32xf32>
    %26 = math.tanh %25 : vector<2x32xf32>
    %27 = arith.mulf %20, %26 : vector<2x32xf32>
    %c0_15 = arith.constant 0 : index
    %c0_16 = arith.constant 0 : index
    %28 = vector.load %arg13[%c0_15, %c0_16] : memref<16x32xf32, #tpu.memory_space<vmem>>, vector<2x32xf32>
    tpu.vector_store %arg13[%c0_15, %c0_16], %27 {strides = array<i32>} : memref<16x32xf32, #tpu.memory_space<vmem>>, vector<2x32xf32>,
    %c14 = arith.constant 14 : index
    %c0_17 = arith.constant 0 : index
    %29 = vector.load %arg14[%c14, %c0_17] : memref<16x32xf32, #tpu.memory_space<vmem>>, vector<2x32xf32>
    tpu.vector_store %arg14[%c14, %c0_17], %27 {strides = array<i32>} : memref<16x32xf32, #tpu.memory_space<vmem>>, vector<2x32xf32>,
    %c2 = arith.constant 2 : index
    %c0_18 = arith.constant 0 : index
    %30 = vector.load %arg12[%c2, %c0_18] : memref<16x128xf32, #tpu.memory_space<vmem>>, vector<2x128xf32>
    %cst_19 = arith.constant dense<0.000000e+00> : vector<2x128xf32>
    %31 = tpu.matmul %27, %7, %cst_19 {dimension_numbers = #tpu.dot_dimension_numbers<[1], [0], [0], [1], [0, 0, 1, 1], [], []>} : vector<2x32xf32>, vector<32x128xf32>, vector<2x128xf32> -> vector<2x128xf32>
    %32 = arith.addf %30, %31 : vector<2x128xf32>
    %33 = arith.negf %32 : vector<2x128xf32>
    %34 = math.exp %33 : vector<2x128xf32>
    %cst_20 = arith.constant 1.000000e+00 : f32
    %35 = vector.broadcast %cst_20 : f32 to vector<2x128xf32>
    %36 = arith.addf %35, %34 : vector<2x128xf32>
    %37 = arith.divf %35, %36 : vector<2x128xf32>
    %38 = vector.extract_strided_slice %37 {offsets = [0, 0], sizes = [2, 32], strides = [1, 1]} : vector<2x128xf32> to vector<2x32xf32>
    %39 = vector.extract_strided_slice %37 {offsets = [0, 32], sizes = [2, 32], strides = [1, 1]} : vector<2x128xf32> to vector<2x32xf32>
    %40 = vector.extract_strided_slice %37 {offsets = [0, 96], sizes = [2, 32], strides = [1, 1]} : vector<2x128xf32> to vector<2x32xf32>
    %41 = vector.extract_strided_slice %32 {offsets = [0, 64], sizes = [2, 32], strides = [1, 1]} : vector<2x128xf32> to vector<2x32xf32>
    %42 = math.tanh %41 : vector<2x32xf32>
    %43 = arith.mulf %39, %25 : vector<2x32xf32>
    %44 = arith.mulf %38, %42 : vector<2x32xf32>
    %45 = arith.addf %43, %44 : vector<2x32xf32>
    %46 = math.tanh %45 : vector<2x32xf32>
    %47 = arith.mulf %40, %46 : vector<2x32xf32>
    %c2_21 = arith.constant 2 : index
    %c0_22 = arith.constant 0 : index
    %48 = vector.load %arg13[%c2_21, %c0_22] : memref<16x32xf32, #tpu.memory_space<vmem>>, vector<2x32xf32>
    tpu.vector_store %arg13[%c2_21, %c0_22], %47 {strides = array<i32>} : memref<16x32xf32, #tpu.memory_space<vmem>>, vector<2x32xf32>,
    %c12 = arith.constant 12 : index
    %c0_23 = arith.constant 0 : index
    %49 = vector.load %arg14[%c12, %c0_23] : memref<16x32xf32, #tpu.memory_space<vmem>>, vector<2x32xf32>
    tpu.vector_store %arg14[%c12, %c0_23], %47 {strides = array<i32>} : memref<16x32xf32, #tpu.memory_space<vmem>>, vector<2x32xf32>,
    %c4 = arith.constant 4 : index
    %c0_24 = arith.constant 0 : index
    %50 = vector.load %arg12[%c4, %c0_24] : memref<16x128xf32, #tpu.memory_space<vmem>>, vector<2x128xf32>
    %cst_25 = arith.constant dense<0.000000e+00> : vector<2x128xf32>
    %51 = tpu.matmul %47, %7, %cst_25 {dimension_numbers = #tpu.dot_dimension_numbers<[1], [0], [0], [1], [0, 0, 1, 1], [], []>} : vector<2x32xf32>, vector<32x128xf32>, vector<2x128xf32> -> vector<2x128xf32>
    %52 = arith.addf %50, %51 : vector<2x128xf32>
    %53 = arith.negf %52 : vector<2x128xf32>
    %54 = math.exp %53 : vector<2x128xf32>
    %cst_26 = arith.constant 1.000000e+00 : f32
    %55 = vector.broadcast %cst_26 : f32 to vector<2x128xf32>
    %56 = arith.addf %55, %54 : vector<2x128xf32>
    %57 = arith.divf %55, %56 : vector<2x128xf32>
    %58 = vector.extract_strided_slice %57 {offsets = [0, 0], sizes = [2, 32], strides = [1, 1]} : vector<2x128xf32> to vector<2x32xf32>
    %59 = vector.extract_strided_slice %57 {offsets = [0, 32], sizes = [2, 32], strides = [1, 1]} : vector<2x128xf32> to vector<2x32xf32>
    %60 = vector.extract_strided_slice %57 {offsets = [0, 96], sizes = [2, 32], strides = [1, 1]} : vector<2x128xf32> to vector<2x32xf32>
    %61 = vector.extract_strided_slice %52 {offsets = [0, 64], sizes = [2, 32], strides = [1, 1]} : vector<2x128xf32> to vector<2x32xf32>
    %62 = math.tanh %61 : vector<2x32xf32>
    %63 = arith.mulf %59, %45 : vector<2x32xf32>
    %64 = arith.mulf %58, %62 : vector<2x32xf32>
    %65 = arith.addf %63, %64 : vector<2x32xf32>
    %66 = math.tanh %65 : vector<2x32xf32>
    %67 = arith.mulf %60, %66 : vector<2x32xf32>
    %c4_27 = arith.constant 4 : index
    %c0_28 = arith.constant 0 : index
    %68 = vector.load %arg13[%c4_27, %c0_28] : memref<16x32xf32, #tpu.memory_space<vmem>>, vector<2x32xf32>
    tpu.vector_store %arg13[%c4_27, %c0_28], %67 {strides = array<i32>} : memref<16x32xf32, #tpu.memory_space<vmem>>, vector<2x32xf32>,
    %c10 = arith.constant 10 : index
    %c0_29 = arith.constant 0 : index
    %69 = vector.load %arg14[%c10, %c0_29] : memref<16x32xf32, #tpu.memory_space<vmem>>, vector<2x32xf32>
    tpu.vector_store %arg14[%c10, %c0_29], %67 {strides = array<i32>} : memref<16x32xf32, #tpu.memory_space<vmem>>, vector<2x32xf32>,
    %c6 = arith.constant 6 : index
    %c0_30 = arith.constant 0 : index
    %70 = vector.load %arg12[%c6, %c0_30] : memref<16x128xf32, #tpu.memory_space<vmem>>, vector<2x128xf32>
    %cst_31 = arith.constant dense<0.000000e+00> : vector<2x128xf32>
    %71 = tpu.matmul %67, %7, %cst_31 {dimension_numbers = #tpu.dot_dimension_numbers<[1], [0], [0], [1], [0, 0, 1, 1], [], []>} : vector<2x32xf32>, vector<32x128xf32>, vector<2x128xf32> -> vector<2x128xf32>
    %72 = arith.addf %70, %71 : vector<2x128xf32>
    %73 = arith.negf %72 : vector<2x128xf32>
    %74 = math.exp %73 : vector<2x128xf32>
    %cst_32 = arith.constant 1.000000e+00 : f32
    %75 = vector.broadcast %cst_32 : f32 to vector<2x128xf32>
    %76 = arith.addf %75, %74 : vector<2x128xf32>
    %77 = arith.divf %75, %76 : vector<2x128xf32>
    %78 = vector.extract_strided_slice %77 {offsets = [0, 0], sizes = [2, 32], strides = [1, 1]} : vector<2x128xf32> to vector<2x32xf32>
    %79 = vector.extract_strided_slice %77 {offsets = [0, 32], sizes = [2, 32], strides = [1, 1]} : vector<2x128xf32> to vector<2x32xf32>
    %80 = vector.extract_strided_slice %77 {offsets = [0, 96], sizes = [2, 32], strides = [1, 1]} : vector<2x128xf32> to vector<2x32xf32>
    %81 = vector.extract_strided_slice %72 {offsets = [0, 64], sizes = [2, 32], strides = [1, 1]} : vector<2x128xf32> to vector<2x32xf32>
    %82 = math.tanh %81 : vector<2x32xf32>
    %83 = arith.mulf %79, %65 : vector<2x32xf32>
    %84 = arith.mulf %78, %82 : vector<2x32xf32>
    %85 = arith.addf %83, %84 : vector<2x32xf32>
    %86 = math.tanh %85 : vector<2x32xf32>
    %87 = arith.mulf %80, %86 : vector<2x32xf32>
    %c6_33 = arith.constant 6 : index
    %c0_34 = arith.constant 0 : index
    %88 = vector.load %arg13[%c6_33, %c0_34] : memref<16x32xf32, #tpu.memory_space<vmem>>, vector<2x32xf32>
    tpu.vector_store %arg13[%c6_33, %c0_34], %87 {strides = array<i32>} : memref<16x32xf32, #tpu.memory_space<vmem>>, vector<2x32xf32>,
    %c8 = arith.constant 8 : index
    %c0_35 = arith.constant 0 : index
    %89 = vector.load %arg14[%c8, %c0_35] : memref<16x32xf32, #tpu.memory_space<vmem>>, vector<2x32xf32>
    tpu.vector_store %arg14[%c8, %c0_35], %87 {strides = array<i32>} : memref<16x32xf32, #tpu.memory_space<vmem>>, vector<2x32xf32>,
    %c8_36 = arith.constant 8 : index
    %c0_37 = arith.constant 0 : index
    %90 = vector.load %arg12[%c8_36, %c0_37] : memref<16x128xf32, #tpu.memory_space<vmem>>, vector<2x128xf32>
    %cst_38 = arith.constant dense<0.000000e+00> : vector<2x128xf32>
    %91 = tpu.matmul %87, %7, %cst_38 {dimension_numbers = #tpu.dot_dimension_numbers<[1], [0], [0], [1], [0, 0, 1, 1], [], []>} : vector<2x32xf32>, vector<32x128xf32>, vector<2x128xf32> -> vector<2x128xf32>
    %92 = arith.addf %90, %91 : vector<2x128xf32>
    %93 = arith.negf %92 : vector<2x128xf32>
    %94 = math.exp %93 : vector<2x128xf32>
    %cst_39 = arith.constant 1.000000e+00 : f32
    %95 = vector.broadcast %cst_39 : f32 to vector<2x128xf32>
    %96 = arith.addf %95, %94 : vector<2x128xf32>
    %97 = arith.divf %95, %96 : vector<2x128xf32>
    %98 = vector.extract_strided_slice %97 {offsets = [0, 0], sizes = [2, 32], strides = [1, 1]} : vector<2x128xf32> to vector<2x32xf32>
    %99 = vector.extract_strided_slice %97 {offsets = [0, 32], sizes = [2, 32], strides = [1, 1]} : vector<2x128xf32> to vector<2x32xf32>
    %100 = vector.extract_strided_slice %97 {offsets = [0, 96], sizes = [2, 32], strides = [1, 1]} : vector<2x128xf32> to vector<2x32xf32>
    %101 = vector.extract_strided_slice %92 {offsets = [0, 64], sizes = [2, 32], strides = [1, 1]} : vector<2x128xf32> to vector<2x32xf32>
    %102 = math.tanh %101 : vector<2x32xf32>
    %103 = arith.mulf %99, %85 : vector<2x32xf32>
    %104 = arith.mulf %98, %102 : vector<2x32xf32>
    %105 = arith.addf %103, %104 : vector<2x32xf32>
    %106 = math.tanh %105 : vector<2x32xf32>
    %107 = arith.mulf %100, %106 : vector<2x32xf32>
    %c8_40 = arith.constant 8 : index
    %c0_41 = arith.constant 0 : index
    %108 = vector.load %arg13[%c8_40, %c0_41] : memref<16x32xf32, #tpu.memory_space<vmem>>, vector<2x32xf32>
    tpu.vector_store %arg13[%c8_40, %c0_41], %107 {strides = array<i32>} : memref<16x32xf32, #tpu.memory_space<vmem>>, vector<2x32xf32>,
    %c6_42 = arith.constant 6 : index
    %c0_43 = arith.constant 0 : index
    %109 = vector.load %arg14[%c6_42, %c0_43] : memref<16x32xf32, #tpu.memory_space<vmem>>, vector<2x32xf32>
    tpu.vector_store %arg14[%c6_42, %c0_43], %107 {strides = array<i32>} : memref<16x32xf32, #tpu.memory_space<vmem>>, vector<2x32xf32>,
    %c10_44 = arith.constant 10 : index
    %c0_45 = arith.constant 0 : index
    %110 = vector.load %arg12[%c10_44, %c0_45] : memref<16x128xf32, #tpu.memory_space<vmem>>, vector<2x128xf32>
    %cst_46 = arith.constant dense<0.000000e+00> : vector<2x128xf32>
    %111 = tpu.matmul %107, %7, %cst_46 {dimension_numbers = #tpu.dot_dimension_numbers<[1], [0], [0], [1], [0, 0, 1, 1], [], []>} : vector<2x32xf32>, vector<32x128xf32>, vector<2x128xf32> -> vector<2x128xf32>
    %112 = arith.addf %110, %111 : vector<2x128xf32>
    %113 = arith.negf %112 : vector<2x128xf32>
    %114 = math.exp %113 : vector<2x128xf32>
    %cst_47 = arith.constant 1.000000e+00 : f32
    %115 = vector.broadcast %cst_47 : f32 to vector<2x128xf32>
    %116 = arith.addf %115, %114 : vector<2x128xf32>
    %117 = arith.divf %115, %116 : vector<2x128xf32>
    %118 = vector.extract_strided_slice %117 {offsets = [0, 0], sizes = [2, 32], strides = [1, 1]} : vector<2x128xf32> to vector<2x32xf32>
    %119 = vector.extract_strided_slice %117 {offsets = [0, 32], sizes = [2, 32], strides = [1, 1]} : vector<2x128xf32> to vector<2x32xf32>
    %120 = vector.extract_strided_slice %117 {offsets = [0, 96], sizes = [2, 32], strides = [1, 1]} : vector<2x128xf32> to vector<2x32xf32>
    %121 = vector.extract_strided_slice %112 {offsets = [0, 64], sizes = [2, 32], strides = [1, 1]} : vector<2x128xf32> to vector<2x32xf32>
    %122 = math.tanh %121 : vector<2x32xf32>
    %123 = arith.mulf %119, %105 : vector<2x32xf32>
    %124 = arith.mulf %118, %122 : vector<2x32xf32>
    %125 = arith.addf %123, %124 : vector<2x32xf32>
    %126 = math.tanh %125 : vector<2x32xf32>
    %127 = arith.mulf %120, %126 : vector<2x32xf32>
    %c10_48 = arith.constant 10 : index
    %c0_49 = arith.constant 0 : index
    %128 = vector.load %arg13[%c10_48, %c0_49] : memref<16x32xf32, #tpu.memory_space<vmem>>, vector<2x32xf32>
    tpu.vector_store %arg13[%c10_48, %c0_49], %127 {strides = array<i32>} : memref<16x32xf32, #tpu.memory_space<vmem>>, vector<2x32xf32>,
    %c4_50 = arith.constant 4 : index
    %c0_51 = arith.constant 0 : index
    %129 = vector.load %arg14[%c4_50, %c0_51] : memref<16x32xf32, #tpu.memory_space<vmem>>, vector<2x32xf32>
    tpu.vector_store %arg14[%c4_50, %c0_51], %127 {strides = array<i32>} : memref<16x32xf32, #tpu.memory_space<vmem>>, vector<2x32xf32>,
    %c12_52 = arith.constant 12 : index
    %c0_53 = arith.constant 0 : index
    %130 = vector.load %arg12[%c12_52, %c0_53] : memref<16x128xf32, #tpu.memory_space<vmem>>, vector<2x128xf32>
    %cst_54 = arith.constant dense<0.000000e+00> : vector<2x128xf32>
    %131 = tpu.matmul %127, %7, %cst_54 {dimension_numbers = #tpu.dot_dimension_numbers<[1], [0], [0], [1], [0, 0, 1, 1], [], []>} : vector<2x32xf32>, vector<32x128xf32>, vector<2x128xf32> -> vector<2x128xf32>
    %132 = arith.addf %130, %131 : vector<2x128xf32>
    %133 = arith.negf %132 : vector<2x128xf32>
    %134 = math.exp %133 : vector<2x128xf32>
    %cst_55 = arith.constant 1.000000e+00 : f32
    %135 = vector.broadcast %cst_55 : f32 to vector<2x128xf32>
    %136 = arith.addf %135, %134 : vector<2x128xf32>
    %137 = arith.divf %135, %136 : vector<2x128xf32>
    %138 = vector.extract_strided_slice %137 {offsets = [0, 0], sizes = [2, 32], strides = [1, 1]} : vector<2x128xf32> to vector<2x32xf32>
    %139 = vector.extract_strided_slice %137 {offsets = [0, 32], sizes = [2, 32], strides = [1, 1]} : vector<2x128xf32> to vector<2x32xf32>
    %140 = vector.extract_strided_slice %137 {offsets = [0, 96], sizes = [2, 32], strides = [1, 1]} : vector<2x128xf32> to vector<2x32xf32>
    %141 = vector.extract_strided_slice %132 {offsets = [0, 64], sizes = [2, 32], strides = [1, 1]} : vector<2x128xf32> to vector<2x32xf32>
    %142 = math.tanh %141 : vector<2x32xf32>
    %143 = arith.mulf %139, %125 : vector<2x32xf32>
    %144 = arith.mulf %138, %142 : vector<2x32xf32>
    %145 = arith.addf %143, %144 : vector<2x32xf32>
    %146 = math.tanh %145 : vector<2x32xf32>
    %147 = arith.mulf %140, %146 : vector<2x32xf32>
    %c12_56 = arith.constant 12 : index
    %c0_57 = arith.constant 0 : index
    %148 = vector.load %arg13[%c12_56, %c0_57] : memref<16x32xf32, #tpu.memory_space<vmem>>, vector<2x32xf32>
    tpu.vector_store %arg13[%c12_56, %c0_57], %147 {strides = array<i32>} : memref<16x32xf32, #tpu.memory_space<vmem>>, vector<2x32xf32>,
    %c2_58 = arith.constant 2 : index
    %c0_59 = arith.constant 0 : index
    %149 = vector.load %arg14[%c2_58, %c0_59] : memref<16x32xf32, #tpu.memory_space<vmem>>, vector<2x32xf32>
    tpu.vector_store %arg14[%c2_58, %c0_59], %147 {strides = array<i32>} : memref<16x32xf32, #tpu.memory_space<vmem>>, vector<2x32xf32>,
    %c14_60 = arith.constant 14 : index
    %c0_61 = arith.constant 0 : index
    %150 = vector.load %arg12[%c14_60, %c0_61] : memref<16x128xf32, #tpu.memory_space<vmem>>, vector<2x128xf32>
    %cst_62 = arith.constant dense<0.000000e+00> : vector<2x128xf32>
    %151 = tpu.matmul %147, %7, %cst_62 {dimension_numbers = #tpu.dot_dimension_numbers<[1], [0], [0], [1], [0, 0, 1, 1], [], []>} : vector<2x32xf32>, vector<32x128xf32>, vector<2x128xf32> -> vector<2x128xf32>
    %152 = arith.addf %150, %151 : vector<2x128xf32>
    %153 = arith.negf %152 : vector<2x128xf32>
    %154 = math.exp %153 : vector<2x128xf32>
    %cst_63 = arith.constant 1.000000e+00 : f32
    %155 = vector.broadcast %cst_63 : f32 to vector<2x128xf32>
    %156 = arith.addf %155, %154 : vector<2x128xf32>
    %157 = arith.divf %155, %156 : vector<2x128xf32>
    %158 = vector.extract_strided_slice %157 {offsets = [0, 0], sizes = [2, 32], strides = [1, 1]} : vector<2x128xf32> to vector<2x32xf32>
    %159 = vector.extract_strided_slice %157 {offsets = [0, 32], sizes = [2, 32], strides = [1, 1]} : vector<2x128xf32> to vector<2x32xf32>
    %160 = vector.extract_strided_slice %157 {offsets = [0, 96], sizes = [2, 32], strides = [1, 1]} : vector<2x128xf32> to vector<2x32xf32>
    %161 = vector.extract_strided_slice %152 {offsets = [0, 64], sizes = [2, 32], strides = [1, 1]} : vector<2x128xf32> to vector<2x32xf32>
    %162 = math.tanh %161 : vector<2x32xf32>
    %163 = arith.mulf %159, %145 : vector<2x32xf32>
    %164 = arith.mulf %158, %162 : vector<2x32xf32>
    %165 = arith.addf %163, %164 : vector<2x32xf32>
    %166 = math.tanh %165 : vector<2x32xf32>
    %167 = arith.mulf %160, %166 : vector<2x32xf32>
    %c14_64 = arith.constant 14 : index
    %c0_65 = arith.constant 0 : index
    %168 = vector.load %arg13[%c14_64, %c0_65] : memref<16x32xf32, #tpu.memory_space<vmem>>, vector<2x32xf32>
    tpu.vector_store %arg13[%c14_64, %c0_65], %167 {strides = array<i32>} : memref<16x32xf32, #tpu.memory_space<vmem>>, vector<2x32xf32>,
    %c0_66 = arith.constant 0 : index
    %c0_67 = arith.constant 0 : index
    %169 = vector.load %arg14[%c0_66, %c0_67] : memref<16x32xf32, #tpu.memory_space<vmem>>, vector<2x32xf32>
    tpu.vector_store %arg14[%c0_66, %c0_67], %167 {strides = array<i32>} : memref<16x32xf32, #tpu.memory_space<vmem>>, vector<2x32xf32>,
    %c0_68 = arith.constant 0 : index
    %c0_69 = arith.constant 0 : index
    %170 = vector.load %arg13[%c0_68, %c0_69] : memref<16x32xf32, #tpu.memory_space<vmem>>, vector<16x32xf32>
    %c0_70 = arith.constant 0 : index
    %c0_71 = arith.constant 0 : index
    %171 = vector.load %arg4[%c0_70, %c0_71] : memref<32x5xf32, #tpu.memory_space<vmem>>, vector<32x5xf32>
    %cst_72 = arith.constant dense<0.000000e+00> : vector<16x5xf32>
    %172 = tpu.matmul %170, %171, %cst_72 {dimension_numbers = #tpu.dot_dimension_numbers<[1], [0], [0], [1], [0, 0, 1, 1], [], []>} : vector<16x32xf32>, vector<32x5xf32>, vector<16x5xf32> -> vector<16x5xf32>
    %c0_73 = arith.constant 0 : index
    %c0_74 = arith.constant 0 : index
    %173 = vector.load %arg14[%c0_73, %c0_74] : memref<16x32xf32, #tpu.memory_space<vmem>>, vector<16x32xf32>
    %c0_75 = arith.constant 0 : index
    %c0_76 = arith.constant 0 : index
    %174 = vector.load %arg5[%c0_75, %c0_76] : memref<32x5xf32, #tpu.memory_space<vmem>>, vector<32x5xf32>
    %cst_77 = arith.constant dense<0.000000e+00> : vector<16x5xf32>
    %175 = tpu.matmul %173, %174, %cst_77 {dimension_numbers = #tpu.dot_dimension_numbers<[1], [0], [0], [1], [0, 0, 1, 1], [], []>} : vector<16x32xf32>, vector<32x5xf32>, vector<16x5xf32> -> vector<16x5xf32>
    %176 = arith.addf %172, %175 : vector<16x5xf32>
    %c0_78 = arith.constant 0 : index
    %c0_79 = arith.constant 0 : index
    %177 = vector.load %arg6[%c0_78, %c0_79] : memref<1x5xf32, #tpu.memory_space<vmem>>, vector<1x5xf32>
    %178 = vector.broadcast %177 : vector<1x5xf32> to vector<16x5xf32>
    %179 = arith.addf %176, %178 : vector<16x5xf32>
    %c0_80 = arith.constant 0 : index
    %c0_81 = arith.constant 0 : index
    %180 = vector.load %arg11[%c0_80, %c0_81] : memref<16x5xf32, #tpu.memory_space<vmem>>, vector<16x5xf32>
    tpu.vector_store %arg11[%c0_80, %c0_81], %179 {strides = array<i32>} : memref<16x5xf32, #tpu.memory_space<vmem>>, vector<16x5xf32>,
    %c0_82 = arith.constant 0 : index
    %c0_83 = arith.constant 0 : index
    %181 = vector.load %arg7[%c0_82, %c0_83] : memref<5x5xf32, #tpu.memory_space<vmem>>, vector<5x5xf32>
    %182 = vector.shape_cast %181 : vector<5x5xf32> to vector<1x5x5xf32>
    %183 = tpu.iota {dimensions = array<i32: 2>} : vector<2x5x5xi32>
    %184 = tpu.iota {dimensions = array<i32: 1>} : vector<2x5xi32>
    %185 = vector.extract_strided_slice %179 {offsets = [0, 0], sizes = [2, 5], strides = [1, 1]} : vector<16x5xf32> to vector<2x5xf32>
    %c0_84 = arith.constant 0 : index
    %c0_85 = arith.constant 0 : index
    %186 = vector.load %arg8[%c0_84, %c0_85] : memref<1x5xf32, #tpu.memory_space<vmem>>, vector<1x5xf32>
    %187 = vector.broadcast %186 : vector<1x5xf32> to vector<2x5xf32>
    %188 = arith.addf %185, %187 : vector<2x5xf32>
    %189 = vector.shape_cast %188 : vector<2x5xf32> to vector<2x1x5xf32>
    %190 = vector.broadcast %189 : vector<2x1x5xf32> to vector<2x5x5xf32>
    %191 = vector.broadcast %182 : vector<1x5x5xf32> to vector<2x5x5xf32>
    %192 = arith.addf %190, %191 : vector<2x5x5xf32>
    %cst_86 = arith.constant dense<0xFF800000> : vector<2x5xf32>
    %193 = vector.multi_reduction <maximumf>, %192, %cst_86 [2] : vector<2x5x5xf32> to vector<2x5xf32>
    %194 = vector.shape_cast %193 : vector<2x5xf32> to vector<2x5x1xf32>
    %195 = vector.broadcast %194 : vector<2x5x1xf32> to vector<2x5x5xf32>
    %196 = arith.cmpf oge, %192, %195 : vector<2x5x5xf32>
    %c5_i32 = arith.constant 5 : i32
    %197 = vector.broadcast %c5_i32 : i32 to vector<2x5x5xi32>
    %198 = arith.select %196, %183, %197 : vector<2x5x5xi1>, vector<2x5x5xi32>
    %cst_87 = arith.constant dense<2147483647> : vector<2x5xi32>
    %199 = vector.multi_reduction <minsi>, %198, %cst_87 [2] : vector<2x5x5xi32> to vector<2x5xi32>
    %200 = vector.extract_strided_slice %179 {offsets = [2, 0], sizes = [2, 5], strides = [1, 1]} : vector<16x5xf32> to vector<2x5xf32>
    %201 = arith.addf %193, %200 : vector<2x5xf32>
    %202 = vector.shape_cast %201 : vector<2x5xf32> to vector<2x1x5xf32>
    %203 = vector.broadcast %202 : vector<2x1x5xf32> to vector<2x5x5xf32>
    %204 = vector.broadcast %182 : vector<1x5x5xf32> to vector<2x5x5xf32>
    %205 = arith.addf %203, %204 : vector<2x5x5xf32>
    %cst_88 = arith.constant dense<0xFF800000> : vector<2x5xf32>
    %206 = vector.multi_reduction <maximumf>, %205, %cst_88 [2] : vector<2x5x5xf32> to vector<2x5xf32>
    %207 = vector.shape_cast %206 : vector<2x5xf32> to vector<2x5x1xf32>
    %208 = vector.broadcast %207 : vector<2x5x1xf32> to vector<2x5x5xf32>
    %209 = arith.cmpf oge, %205, %208 : vector<2x5x5xf32>
    %c5_i32_89 = arith.constant 5 : i32
    %210 = vector.broadcast %c5_i32_89 : i32 to vector<2x5x5xi32>
    %211 = arith.select %209, %183, %210 : vector<2x5x5xi1>, vector<2x5x5xi32>
    %cst_90 = arith.constant dense<2147483647> : vector<2x5xi32>
    %212 = vector.multi_reduction <minsi>, %211, %cst_90 [2] : vector<2x5x5xi32> to vector<2x5xi32>
    %213 = vector.extract_strided_slice %179 {offsets = [4, 0], sizes = [2, 5], strides = [1, 1]} : vector<16x5xf32> to vector<2x5xf32>
    %214 = arith.addf %206, %213 : vector<2x5xf32>
    %215 = vector.shape_cast %214 : vector<2x5xf32> to vector<2x1x5xf32>
    %216 = vector.broadcast %215 : vector<2x1x5xf32> to vector<2x5x5xf32>
    %217 = vector.broadcast %182 : vector<1x5x5xf32> to vector<2x5x5xf32>
    %218 = arith.addf %216, %217 : vector<2x5x5xf32>
    %cst_91 = arith.constant dense<0xFF800000> : vector<2x5xf32>
    %219 = vector.multi_reduction <maximumf>, %218, %cst_91 [2] : vector<2x5x5xf32> to vector<2x5xf32>
    %220 = vector.shape_cast %219 : vector<2x5xf32> to vector<2x5x1xf32>
    %221 = vector.broadcast %220 : vector<2x5x1xf32> to vector<2x5x5xf32>
    %222 = arith.cmpf oge, %218, %221 : vector<2x5x5xf32>
    %c5_i32_92 = arith.constant 5 : i32
    %223 = vector.broadcast %c5_i32_92 : i32 to vector<2x5x5xi32>
    %224 = arith.select %222, %183, %223 : vector<2x5x5xi1>, vector<2x5x5xi32>
    %cst_93 = arith.constant dense<2147483647> : vector<2x5xi32>
    %225 = vector.multi_reduction <minsi>, %224, %cst_93 [2] : vector<2x5x5xi32> to vector<2x5xi32>
    %226 = vector.extract_strided_slice %179 {offsets = [6, 0], sizes = [2, 5], strides = [1, 1]} : vector<16x5xf32> to vector<2x5xf32>
    %227 = arith.addf %219, %226 : vector<2x5xf32>
    %228 = vector.shape_cast %227 : vector<2x5xf32> to vector<2x1x5xf32>
    %229 = vector.broadcast %228 : vector<2x1x5xf32> to vector<2x5x5xf32>
    %230 = vector.broadcast %182 : vector<1x5x5xf32> to vector<2x5x5xf32>
    %231 = arith.addf %229, %230 : vector<2x5x5xf32>
    %cst_94 = arith.constant dense<0xFF800000> : vector<2x5xf32>
    %232 = vector.multi_reduction <maximumf>, %231, %cst_94 [2] : vector<2x5x5xf32> to vector<2x5xf32>
    %233 = vector.shape_cast %232 : vector<2x5xf32> to vector<2x5x1xf32>
    %234 = vector.broadcast %233 : vector<2x5x1xf32> to vector<2x5x5xf32>
    %235 = arith.cmpf oge, %231, %234 : vector<2x5x5xf32>
    %c5_i32_95 = arith.constant 5 : i32
    %236 = vector.broadcast %c5_i32_95 : i32 to vector<2x5x5xi32>
    %237 = arith.select %235, %183, %236 : vector<2x5x5xi1>, vector<2x5x5xi32>
    %cst_96 = arith.constant dense<2147483647> : vector<2x5xi32>
    %238 = vector.multi_reduction <minsi>, %237, %cst_96 [2] : vector<2x5x5xi32> to vector<2x5xi32>
    %239 = vector.extract_strided_slice %179 {offsets = [8, 0], sizes = [2, 5], strides = [1, 1]} : vector<16x5xf32> to vector<2x5xf32>
    %240 = arith.addf %232, %239 : vector<2x5xf32>
    %241 = vector.shape_cast %240 : vector<2x5xf32> to vector<2x1x5xf32>
    %242 = vector.broadcast %241 : vector<2x1x5xf32> to vector<2x5x5xf32>
    %243 = vector.broadcast %182 : vector<1x5x5xf32> to vector<2x5x5xf32>
    %244 = arith.addf %242, %243 : vector<2x5x5xf32>
    %cst_97 = arith.constant dense<0xFF800000> : vector<2x5xf32>
    %245 = vector.multi_reduction <maximumf>, %244, %cst_97 [2] : vector<2x5x5xf32> to vector<2x5xf32>
    %246 = vector.shape_cast %245 : vector<2x5xf32> to vector<2x5x1xf32>
    %247 = vector.broadcast %246 : vector<2x5x1xf32> to vector<2x5x5xf32>
    %248 = arith.cmpf oge, %244, %247 : vector<2x5x5xf32>
    %c5_i32_98 = arith.constant 5 : i32
    %249 = vector.broadcast %c5_i32_98 : i32 to vector<2x5x5xi32>
    %250 = arith.select %248, %183, %249 : vector<2x5x5xi1>, vector<2x5x5xi32>
    %cst_99 = arith.constant dense<2147483647> : vector<2x5xi32>
    %251 = vector.multi_reduction <minsi>, %250, %cst_99 [2] : vector<2x5x5xi32> to vector<2x5xi32>
    %252 = vector.extract_strided_slice %179 {offsets = [10, 0], sizes = [2, 5], strides = [1, 1]} : vector<16x5xf32> to vector<2x5xf32>
    %253 = arith.addf %245, %252 : vector<2x5xf32>
    %254 = vector.shape_cast %253 : vector<2x5xf32> to vector<2x1x5xf32>
    %255 = vector.broadcast %254 : vector<2x1x5xf32> to vector<2x5x5xf32>
    %256 = vector.broadcast %182 : vector<1x5x5xf32> to vector<2x5x5xf32>
    %257 = arith.addf %255, %256 : vector<2x5x5xf32>
    %cst_100 = arith.constant dense<0xFF800000> : vector<2x5xf32>
    %258 = vector.multi_reduction <maximumf>, %257, %cst_100 [2] : vector<2x5x5xf32> to vector<2x5xf32>
    %259 = vector.shape_cast %258 : vector<2x5xf32> to vector<2x5x1xf32>
    %260 = vector.broadcast %259 : vector<2x5x1xf32> to vector<2x5x5xf32>
    %261 = arith.cmpf oge, %257, %260 : vector<2x5x5xf32>
    %c5_i32_101 = arith.constant 5 : i32
    %262 = vector.broadcast %c5_i32_101 : i32 to vector<2x5x5xi32>
    %263 = arith.select %261, %183, %262 : vector<2x5x5xi1>, vector<2x5x5xi32>
    %cst_102 = arith.constant dense<2147483647> : vector<2x5xi32>
    %264 = vector.multi_reduction <minsi>, %263, %cst_102 [2] : vector<2x5x5xi32> to vector<2x5xi32>
    %265 = vector.extract_strided_slice %179 {offsets = [12, 0], sizes = [2, 5], strides = [1, 1]} : vector<16x5xf32> to vector<2x5xf32>
    %266 = arith.addf %258, %265 : vector<2x5xf32>
    %267 = vector.shape_cast %266 : vector<2x5xf32> to vector<2x1x5xf32>
    %268 = vector.broadcast %267 : vector<2x1x5xf32> to vector<2x5x5xf32>
    %269 = vector.broadcast %182 : vector<1x5x5xf32> to vector<2x5x5xf32>
    %270 = arith.addf %268, %269 : vector<2x5x5xf32>
    %cst_103 = arith.constant dense<0xFF800000> : vector<2x5xf32>
    %271 = vector.multi_reduction <maximumf>, %270, %cst_103 [2] : vector<2x5x5xf32> to vector<2x5xf32>
    %272 = vector.shape_cast %271 : vector<2x5xf32> to vector<2x5x1xf32>
    %273 = vector.broadcast %272 : vector<2x5x1xf32> to vector<2x5x5xf32>
    %274 = arith.cmpf oge, %270, %273 : vector<2x5x5xf32>
    %c5_i32_104 = arith.constant 5 : i32
    %275 = vector.broadcast %c5_i32_104 : i32 to vector<2x5x5xi32>
    %276 = arith.select %274, %183, %275 : vector<2x5x5xi1>, vector<2x5x5xi32>
    %cst_105 = arith.constant dense<2147483647> : vector<2x5xi32>
    %277 = vector.multi_reduction <minsi>, %276, %cst_105 [2] : vector<2x5x5xi32> to vector<2x5xi32>
    %278 = vector.extract_strided_slice %179 {offsets = [14, 0], sizes = [2, 5], strides = [1, 1]} : vector<16x5xf32> to vector<2x5xf32>
    %279 = arith.addf %271, %278 : vector<2x5xf32>
    %c0_106 = arith.constant 0 : index
    %c0_107 = arith.constant 0 : index
    %280 = vector.load %arg9[%c0_106, %c0_107] : memref<1x5xf32, #tpu.memory_space<vmem>>, vector<1x5xf32>
    %281 = vector.broadcast %280 : vector<1x5xf32> to vector<2x5xf32>
    %282 = arith.addf %279, %281 : vector<2x5xf32>
    %cst_108 = arith.constant dense<0xFF800000> : vector<2xf32>
    %283 = vector.multi_reduction <maximumf>, %282, %cst_108 [1] : vector<2x5xf32> to vector<2xf32>
    %284 = vector.shape_cast %283 : vector<2xf32> to vector<2x1xf32>
    %285 = vector.broadcast %284 : vector<2x1xf32> to vector<2x5xf32>
    %286 = arith.cmpf oge, %282, %285 : vector<2x5xf32>
    %c5_i32_109 = arith.constant 5 : i32
    %287 = vector.broadcast %c5_i32_109 : i32 to vector<2x5xi32>
    %288 = arith.select %286, %184, %287 : vector<2x5xi1>, vector<2x5xi32>
    %cst_110 = arith.constant dense<2147483647> : vector<2xi32>
    %289 = vector.multi_reduction <minsi>, %288, %cst_110 [1] : vector<2x5xi32> to vector<2xi32>
    %290 = vector.shape_cast %289 : vector<2xi32> to vector<2x1xi32>
    %291 = tpu.iota {dimensions = array<i32: 1>} : vector<2x8xi32>
    %c7_i32 = arith.constant 7 : i32
    %292 = vector.broadcast %c7_i32 : i32 to vector<2x8xi32>
    %293 = arith.cmpi eq, %291, %292 : vector<2x8xi32>
    %c0_i32 = arith.constant 0 : i32
    %294 = vector.broadcast %c0_i32 : i32 to vector<2x8xi32>
    %295 = vector.shape_cast %290 : vector<2x1xi32> to vector<2x1xi32>
    %296 = vector.broadcast %295 : vector<2x1xi32> to vector<2x8xi32>
    %297 = arith.select %293, %296, %294 : vector<2x8xi1>, vector<2x8xi32>
    %298 = vector.broadcast %290 : vector<2x1xi32> to vector<2x5xi32>
    %299 = arith.cmpi eq, %184, %298 : vector<2x5xi32>
    %c0_i32_111 = arith.constant 0 : i32
    %300 = vector.broadcast %c0_i32_111 : i32 to vector<2x5xi32>
    %301 = arith.select %299, %277, %300 : vector<2x5xi1>, vector<2x5xi32>
    %cst_112 = arith.constant dense<0> : vector<2xi32>
    %302 = vector.multi_reduction <add>, %301, %cst_112 [1] : vector<2x5xi32> to vector<2xi32>
    %303 = vector.shape_cast %302 : vector<2xi32> to vector<2x1xi32>
    %c6_i32 = arith.constant 6 : i32
    %304 = vector.broadcast %c6_i32 : i32 to vector<2x8xi32>
    %305 = arith.cmpi eq, %291, %304 : vector<2x8xi32>
    %306 = vector.shape_cast %303 : vector<2x1xi32> to vector<2x1xi32>
    %307 = vector.broadcast %306 : vector<2x1xi32> to vector<2x8xi32>
    %308 = arith.select %305, %307, %297 : vector<2x8xi1>, vector<2x8xi32>
    %309 = vector.broadcast %303 : vector<2x1xi32> to vector<2x5xi32>
    %310 = arith.cmpi eq, %184, %309 : vector<2x5xi32>
    %c0_i32_113 = arith.constant 0 : i32
    %311 = vector.broadcast %c0_i32_113 : i32 to vector<2x5xi32>
    %312 = arith.select %310, %264, %311 : vector<2x5xi1>, vector<2x5xi32>
    %cst_114 = arith.constant dense<0> : vector<2xi32>
    %313 = vector.multi_reduction <add>, %312, %cst_114 [1] : vector<2x5xi32> to vector<2xi32>
    %314 = vector.shape_cast %313 : vector<2xi32> to vector<2x1xi32>
    %c5_i32_115 = arith.constant 5 : i32
    %315 = vector.broadcast %c5_i32_115 : i32 to vector<2x8xi32>
    %316 = arith.cmpi eq, %291, %315 : vector<2x8xi32>
    %317 = vector.shape_cast %314 : vector<2x1xi32> to vector<2x1xi32>
    %318 = vector.broadcast %317 : vector<2x1xi32> to vector<2x8xi32>
    %319 = arith.select %316, %318, %308 : vector<2x8xi1>, vector<2x8xi32>
    %320 = vector.broadcast %314 : vector<2x1xi32> to vector<2x5xi32>
    %321 = arith.cmpi eq, %184, %320 : vector<2x5xi32>
    %c0_i32_116 = arith.constant 0 : i32
    %322 = vector.broadcast %c0_i32_116 : i32 to vector<2x5xi32>
    %323 = arith.select %321, %251, %322 : vector<2x5xi1>, vector<2x5xi32>
    %cst_117 = arith.constant dense<0> : vector<2xi32>
    %324 = vector.multi_reduction <add>, %323, %cst_117 [1] : vector<2x5xi32> to vector<2xi32>
    %325 = vector.shape_cast %324 : vector<2xi32> to vector<2x1xi32>
    %c4_i32 = arith.constant 4 : i32
    %326 = vector.broadcast %c4_i32 : i32 to vector<2x8xi32>
    %327 = arith.cmpi eq, %291, %326 : vector<2x8xi32>
    %328 = vector.shape_cast %325 : vector<2x1xi32> to vector<2x1xi32>
    %329 = vector.broadcast %328 : vector<2x1xi32> to vector<2x8xi32>
    %330 = arith.select %327, %329, %319 : vector<2x8xi1>, vector<2x8xi32>
    %331 = vector.broadcast %325 : vector<2x1xi32> to vector<2x5xi32>
    %332 = arith.cmpi eq, %184, %331 : vector<2x5xi32>
    %c0_i32_118 = arith.constant 0 : i32
    %333 = vector.broadcast %c0_i32_118 : i32 to vector<2x5xi32>
    %334 = arith.select %332, %238, %333 : vector<2x5xi1>, vector<2x5xi32>
    %cst_119 = arith.constant dense<0> : vector<2xi32>
    %335 = vector.multi_reduction <add>, %334, %cst_119 [1] : vector<2x5xi32> to vector<2xi32>
    %336 = vector.shape_cast %335 : vector<2xi32> to vector<2x1xi32>
    %c3_i32 = arith.constant 3 : i32
    %337 = vector.broadcast %c3_i32 : i32 to vector<2x8xi32>
    %338 = arith.cmpi eq, %291, %337 : vector<2x8xi32>
    %339 = vector.shape_cast %336 : vector<2x1xi32> to vector<2x1xi32>
    %340 = vector.broadcast %339 : vector<2x1xi32> to vector<2x8xi32>
    %341 = arith.select %338, %340, %330 : vector<2x8xi1>, vector<2x8xi32>
    %342 = vector.broadcast %336 : vector<2x1xi32> to vector<2x5xi32>
    %343 = arith.cmpi eq, %184, %342 : vector<2x5xi32>
    %c0_i32_120 = arith.constant 0 : i32
    %344 = vector.broadcast %c0_i32_120 : i32 to vector<2x5xi32>
    %345 = arith.select %343, %225, %344 : vector<2x5xi1>, vector<2x5xi32>
    %cst_121 = arith.constant dense<0> : vector<2xi32>
    %346 = vector.multi_reduction <add>, %345, %cst_121 [1] : vector<2x5xi32> to vector<2xi32>
    %347 = vector.shape_cast %346 : vector<2xi32> to vector<2x1xi32>
    %c2_i32 = arith.constant 2 : i32
    %348 = vector.broadcast %c2_i32 : i32 to vector<2x8xi32>
    %349 = arith.cmpi eq, %291, %348 : vector<2x8xi32>
    %350 = vector.shape_cast %347 : vector<2x1xi32> to vector<2x1xi32>
    %351 = vector.broadcast %350 : vector<2x1xi32> to vector<2x8xi32>
    %352 = arith.select %349, %351, %341 : vector<2x8xi1>, vector<2x8xi32>
    %353 = vector.broadcast %347 : vector<2x1xi32> to vector<2x5xi32>
    %354 = arith.cmpi eq, %184, %353 : vector<2x5xi32>
    %c0_i32_122 = arith.constant 0 : i32
    %355 = vector.broadcast %c0_i32_122 : i32 to vector<2x5xi32>
    %356 = arith.select %354, %212, %355 : vector<2x5xi1>, vector<2x5xi32>
    %cst_123 = arith.constant dense<0> : vector<2xi32>
    %357 = vector.multi_reduction <add>, %356, %cst_123 [1] : vector<2x5xi32> to vector<2xi32>
    %358 = vector.shape_cast %357 : vector<2xi32> to vector<2x1xi32>
    %c1_i32 = arith.constant 1 : i32
    %359 = vector.broadcast %c1_i32 : i32 to vector<2x8xi32>
    %360 = arith.cmpi eq, %291, %359 : vector<2x8xi32>
    %361 = vector.shape_cast %358 : vector<2x1xi32> to vector<2x1xi32>
    %362 = vector.broadcast %361 : vector<2x1xi32> to vector<2x8xi32>
    %363 = arith.select %360, %362, %352 : vector<2x8xi1>, vector<2x8xi32>
    %364 = vector.broadcast %358 : vector<2x1xi32> to vector<2x5xi32>
    %365 = arith.cmpi eq, %184, %364 : vector<2x5xi32>
    %c0_i32_124 = arith.constant 0 : i32
    %366 = vector.broadcast %c0_i32_124 : i32 to vector<2x5xi32>
    %367 = arith.select %365, %199, %366 : vector<2x5xi1>, vector<2x5xi32>
    %cst_125 = arith.constant dense<0> : vector<2xi32>
    %368 = vector.multi_reduction <add>, %367, %cst_125 [1] : vector<2x5xi32> to vector<2xi32>
    %369 = vector.shape_cast %368 : vector<2xi32> to vector<2x1xi32>
    %c0_i32_126 = arith.constant 0 : i32
    %370 = vector.broadcast %c0_i32_126 : i32 to vector<2x8xi32>
    %371 = arith.cmpi eq, %291, %370 : vector<2x8xi32>
    %372 = vector.shape_cast %369 : vector<2x1xi32> to vector<2x1xi32>
    %373 = vector.broadcast %372 : vector<2x1xi32> to vector<2x8xi32>
    %374 = arith.select %371, %373, %363 : vector<2x8xi1>, vector<2x8xi32>
    %c0_127 = arith.constant 0 : index
    %c0_128 = arith.constant 0 : index
    %375 = vector.load %arg10[%c0_127, %c0_128] : memref<2x8xi32, #tpu.memory_space<vmem>>, vector<2x8xi32>
    tpu.vector_store %arg10[%c0_127, %c0_128], %374 {strides = array<i32>} : memref<2x8xi32, #tpu.memory_space<vmem>>, vector<2x8xi32>,
    return
  }
}

</mosaic_0001>

<bundles_post_ra>
// kernel: bilstm_crf_forward.1
= control target key start
LH: loop header
LB: loop body
LE: loop exit
PB: predicated region body
PF: predicated region fallthrough
CT: control target
= control target key end

     0   :  { %vm51_vm0 = vcmask 261120   ;;  %v3797_v6 = vmov 0.0|0.0   ;;  %vm3798_vm1 = vmmov 0   ;;  %v3799_v11 = vmov 0.0   ;;  %s5151_s0 = inlined_call_operand.vmem [shape: f32[16,32], index: 0, kind: input, shape index: {}]   ;;  %s5152_s1 = inlined_call_operand.vmem [shape: f32[32,128], index: 1, kind: input, shape index: {}]   ;;  %s5153_s2 = inlined_call_operand.vmem [shape: f32[1,128], index: 2, kind: input, shape index: {}]   ;;  %s5154_s3 = inlined_call_operand.vmem [shape: f32[32,128], index: 3, kind: input, shape index: {}]   ;;  %s5155_s4 = inlined_call_operand.vmem [shape: f32[32,5], index: 4, kind: input, shape index: {}]   ;;  %s5156_s5 = inlined_call_operand.vmem [shape: f32[32,5], index: 5, kind: input, shape index: {}]   ;;  %s5157_s6 = inlined_call_operand.vmem [shape: f32[1,5], index: 6, kind: input, shape index: {}]   ;;  %s5158_s7 = inlined_call_operand.vmem [shape: f32[5,5], index: 7, kind: input, shape index: {}]   ;;  %s5159_s8 = inlined_call_operand.vmem [shape: f32[1,5], index: 8, kind: input, shape index: {}]   ;;  %s5160_s9 = inlined_call_operand.vmem [shape: f32[1,5], index: 9, kind: input, shape index: {}]   ;;  %s5161_s10 = inlined_call_operand.hbm [shape: s32[2,8], index: 10, kind: output, shape index: {0}]   ;;  %s5162_s11 = inlined_call_operand.vmem [shape: f32[16,5], index: 11, kind: output, shape index: {1}]  }
   0x1   :  { %v40_v0 = vld [vmem:[%s5152_s1] sm:$0xff]  ;;  %v41_v1 = vld [vmem:[%s5152_s1 + $0x8] sm:$0xff]  ;;  %v42_v2 = vld [vmem:[%s5152_s1 + $0x10] sm:$0xff]  ;;  %3633 = vmatprep.subr.bf16.mxu1 %v3797_v6  ;;  %3523 = vmatprep.mubr.msk.f32.mxu1 %vm3798_vm1, %v3799_v11 }
   0x2   :  { %v3625_v3 = vpack.c.bf16 %v41_v1, %v40_v0  ;;  %v43_v4 = vld [vmem:[%s5152_s1 + $0x18] sm:$0xff]  ;;  %v38_v5 = vld [vmem:[%s5151_s0] sm:$0xff]  ;;  %v136_v9 = vld [vmem:[%s5154_s3 + $0x8] sm:$0xff] }
   0x3   :  { %v3629_v7 = vpack.c.bf16 %v43_v4, %v42_v2  ;;  %3512 = vmatprep.mubr.msk.f32.mxu0 %vm51_vm0, %v38_v5  ;;  %v135_v8 = vld [vmem:[%s5154_s3] sm:$0xff]  ;;  %v137_v10 = vld [vmem:[%s5154_s3 + $0x10] sm:$0xff]  ;;  %v138_v13 = vld [vmem:[%s5154_s3 + $0x18] sm:$0xff] }
   0x4   :  { %3626 = vmatprep.subr.bf16.mxu0 %v3625_v3  ;;  %v3893_v12 = vpack.c.bf16 %v136_v9, %v135_v8 }
   0x5   :  { %17 = vsyncpa [#allocation6], 0  ;;  %3628 = vmatpush3.bf16.msra.mxu0 %v3625_v3  ;;  %v3899_v14 = vpack.c.bf16 %v138_v13, %v137_v10  ;;  %v39_v15 = vld [vmem:[%s5151_s0 + $0x8] sm:$0xff]  ;;  %v3421_v16 = vld [vmem:[%s5153_s2] ss:$0 sm:$0xff]  ;;  %s3800_s17 = smov 64  }
   0x6   :  { %3630 = vmatprep.subr.bf16.mxu0 %v3629_v7  ;;  %3635 = vmatpush3.bf16.msra.mxu1 %v3893_v12  ;;  %s3801_s2 = smov 32   ;;  %vm242_vm2 = vcmask 254976   ;;  %vm1156_vm3 = vcmask 39936   ;;  %vm1205_vm4 = vcmask 36864   ;;  %vm1396_vm5 = vcmask 1041409  }
   0x7   :  { %3636 = vmatprep.subr.bf16.mxu1 %v3797_v6  ;;  %vm1398_vm6 = vcmask 1042434   ;;  %vm1400_vm7 = vcmask 1043459   ;;  %vm1402_vm8 = vcmask 1044484   ;;  %vm3168_vm9 = vcmask 33792  }
   0x9   :  { %3632 = vmatpush3.bf16.msra.mxu0 %v3629_v7 }
   0xa   :  { %3638 = vmatpush3.bf16.msra.mxu1 %v3899_v14  ;;  %3639 = vmatprep.subr.bf16.mxu0 %v3797_v6 }
   0xb   :  { %3645 = vmatprep.subr.bf16.mxu1 %v3797_v6 }
   0xc   :  { %3513 = vmatmul.mubr.msk.f32.vlgmr.msra.gmra.mrb[0].mxu0 %vm51_vm0, %v39_v15 }
   0xd   :  { %3524 = vmatmul.mubr.f32.vlgmr.msra.gmra.mrb[0].mxu1 %v3799_v11  ;;  %3641 = vmatpush3.bf16.msra.mxu0 %v3893_v12 }
   0xe   :  { %3642 = vmatprep.subr.bf16.mxu0 %v3797_v6  ;;  %3534 = vmatprep.mubr.msk.f32.mxu0 %vm3798_vm1, %v3799_v11 }
   0xf   :  { %3647 = vmatpush3.bf16.msra.mxu1 %v3893_v12  ;;  %3545 = vmatprep.mubr.msk.f32.mxu1 %vm3798_vm1, %v3799_v11 }
  0x10   :  { %3648 = vmatprep.subr.bf16.mxu1 %v3797_v6 }
  0x11   :  { %3644 = vmatpush3.bf16.msra.mxu0 %v3899_v14 }
  0x12   :  { %3651 = vmatprep.subr.bf16.mxu0 %v3797_v6 }
  0x13   :  { %3650 = vmatpush3.bf16.msra.mxu1 %v3899_v14 }
  0x14   :  { %3657 = vmatprep.subr.bf16.mxu1 %v3797_v6 }
  0xdf   :  { %v3514_v17 = vpop.f32.mrb[0].mxu0 }
  0xe0   :  { %v130_v18 = vadd.f32 %v3514_v17, %v3421_v16  ;;  %v124_v19 = vpop.f32.mrb[1].mxu0  ;;  %v209_v20 = vpop.f32.mrb[0].mxu1 }
  0xe1   :  { %v125_v21 = vadd.f32 %v3421_v16, %v124_v19  ;;  %v3525_v22 = vpop.f32.mrb[1].mxu1 }
  0xe2   :  { %134 = vst [vmem:[#allocation2 + $0x8] sm:$0xff] %v130_v18 }
  0xe3   :  { %133 = vst [vmem:[#allocation2] sm:$0xff] %v125_v21 }
  0xea   :  { %v139_v23 = vld [vmem:[#allocation2] sm:$0x3]  ;;  %v245_v39 = vld [vmem:[#allocation2 + $0x2] sm:$0x3]  ;;  %v349_v57 = vld [vmem:[#allocation2 + $0x4] sm:$0x3] }
  0xeb   :  { %v213_v24 = vadd.f32 %v209_v20, %v139_v23  ;;  %v453_v15 = vld [vmem:[#allocation2 + $0x6] sm:$0x3] }
  0xed   :  { %3709 = vtanh.f32 %v213_v24  ;;  %v3424_v26 = vmul.f32 -1.442695, %v213_v24 }
  0xef   :  { %3711 = vpow2.f32 %v3424_v26 }
  0xf7   :  { %v3710_v25 = vpop.eup %3709 }
  0xf8   :  { %223 = vrot.lane.b32.xlu0 %v3710_v25, %s3800_s17 }
  0xf9   :  { %v3712_v27 = vpop.eup %3711 }
  0xfa   :  { %v217_v28 = vadd.f32 1.0, %v3712_v27 }
  0xfc   :  { %3713 = vrcp.f32 %v217_v28 }
 0x106   :  { %v3714_v29 = vpop.eup %3713 }
 0x107   :  { %v221_v32 = vmul.f32 0.0, %v3714_v29 }
 0x16a   :  { %v224_v30 = vpop.permute.xlu0 %223 }
 0x16b   :  { %v226_v31 = vmul.f32 %v3714_v29, %v224_v30 }
 0x16d   :  { %228 = vrot.lane.b32.xlu0 %v226_v31, %s3801_s2 }
 0x1df   :  { %v229_v33 = vpop.permute.xlu0 %228 }
 0x1e0   :  { %v231_v34 = vadd.f32 %v229_v33, %v221_v32  ;;  %v557_v33 = vld [vmem:[#allocation2 + $0x8] sm:$0x3] }
 0x1e2   :  { %3715 = vtanh.f32 %v231_v34 }
 0x1ec   :  { %v3716_v35 = vpop.eup %3715 }
 0x1ed   :  { %234 = vrot.lane.b32.xlu1 %v3716_v35, %s3800_s17 }
 0x25f   :  { %v235_v36 = vpop.permute.xlu1 %234 }
 0x260   :  { %v237_v37 = vmul.f32 %v3714_v29, %v235_v36 }
 0x262   :  { %239 = vrot.lane.b32.xlu1 %v237_v37, %s3801_s2 }
 0x2d4   :  { %v240_v38 = vpop.permute.xlu1 %239 }
 0x2d5   :  { %243 = vst.msk [vmem:[#allocation3] sm:$0x3] %vm242_vm2, %v240_v38  ;;  %244 = vst.msk [vmem:[#allocation4 + $0xe] sm:$0x3] %vm242_vm2, %v240_v38  ;;  %3535 = vmatmul.mubr.msk.f32.vlgmr.msra.gmra.mrb[2].mxu0 %vm51_vm0, %v240_v38 }
 0x2d6   :  { %3653 = vmatpush3.bf16.msra.mxu0 %v3893_v12  ;;  %3556 = vmatprep.mubr.msk.f32.mxu0 %vm3798_vm1, %v3799_v11 }
 0x2d7   :  { %3654 = vmatprep.subr.bf16.mxu0 %v3797_v6 }
 0x2da   :  { %3656 = vmatpush3.bf16.msra.mxu0 %v3899_v14 }
 0x2db   :  { %3663 = vmatprep.subr.bf16.mxu0 %v3797_v6 }
 0x3a8   :  { %v314_v40 = vpop.f32.mrb[2].mxu0 }
 0x3a9   :  { %v318_v41 = vadd.f32 %v314_v40, %v245_v39  ;;  %v3536_v42 = vpop.f32.mrb[3].mxu0 }
 0x3ab   :  { %3717 = vtanh.f32 %v318_v41  ;;  %v3426_v44 = vmul.f32 -1.442695, %v318_v41 }
 0x3ad   :  { %3719 = vpow2.f32 %v3426_v44 }
 0x3b5   :  { %v3718_v43 = vpop.eup %3717 }
 0x3b6   :  { %328 = vrot.lane.b32.xlu0 %v3718_v43, %s3800_s17 }
 0x3b7   :  { %v3720_v45 = vpop.eup %3719 }
 0x3b8   :  { %v322_v46 = vadd.f32 1.0, %v3720_v45 }
 0x3ba   :  { %3721 = vrcp.f32 %v322_v46 }
 0x3c4   :  { %v3722_v47 = vpop.eup %3721 }
 0x3c5   :  { %v326_v50 = vmul.f32 %v3722_v47, %v231_v34 }
 0x428   :  { %v329_v48 = vpop.permute.xlu0 %328 }
 0x429   :  { %v331_v49 = vmul.f32 %v3722_v47, %v329_v48 }
 0x42b   :  { %333 = vrot.lane.b32.xlu1 %v331_v49, %s3801_s2 }
 0x49d   :  { %v334_v51 = vpop.permute.xlu1 %333 }
 0x49e   :  { %v336_v52 = vadd.f32 %v334_v51, %v326_v50  ;;  %v661_v51 = vld [vmem:[#allocation2 + $0xa] sm:$0x3] }
 0x4a0   :  { %3723 = vtanh.f32 %v336_v52 }
 0x4aa   :  { %v3724_v53 = vpop.eup %3723 }
 0x4ab   :  { %339 = vrot.lane.b32.xlu0 %v3724_v53, %s3800_s17 }
 0x51d   :  { %v340_v54 = vpop.permute.xlu0 %339 }
 0x51e   :  { %v342_v55 = vmul.f32 %v3722_v47, %v340_v54 }
 0x520   :  { %344 = vrot.lane.b32.xlu1 %v342_v55, %s3801_s2 }
 0x592   :  { %v345_v56 = vpop.permute.xlu1 %344 }
 0x593   :  { %347 = vst.msk [vmem:[#allocation3 + $0x2] sm:$0x3] %vm242_vm2, %v345_v56  ;;  %348 = vst.msk [vmem:[#allocation4 + $0xc] sm:$0x3] %vm242_vm2, %v345_v56  ;;  %3546 = vmatmul.mubr.msk.f32.vlgmr.msra.gmra.mrb[2].mxu1 %vm51_vm0, %v345_v56 }
 0x594   :  { %3659 = vmatpush3.bf16.msra.mxu1 %v3893_v12  ;;  %3567 = vmatprep.mubr.msk.f32.mxu1 %vm3798_vm1, %v3799_v11 }
 0x595   :  { %3660 = vmatprep.subr.bf16.mxu1 %v3797_v6 }
 0x598   :  { %3662 = vmatpush3.bf16.msra.mxu1 %v3899_v14 }
 0x599   :  { %3669 = vmatprep.subr.bf16.mxu1 %v3797_v6 }
 0x666   :  { %v418_v58 = vpop.f32.mrb[2].mxu1 }
 0x667   :  { %v422_v59 = vadd.f32 %v418_v58, %v349_v57  ;;  %v3547_v60 = vpop.f32.mrb[3].mxu1 }
 0x669   :  { %3725 = vtanh.f32 %v422_v59  ;;  %v3428_v62 = vmul.f32 -1.442695, %v422_v59 }
 0x66b   :  { %3727 = vpow2.f32 %v3428_v62 }
 0x673   :  { %v3726_v61 = vpop.eup %3725 }
 0x674   :  { %432 = vrot.lane.b32.xlu0 %v3726_v61, %s3800_s17 }
 0x675   :  { %v3728_v63 = vpop.eup %3727 }
 0x676   :  { %v426_v0 = vadd.f32 1.0, %v3728_v63 }
 0x678   :  { %3729 = vrcp.f32 %v426_v0 }
 0x682   :  { %v3730_v1 = vpop.eup %3729 }
 0x683   :  { %v430_v4 = vmul.f32 %v3730_v1, %v336_v52 }
 0x6e6   :  { %v433_v2 = vpop.permute.xlu0 %432 }
 0x6e7   :  { %v435_v3 = vmul.f32 %v3730_v1, %v433_v2 }
 0x6e9   :  { %437 = vrot.lane.b32.xlu1 %v435_v3, %s3801_s2 }
 0x75b   :  { %v438_v5 = vpop.permute.xlu1 %437 }
 0x75c   :  { %v440_v7 = vadd.f32 %v438_v5, %v430_v4 }
 0x75e   :  { %3731 = vtanh.f32 %v440_v7 }
 0x768   :  { %v3732_v8 = vpop.eup %3731 }
 0x769   :  { %443 = vrot.lane.b32.xlu0 %v3732_v8, %s3800_s17 }
 0x7db   :  { %v444_v9 = vpop.permute.xlu0 %443 }
 0x7dc   :  { %v446_v10 = vmul.f32 %v3730_v1, %v444_v9  ;;  %v765_v1 = vld [vmem:[#allocation2 + $0xc] sm:$0x3] }
 0x7de   :  { %448 = vrot.lane.b32.xlu1 %v446_v10, %s3801_s2 }
 0x850   :  { %v449_v13 = vpop.permute.xlu1 %448 }
 0x851   :  { %451 = vst.msk [vmem:[#allocation3 + $0x4] sm:$0x3] %vm242_vm2, %v449_v13  ;;  %452 = vst.msk [vmem:[#allocation4 + $0xa] sm:$0x3] %vm242_vm2, %v449_v13  ;;  %3557 = vmatmul.mubr.msk.f32.vlgmr.msra.gmra.mrb[4].mxu0 %vm51_vm0, %v449_v13 }
 0x852   :  { %3665 = vmatpush3.bf16.msra.mxu0 %v3893_v12  ;;  %3578 = vmatprep.mubr.msk.f32.mxu0 %vm3798_vm1, %v3799_v11 }
 0x853   :  { %3666 = vmatprep.subr.bf16.mxu0 %v3797_v6 }
 0x856   :  { %3668 = vmatpush3.bf16.msra.mxu0 %v3899_v14 }
 0x857   :  { %3675 = vmatprep.subr.bf16.mxu0 %v3797_v6 }
 0x924   :  { %v522_v16 = vpop.f32.mrb[4].mxu0 }
 0x925   :  { %v526_v17 = vadd.f32 %v522_v16, %v453_v15  ;;  %v3558_v18 = vpop.f32.mrb[5].mxu0 }
 0x927   :  { %3733 = vtanh.f32 %v526_v17  ;;  %v3430_v20 = vmul.f32 -1.442695, %v526_v17 }
 0x929   :  { %3735 = vpow2.f32 %v3430_v20 }
 0x931   :  { %v3734_v19 = vpop.eup %3733 }
 0x932   :  { %536 = vrot.lane.b32.xlu0 %v3734_v19, %s3800_s17 }
 0x933   :  { %v3736_v21 = vpop.eup %3735 }
 0x934   :  { %v530_v22 = vadd.f32 1.0, %v3736_v21 }
 0x936   :  { %3737 = vrcp.f32 %v530_v22 }
 0x940   :  { %v3738_v23 = vpop.eup %3737 }
 0x941   :  { %v534_v26 = vmul.f32 %v3738_v23, %v440_v7 }
 0x9a4   :  { %v537_v24 = vpop.permute.xlu0 %536 }
 0x9a5   :  { %v539_v25 = vmul.f32 %v3738_v23, %v537_v24 }
 0x9a7   :  { %541 = vrot.lane.b32.xlu1 %v539_v25, %s3801_s2 }
 0xa19   :  { %v542_v27 = vpop.permute.xlu1 %541 }
 0xa1a   :  { %v544_v28 = vadd.f32 %v542_v27, %v534_v26 }
 0xa1c   :  { %3739 = vtanh.f32 %v544_v28 }
 0xa26   :  { %v3740_v29 = vpop.eup %3739 }
 0xa27   :  { %547 = vrot.lane.b32.xlu0 %v3740_v29, %s3800_s17 }
 0xa99   :  { %v548_v30 = vpop.permute.xlu0 %547 }
 0xa9a   :  { %v550_v31 = vmul.f32 %v3738_v23, %v548_v30  ;;  %v869_v23 = vld [vmem:[#allocation2 + $0xe] sm:$0x3] }
 0xa9c   :  { %552 = vrot.lane.b32.xlu1 %v550_v31, %s3801_s2 }
 0xb0e   :  { %v553_v32 = vpop.permute.xlu1 %552 }
 0xb0f   :  { %555 = vst.msk [vmem:[#allocation3 + $0x6] sm:$0x3] %vm242_vm2, %v553_v32  ;;  %556 = vst.msk [vmem:[#allocation4 + $0x8] sm:$0x3] %vm242_vm2, %v553_v32  ;;  %3568 = vmatmul.mubr.msk.f32.vlgmr.msra.gmra.mrb[4].mxu1 %vm51_vm0, %v553_v32 }
 0xb10   :  { %3671 = vmatpush3.bf16.msra.mxu1 %v3893_v12  ;;  %3589 = vmatprep.mubr.msk.f32.mxu1 %vm3798_vm1, %v3799_v11 }
 0xb11   :  { %3672 = vmatprep.subr.bf16.mxu1 %v3797_v6 }
 0xb14   :  { %3674 = vmatpush3.bf16.msra.mxu1 %v3899_v14 }
 0xbe2   :  { %v626_v34 = vpop.f32.mrb[4].mxu1 }
 0xbe3   :  { %v630_v35 = vadd.f32 %v626_v34, %v557_v33  ;;  %v3569_v36 = vpop.f32.mrb[5].mxu1 }
 0xbe5   :  { %3741 = vtanh.f32 %v630_v35  ;;  %v3432_v38 = vmul.f32 -1.442695, %v630_v35 }
 0xbe7   :  { %3743 = vpow2.f32 %v3432_v38  ;;  %v981_v38 = vld [vmem:[%s5156_s5] sm:$0xff] }
 0xbef   :  { %v3742_v37 = vpop.eup %3741 }
 0xbf0   :  { %640 = vrot.lane.b32.xlu0 %v3742_v37, %s3800_s17 }
 0xbf1   :  { %v3744_v39 = vpop.eup %3743 }
 0xbf2   :  { %v634_v40 = vadd.f32 1.0, %v3744_v39  ;;  %v982_v39 = vld [vmem:[%s5156_s5 + $0x8] sm:$0xff] }
 0xbf4   :  { %3745 = vrcp.f32 %v634_v40  ;;  %v983_v40 = vld [vmem:[%s5156_s5 + $0x10] sm:$0xff] }
 0xbfe   :  { %v3746_v41 = vpop.eup %3745 }
 0xbff   :  { %v638_v44 = vmul.f32 %v3746_v41, %v544_v28 }
 0xc62   :  { %v641_v42 = vpop.permute.xlu0 %640 }
 0xc63   :  { %v643_v43 = vmul.f32 %v3746_v41, %v641_v42  ;;  %v984_v42 = vld [vmem:[%s5156_s5 + $0x18] sm:$0xff] }
 0xc65   :  { %645 = vrot.lane.b32.xlu1 %v643_v43, %s3801_s2  ;;  %v3685_v43 = vpack.c.bf16 %v984_v42, %v983_v40 }
 0xcd7   :  { %v646_v45 = vpop.permute.xlu1 %645 }
 0xcd8   :  { %v648_v46 = vadd.f32 %v646_v45, %v638_v44  ;;  %v975_v44 = vld [vmem:[%s5155_s4] sm:$0xff]  ;;  %v976_v45 = vld [vmem:[%s5155_s4 + $0x8] sm:$0xff] }
 0xcda   :  { %3747 = vtanh.f32 %v648_v46 }
 0xce4   :  { %v3748_v47 = vpop.eup %3747 }
 0xce5   :  { %651 = vrot.lane.b32.xlu0 %v3748_v47, %s3800_s17 }
 0xd57   :  { %v652_v48 = vpop.permute.xlu0 %651 }
 0xd58   :  { %v654_v49 = vmul.f32 %v3746_v41, %v652_v48  ;;  %v3681_v41 = vpack.c.bf16 %v982_v39, %v981_v38 }
 0xd5a   :  { %656 = vrot.lane.b32.xlu1 %v654_v49, %s3801_s2  ;;  %3682 = vmatprep.subr.bf16.mxu1 %v3681_v41  ;;  %v1160_v49 = vlaneseq }
 0xdcc   :  { %v657_v50 = vpop.permute.xlu1 %656 }
 0xdcd   :  { %659 = vst.msk [vmem:[#allocation3 + $0x8] sm:$0x3] %vm242_vm2, %v657_v50  ;;  %660 = vst.msk [vmem:[#allocation4 + $0x6] sm:$0x3] %vm242_vm2, %v657_v50  ;;  %3579 = vmatmul.mubr.msk.f32.vlgmr.msra.gmra.mrb[6].mxu0 %vm51_vm0, %v657_v50  ;;  %v4025_v50 = vshrl.u32 %v1160_v49, 7 }
 0xdce   :  { %3677 = vmatpush3.bf16.msra.mxu0 %v3893_v12  ;;  %3600 = vmatprep.mubr.msk.f32.mxu0 %vm3798_vm1, %v3799_v11 }
 0xdcf   :  { %3678 = vmatprep.subr.bf16.mxu0 %v3797_v6 }
 0xdd2   :  { %3680 = vmatpush3.bf16.msra.mxu0 %v3899_v14 }
 0xea0   :  { %v730_v52 = vpop.f32.mrb[6].mxu0 }
 0xea1   :  { %v734_v53 = vadd.f32 %v730_v52, %v661_v51  ;;  %v3580_v54 = vpop.f32.mrb[7].mxu0  ;;  %v4030_v51 = vld [vmem:[%s5158_s7] sm:$0x1f]  ;;  %v4033_v52 = vsub.s32 0, %v4025_v50 }
 0xea3   :  { %3749 = vtanh.f32 %v734_v53  ;;  %v3434_v56 = vmul.f32 -1.442695, %v734_v53  ;;  %v1269_v53 = vrot.slane %v4030_v51, %v4033_v52 }
 0xea5   :  { %3751 = vpow2.f32 %v3434_v56  ;;  %v978_v56 = vld [vmem:[%s5155_s4 + $0x18] sm:$0xff] }
 0xead   :  { %v3750_v55 = vpop.eup %3749 }
 0xeae   :  { %744 = vrot.lane.b32.xlu0 %v3750_v55, %s3800_s17  ;;  %v977_v55 = vld [vmem:[%s5155_s4 + $0x10] sm:$0xff] }
 0xeaf   :  { %v3752_v57 = vpop.eup %3751 }
 0xeb0   :  { %v738_v58 = vadd.f32 1.0, %v3752_v57 }
 0xeb2   :  { %3753 = vrcp.f32 %v738_v58  ;;  %v3693_v58 = vpack.c.bf16 %v978_v56, %v977_v55 }
 0xebc   :  { %v3754_v12 = vpop.eup %3753 }
 0xebd   :  { %v742_v6 = vmul.f32 %v3754_v12, %v648_v46  ;;  %v3689_v46 = vpack.c.bf16 %v976_v45, %v975_v44 }
 0xf20   :  { %v745_v59 = vpop.permute.xlu0 %744 }
 0xf21   :  { %v747_v11 = vmul.f32 %v3754_v12, %v745_v59  ;;  %v973_v59 = vld [vmem:[#allocation3] sm:$0xff] }
 0xf23   :  { %749 = vrot.lane.b32.xlu1 %v747_v11, %s3801_s2 }
 0xf95   :  { %v750_v14 = vpop.permute.xlu1 %749 }
 0xf96   :  { %v752_v60 = vadd.f32 %v750_v14, %v742_v6  ;;  %v4050_v6 = vsub.s32 2, %v4025_v50  ;;  %v4053_v14 = vsub.s32 1, %v4025_v50 }
 0xf98   :  { %3755 = vtanh.f32 %v752_v60 }
 0xfa2   :  { %v3756_v61 = vpop.eup %3755 }
 0xfa3   :  { %755 = vrot.lane.b32.xlu0 %v3756_v61, %s3800_s17  ;;  %v1276_v61 = vrot.slane %v4030_v51, %v4053_v14 }
0x1015   :  { %v756_v62 = vpop.permute.xlu0 %755 }
0x1016   :  { %v758_v63 = vmul.f32 %v3754_v12, %v756_v62  ;;  %v980_v12 = vld [vmem:[#allocation4 + $0x8] sm:$0xff]  ;;  %v3443_v62 = vld [vmem:[%s5157_s6] ss:$0 sm:$0xff] }
0x1018   :  { %760 = vrot.lane.b32.xlu1 %v758_v63, %s3801_s2 }
0x108a   :  { %v761_v0 = vpop.permute.xlu1 %760 }
0x108b   :  { %763 = vst.msk [vmem:[#allocation3 + $0xa] sm:$0x3] %vm242_vm2, %v761_v0  ;;  %764 = vst.msk [vmem:[#allocation4 + $0x4] sm:$0x3] %vm242_vm2, %v761_v0  ;;  %3590 = vmatmul.mubr.msk.f32.vlgmr.msra.gmra.mrb[6].mxu1 %vm51_vm0, %v761_v0  ;;  %v4063_v0 = vsub.s32 3, %v4025_v50 }
0x108c   :  { %3684 = vmatpush3.bf16.msra.mxu1 %v3681_v41 }
0x108d   :  { %3686 = vmatprep.subr.bf16.mxu1 %v3685_v43 }
0x1090   :  { %3688 = vmatpush3.bf16.msra.mxu1 %v3685_v43 }
0x1091   :  { %3690 = vmatprep.subr.bf16.mxu1 %v3689_v46 }
0x115e   :  { %v834_v2 = vpop.f32.mrb[6].mxu1 }
0x115f   :  { %v838_v3 = vadd.f32 %v834_v2, %v765_v1  ;;  %v3591_v4 = vpop.f32.mrb[7].mxu1 }
0x1161   :  { %3757 = vtanh.f32 %v838_v3  ;;  %v3436_v7 = vmul.f32 -1.442695, %v838_v3  ;;  %v1608_v3 = vsub.s32 5, %v4025_v50 }
0x1163   :  { %3759 = vpow2.f32 %v3436_v7  ;;  %v1912_v7 = vsub.s32 7, %v4025_v50 }
0x116b   :  { %v3758_v5 = vpop.eup %3757 }
0x116c   :  { %848 = vrot.lane.b32.xlu0 %v3758_v5, %s3800_s17  ;;  %v1905_v5 = vsub.s32 6, %v4025_v50 }
0x116d   :  { %v3760_v8 = vpop.eup %3759 }
0x116e   :  { %v842_v9 = vadd.f32 1.0, %v3760_v8 }
0x1170   :  { %3761 = vrcp.f32 %v842_v9 }
0x117a   :  { %v3762_v10 = vpop.eup %3761 }
0x117b   :  { %v846_v16 = vmul.f32 %v3762_v10, %v752_v60  ;;  %v1283_v60 = vrot.slane %v4030_v51, %v4050_v6 }
0x11de   :  { %v849_v13 = vpop.permute.xlu0 %848 }
0x11df   :  { %v851_v15 = vmul.f32 %v3762_v10, %v849_v13 }
0x11e1   :  { %853 = vrot.lane.b32.xlu1 %v851_v15, %s3801_s2 }
0x1253   :  { %v854_v17 = vpop.permute.xlu1 %853 }
0x1254   :  { %v856_v18 = vadd.f32 %v854_v17, %v846_v16  ;;  %v3802_v16 = vmov 1966171168  }
0x1255   :  { %v1172_v17 = vunpack.c.l.s4 %v3802_v16 }
0x1256   :  { %3763 = vtanh.f32 %v856_v18 }
0x1260   :  { %v3764_v19 = vpop.eup %3763 }
0x1261   :  { %859 = vrot.lane.b32.xlu0 %v3764_v19, %s3800_s17  ;;  %v3444_v19 = vld [vmem:[%s5159_s8] ss:$0 sm:$0xff] }
0x12d3   :  { %v860_v20 = vpop.permute.xlu0 %859 }
0x12d4   :  { %v862_v21 = vmul.f32 %v3762_v10, %v860_v20 }
0x12d6   :  { %864 = vrot.lane.b32.xlu1 %v862_v21, %s3801_s2 }
0x1348   :  { %v865_v22 = vpop.permute.xlu1 %864 }
0x1349   :  { %867 = vst.msk [vmem:[#allocation3 + $0xc] sm:$0x3] %vm242_vm2, %v865_v22  ;;  %868 = vst.msk [vmem:[#allocation4 + $0x2] sm:$0x3] %vm242_vm2, %v865_v22  ;;  %3601 = vmatmul.mubr.msk.f32.vlgmr.msra.gmra.mrb[8].mxu0 %vm51_vm0, %v865_v22 }
0x141c   :  { %v938_v24 = vpop.f32.mrb[8].mxu0 }
0x141d   :  { %v942_v25 = vadd.f32 %v938_v24, %v869_v23  ;;  %v3602_v26 = vpop.f32.mrb[9].mxu0 }
0x141f   :  { %3765 = vtanh.f32 %v942_v25  ;;  %v3438_v28 = vmul.f32 -1.442695, %v942_v25 }
0x1421   :  { %3767 = vpow2.f32 %v3438_v28 }
0x1429   :  { %v3766_v27 = vpop.eup %3765 }
0x142a   :  { %952 = vrot.lane.b32.xlu0 %v3766_v27, %s3800_s17 }
0x142b   :  { %v3768_v29 = vpop.eup %3767 }
0x142c   :  { %v946_v30 = vadd.f32 1.0, %v3768_v29 }
0x142e   :  { %3769 = vrcp.f32 %v946_v30 }
0x1438   :  { %v3770_v31 = vpop.eup %3769 }
0x1439   :  { %v950_v34 = vmul.f32 %v3770_v31, %v856_v18  ;;  %v1173_v18 = vunpack.c.0.s8 %v1172_v17 }
0x143b   :  { %v1176_v21 = vsub.s32 %v1173_v18, %v4025_v50 }
0x149c   :  { %v953_v32 = vpop.permute.xlu0 %952 }
0x149d   :  { %v955_v33 = vmul.f32 %v3770_v31, %v953_v32  ;;  %v4117_v32 = vsub.s32 4, %v4025_v50 }
0x149f   :  { %957 = vrot.lane.b32.xlu1 %v955_v33, %s3801_s2  ;;  %v3803_v33 = vmov 0  }
0x14a0   :  { %3708 = vset.pattern.permute.xlu0 %v3803_v33  ;;  %3707 = vset.pattern.permute.xlu1 %v3803_v33 }
0x1511   :  { %v958_v35 = vpop.permute.xlu1 %957 }
0x1512   :  { %v960_v36 = vadd.f32 %v958_v35, %v950_v34  ;;  %v1297_v34 = vrot.slane %v4030_v51, %v4117_v32  ;;  %v1290_v35 = vrot.slane %v4030_v51, %v4063_v0 }
0x1514   :  { %3771 = vtanh.f32 %v960_v36 }
0x151e   :  { %v3772_v37 = vpop.eup %3771 }
0x151f   :  { %963 = vrot.lane.b32.xlu0 %v3772_v37, %s3800_s17 }
0x1523   :  { %1271 = vbcast.lane.b32.xlu0 %v1269_v53, 256 }
0x1527   :  { %1285 = vbcast.lane.b32.xlu0 %v1283_v60, 256  ;;  %v4180_v60 = vand.u32 127, %v1160_v49 }
0x1591   :  { %v964_v47 = vpop.permute.xlu0 %963 }
0x1592   :  { %v966_v48 = vmul.f32 %v3770_v31, %v964_v47 }
0x1594   :  { %968 = vrot.lane.b32.xlu1 %v966_v48, %s3801_s2 }
0x1595   :  { %v4123_v36 = vpop.permute.xlu0 %1271 }
0x1598   :  { %1278 = vbcast.lane.b32.xlu1 %v1276_v61, 256  ;;  %v4184_v61 = vsub.s32 %v4180_v60, %v4025_v50 }
0x1599   :  { %v4125_v37 = vpop.permute.xlu0 %1285 }
0x1606   :  { %v969_v54 = vpop.permute.xlu1 %968 }
0x1607   :  { %971 = vst.msk [vmem:[#allocation3 + $0xe] sm:$0x3] %vm242_vm2, %v969_v54  ;;  %972 = vst.msk [vmem:[#allocation4] sm:$0x3] %vm242_vm2, %v969_v54 }
0x160a   :  { %v4127_v38 = vpop.permute.xlu1 %1278 }
0x160e   :  { %v979_v57 = vld [vmem:[#allocation4] sm:$0xff]  ;;  %v974_v11 = vld [vmem:[#allocation3 + $0x8] sm:$0xff] }
0x160f   :  { %3611 = vmatprep.mubr.msk.f32.mxu1 %vm51_vm0, %v979_v57 }
0x1610   :  { %3612 = vmatmul.mubr.msk.f32.vlgmr.msra.gmra.mrb[8].mxu1 %vm51_vm0, %v980_v12 }
0x1611   :  { %3692 = vmatpush3.bf16.msra.mxu1 %v3689_v46  ;;  %3622 = vmatprep.mubr.msk.f32.mxu1 %vm51_vm0, %v973_v59 }
0x1612   :  { %3694 = vmatprep.subr.bf16.mxu1 %v3693_v58 }
0x1615   :  { %3696 = vmatpush3.bf16.msra.mxu1 %v3693_v58 }
0x1618   :  { %3623 = vmatmul.mubr.msk.f32.vlgmr.msra.gmra.mrb[8].mxu1 %vm51_vm0, %v974_v11 }
0x16eb   :  { %v3624_v63 = vpop.f32.mrb[8].mxu1 }
0x16ec   :  { %v4065_v1 = vadd.f32 %v3624_v63, %v3443_v62  ;;  %v1138_v2 = vpop.f32.mrb[9].mxu1 }
0x16ed   :  { %v4068_v4 = vadd.f32 %v3443_v62, %v1138_v2 }
0x16ee   :  { %1158 = vst.msk [vmem:[%s5162_s11 + $0x8] sm:$0xff] %vm1156_vm3, %v4065_v1  ;;  %v4087_v10 = vrot.slane %v4065_v1, %v1608_v3  ;;  %v4092_v13 = vrot.slane %v4065_v1, %v1905_v5  ;;  %v4097_v15 = vrot.slane %v4065_v1, %v1912_v7 }
0x16ef   :  { %1157 = vst.msk [vmem:[%s5162_s11] sm:$0xff] %vm1156_vm3, %v4068_v4  ;;  %v1257_v8 = vrot.slane %v4068_v4, %v4063_v0  ;;  %v1250_v9 = vrot.slane %v4068_v4, %v4050_v6  ;;  %v1169_v20 = vadd.f32 %v3444_v19, %v4068_v4 }
0x16f1   :  { %1259 = vbcast.lane.b32.xlu1 %v1257_v8, 256  ;;  %1252 = vbcast.lane.b32.xlu0 %v1250_v9, 256  ;;  %v1177_v22 = vrot.slane %v1169_v20, %v1176_v21 }
0x16f3   :  { %v1185_v23 = vrot.slane %v1177_v22, %v1176_v21  ;;  %v1178_v24 = vcombine.high %v1177_v22, %v1177_v22 }
0x16f5   :  { %v1196_v25 = vrot.slane %v1185_v23, %v4033_v52  ;;  %v1192_v26 = vrot.slane %v1178_v24, %v1176_v21 }
0x16f7   :  { %v4106_v27 = vadd.f32 %v1196_v25, %v4030_v51  ;;  %v1200_v28 = vrot.slane %v1192_v26, %v4033_v52 }
0x16f9   :  { %5204 = vst [vmem:[#allocation8_spill] sm:$0xff] %v4106_v27  ;;  %v1206_v29 = vsel %vm1205_vm4, %v4106_v27, -inf  ;;  %v4112_v30 = vadd.f32 %v1200_v28, %v4030_v51 }
0x16fb   :  { %5205 = vst [vmem:[#allocation9_spill] sm:$0xff] %v4112_v30  ;;  %v1209_v31 = vsel %vm1205_vm4, %v4112_v30, -inf }
0x1710   :  { %1207 = vmax.xlane.f32.xlu0 %v1206_v29 }
0x1715   :  { %1210 = vmax.xlane.f32.xlu1 %v1209_v31 }
0x1726   :  { %1299 = vbcast.lane.b32.xlu0 %v1297_v34, 256  ;;  %1292 = vbcast.lane.b32.xlu1 %v1290_v35, 256 }
0x1763   :  { %v1253_v39 = vpop.permute.xlu0 %1252  ;;  %v1260_v41 = vpop.permute.xlu1 %1259 }
0x179d   :  { %v4129_v40 = vpop.xlane.xlu0 %1207 }
0x179e   :  { %5206 = vst [vmem:[#allocation10_spill] sm:$0xff] %v4129_v40  ;;  %v1263_v42 = vadd.f32 %v1253_v39, %v4129_v40 }
0x17a0   :  { %v4133_v43 = vadd.f32 %v4127_v38, %v1263_v42  ;;  %v4136_v44 = vadd.f32 %v4123_v36, %v1263_v42  ;;  %v4144_v47 = vadd.f32 %v4125_v37, %v1263_v42 }
0x17a1   :  { %v4156_v54 = vpop.permute.xlu0 %1299 }
0x17a2   :  { %5207 = vst [vmem:[#allocation11_spill] sm:$0xff] %v4133_v43  ;;  %5208 = vst [vmem:[#allocation12_spill] sm:$0xff] %v4136_v44  ;;  %1330 = vperm.xlu0 %3708, %v4133_v43   ;;  %1327 = vperm.xlu1 %3707, %v4136_v44   ;;  %v4140_v45 = vpop.xlane.xlu1 %1210  ;;  %v4164_v56 = vadd.f32 %v4156_v54, %v1263_v42 }
0x17a3   :  { %5209 = vst [vmem:[#allocation13_spill] sm:$0xff] %v4140_v45  ;;  %v1264_v46 = vadd.f32 %v1260_v41, %v4140_v45  ;;  %5210 = vst [vmem:[#allocation14_spill] sm:$0xff] %v4144_v47 }
0x17a4   :  { %5214 = vst [vmem:[#allocation18_spill] sm:$0xff] %v4164_v56 }
0x17a5   :  { %v4147_v48 = vadd.f32 %v4123_v36, %v1264_v46  ;;  %v4159_v55 = vadd.f32 %v4127_v38, %v1264_v46  ;;  %v4167_v57 = vadd.f32 %v4125_v37, %v1264_v46  ;;  %v4176_v12 = vadd.f32 %v4156_v54, %v1264_v46 }
0x17a6   :  { %1333 = vperm.xlu0 %3708, %v4144_v47   ;;  %v4150_v51 = vpop.permute.xlu1 %1292 }
0x17a7   :  { %5211 = vst [vmem:[#allocation15_spill] sm:$0xff] %v4147_v48  ;;  %1342 = vperm.xlu1 %3707, %v4147_v48   ;;  %v4154_v53 = vadd.f32 %v4150_v51, %v1263_v42  ;;  %5213 = vst [vmem:[#allocation17_spill] sm:$0xff] %v4159_v55  ;;  %v4172_v58 = vadd.f32 %v4150_v51, %v1264_v46 }
0x17a8   :  { %5215 = vst [vmem:[#allocation19_spill] sm:$0xff] %v4167_v57  ;;  %5217 = vst [vmem:[#allocation21_spill] sm:$0xff] %v4176_v12 }
0x17a9   :  { %5212 = vst [vmem:[#allocation16_spill] sm:$0xff] %v4154_v53  ;;  %5216 = vst [vmem:[#allocation20_spill] sm:$0xff] %v4172_v58 }
0x17aa   :  { %1336 = vperm.xlu0 %3708, %v4154_v53  }
0x17ab   :  { %1345 = vperm.xlu1 %3707, %v4159_v55  }
0x17ae   :  { %1339 = vperm.xlu0 %3708, %v4164_v56  }
0x17af   :  { %1348 = vperm.xlu1 %3707, %v4167_v57  }
0x17b3   :  { %1351 = vperm.xlu1 %3707, %v4172_v58  }
0x17b7   :  { %1354 = vperm.xlu1 %3707, %v4176_v12  }
0x1821   :  { %v1331_v59 = vpop.permute.xlu0 %1330  ;;  %v1328_v11 = vpop.permute.xlu1 %1327 }
0x1822   :  { %v1363_v2 = vrot.slane %v1331_v59, %v4184_v61  ;;  %v1359_v8 = vrot.slane %v1328_v11, %v4184_v61  ;;  %v1602_v11 = vrot.slane %v4068_v4, %v4117_v32 }
0x1824   :  { %v1397_v49 = vsel %vm1396_vm5, %v1363_v2, %v1359_v8 }
0x1825   :  { %v1334_v62 = vpop.permute.xlu0 %1333 }
0x1826   :  { %v1343_v63 = vpop.permute.xlu1 %1342  ;;  %v1367_v16 = vrot.slane %v1334_v62, %v4184_v61  ;;  %v1609_v62 = vrot.slane %v4068_v4, %v1608_v3 }
0x1827   :  { %v1379_v31 = vrot.slane %v1343_v63, %v4184_v61 }
0x1828   :  { %v1399_v22 = vsel %vm1398_vm6, %v1367_v16, %v1397_v49 }
0x1829   :  { %v1337_v9 = vpop.permute.xlu0 %1336 }
0x182a   :  { %v1346_v17 = vpop.permute.xlu1 %1345  ;;  %v1371_v18 = vrot.slane %v1337_v9, %v4184_v61 }
0x182b   :  { %v1383_v26 = vrot.slane %v1346_v17, %v4184_v61 }
0x182c   :  { %v1401_v23 = vsel %vm1400_vm7, %v1371_v18, %v1399_v22 }
0x182d   :  { %v1340_v19 = vpop.permute.xlu0 %1339  ;;  %v1404_v34 = vsel %vm1396_vm5, %v1383_v26, %v1379_v31 }
0x182e   :  { %v1375_v20 = vrot.slane %v1340_v19, %v4184_v61  ;;  %v1349_v21 = vpop.permute.xlu1 %1348 }
0x182f   :  { %v1387_v29 = vrot.slane %v1349_v21, %v4184_v61 }
0x1830   :  { %v1403_v24 = vsel %vm1402_vm8, %v1375_v20, %v1401_v23 }
0x1831   :  { %v1410_v25 = vsel %vm1205_vm4, %v1403_v24, -inf  ;;  %v1405_v41 = vsel %vm1398_vm6, %v1387_v29, %v1404_v34 }
0x1832   :  { %1411 = vmax.xlane.f32.xlu0 %v1410_v25  ;;  %v1352_v28 = vpop.permute.xlu1 %1351 }
0x1833   :  { %v1391_v33 = vrot.slane %v1352_v28, %v4184_v61 }
0x1835   :  { %v1406_v42 = vsel %vm1400_vm7, %v1391_v33, %v1405_v41 }
0x1836   :  { %v1355_v35 = vpop.permute.xlu1 %1354 }
0x1837   :  { %v1395_v39 = vrot.slane %v1355_v35, %v4184_v61 }
0x1839   :  { %v1407_v46 = vsel %vm1402_vm8, %v1395_v39, %v1406_v42 }
0x183a   :  { %v1413_v59 = vsel %vm1205_vm4, %v1407_v46, -inf }
0x183b   :  { %1414 = vmax.xlane.f32.xlu1 %v1413_v59 }
0x1848   :  { %1604 = vbcast.lane.b32.xlu0 %v1602_v11, 256 }
0x184c   :  { %1611 = vbcast.lane.b32.xlu1 %v1609_v62, 256 }
0x18bf   :  { %v4211_v63 = vpop.xlane.xlu0 %1411 }
0x18c0   :  { %5218 = vst [vmem:[#allocation22_spill] sm:$0xff] %v4211_v63 }
0x18c3   :  { %v1605_v2 = vpop.permute.xlu0 %1604 }
0x18c4   :  { %v1615_v8 = vadd.f32 %v1605_v2, %v4211_v63 }
0x18c6   :  { %v4215_v9 = vadd.f32 %v1615_v8, %v4123_v36  ;;  %v4218_v16 = vadd.f32 %v1615_v8, %v4127_v38  ;;  %v4225_v3 = vadd.f32 %v1615_v8, %v4125_v37  ;;  %v4230_v19 = vadd.f32 %v1615_v8, %v4150_v51 }
0x18c7   :  { %v4246_v23 = vadd.f32 %v1615_v8, %v4156_v54 }
0x18c8   :  { %5219 = vst [vmem:[#allocation23_spill] sm:$0xff] %v4215_v9  ;;  %5220 = vst [vmem:[#allocation24_spill] sm:$0xff] %v4218_v16  ;;  %1638 = vperm.xlu0 %3708, %v4215_v9   ;;  %1641 = vperm.xlu1 %3707, %v4218_v16   ;;  %v4222_v17 = vpop.xlane.xlu1 %1414 }
0x18c9   :  { %5221 = vst [vmem:[#allocation25_spill] sm:$0xff] %v4222_v17  ;;  %5222 = vst [vmem:[#allocation26_spill] sm:$0xff] %v4225_v3 }
0x18ca   :  { %5223 = vst [vmem:[#allocation27_spill] sm:$0xff] %v4230_v19  ;;  %5227 = vst [vmem:[#allocation31_spill] sm:$0xff] %v4246_v23 }
0x18cc   :  { %1644 = vperm.xlu0 %3708, %v4225_v3   ;;  %v1612_v18 = vpop.permute.xlu1 %1611 }
0x18cd   :  { %v1616_v49 = vadd.f32 %v1612_v18, %v4222_v17 }
0x18cf   :  { %v4233_v20 = vadd.f32 %v1616_v49, %v4127_v38  ;;  %v4238_v21 = vadd.f32 %v1616_v49, %v4123_v36  ;;  %v4241_v22 = vadd.f32 %v1616_v49, %v4125_v37  ;;  %v4249_v24 = vadd.f32 %v1616_v49, %v4150_v51 }
0x18d0   :  { %1647 = vperm.xlu0 %3708, %v4230_v19   ;;  %v4254_v25 = vadd.f32 %v1616_v49, %v4156_v54 }
0x18d1   :  { %5224 = vst [vmem:[#allocation28_spill] sm:$0xff] %v4233_v20  ;;  %1656 = vperm.xlu1 %3707, %v4233_v20   ;;  %5225 = vst [vmem:[#allocation29_spill] sm:$0xff] %v4238_v21 }
0x18d2   :  { %5226 = vst [vmem:[#allocation30_spill] sm:$0xff] %v4241_v22  ;;  %5228 = vst [vmem:[#allocation32_spill] sm:$0xff] %v4249_v24 }
0x18d3   :  { %5229 = vst [vmem:[#allocation33_spill] sm:$0xff] %v4254_v25 }
0x18d4   :  { %1653 = vperm.xlu0 %3708, %v4238_v21  }
0x18d5   :  { %1659 = vperm.xlu1 %3707, %v4241_v22  }
0x18d8   :  { %1650 = vperm.xlu0 %3708, %v4246_v23  }
0x18d9   :  { %1662 = vperm.xlu1 %3707, %v4249_v24  }
0x18dd   :  { %1665 = vperm.xlu1 %3707, %v4254_v25  }
0x1947   :  { %v1639_v26 = vpop.permute.xlu0 %1638  ;;  %v1642_v29 = vpop.permute.xlu1 %1641 }
0x1948   :  { %v1670_v34 = vrot.slane %v1639_v26, %v4184_v61  ;;  %v1674_v35 = vrot.slane %v1642_v29, %v4184_v61 }
0x194a   :  { %v1707_v11 = vsel %vm1396_vm5, %v1674_v35, %v1670_v34 }
0x194b   :  { %v1645_v28 = vpop.permute.xlu0 %1644 }
0x194c   :  { %v1678_v41 = vrot.slane %v1645_v28, %v4184_v61 }
0x194e   :  { %v1708_v49 = vsel %vm1398_vm6, %v1678_v41, %v1707_v11  ;;  %v1913_v11 = vrot.slane %v4068_v4, %v1912_v7 }
0x194f   :  { %v1648_v31 = vpop.permute.xlu0 %1647 }
0x1950   :  { %v1657_v33 = vpop.permute.xlu1 %1656  ;;  %v1682_v46 = vrot.slane %v1648_v31, %v4184_v61 }
0x1951   :  { %v1694_v2 = vrot.slane %v1657_v33, %v4184_v61 }
0x1952   :  { %v1709_v29 = vsel %vm1400_vm7, %v1682_v46, %v1708_v49 }
0x1953   :  { %v1654_v39 = vpop.permute.xlu0 %1653 }
0x1954   :  { %v1660_v42 = vpop.permute.xlu1 %1659  ;;  %v1690_v59 = vrot.slane %v1654_v39, %v4184_v61 }
0x1955   :  { %v1698_v26 = vrot.slane %v1660_v42, %v4184_v61 }
0x1956   :  { %v1711_v28 = vsel %vm1396_vm5, %v1694_v2, %v1690_v59  ;;  %v1906_v59 = vrot.slane %v4068_v4, %v1905_v5 }
0x1957   :  { %v1651_v62 = vpop.permute.xlu0 %1650 }
0x1958   :  { %v1686_v8 = vrot.slane %v1651_v62, %v4184_v61  ;;  %v1663_v18 = vpop.permute.xlu1 %1662  ;;  %v1712_v62 = vsel %vm1398_vm6, %v1698_v26, %v1711_v28 }
0x1959   :  { %v1702_v31 = vrot.slane %v1663_v18, %v4184_v61 }
0x195a   :  { %v1710_v39 = vsel %vm1402_vm8, %v1686_v8, %v1709_v29 }
0x195b   :  { %v1717_v34 = vsel %vm1205_vm4, %v1710_v39, -inf  ;;  %v1713_v41 = vsel %vm1400_vm7, %v1702_v31, %v1712_v62 }
0x195c   :  { %1718 = vmax.xlane.f32.xlu0 %v1717_v34  ;;  %v1666_v35 = vpop.permute.xlu1 %1665 }
0x195d   :  { %v1706_v33 = vrot.slane %v1666_v35, %v4184_v61 }
0x195f   :  { %v1714_v42 = vsel %vm1402_vm8, %v1706_v33, %v1713_v41 }
0x1960   :  { %v1720_v46 = vsel %vm1205_vm4, %v1714_v42, -inf }
0x1961   :  { %1721 = vmax.xlane.f32.xlu1 %v1720_v46 }
0x1972   :  { %1908 = vbcast.lane.b32.xlu0 %v1906_v59, 256  ;;  %1915 = vbcast.lane.b32.xlu1 %v1913_v11, 256 }
0x19e9   :  { %v4283_v2 = vpop.xlane.xlu0 %1718 }
0x19ea   :  { %5230 = vst [vmem:[#allocation34_spill] sm:$0xff] %v4283_v2 }
0x19ed   :  { %v1909_v8 = vpop.permute.xlu0 %1908 }
0x19ee   :  { %v1919_v18 = vadd.f32 %v1909_v8, %v4283_v2  ;;  %v4286_v49 = vpop.xlane.xlu1 %1721 }
0x19ef   :  { %5231 = vst [vmem:[#allocation35_spill] sm:$0xff] %v4286_v49 }
0x19f0   :  { %v4289_v26 = vadd.f32 %v1919_v18, %v4123_v36  ;;  %v4292_v29 = vadd.f32 %v1919_v18, %v4127_v38  ;;  %v4298_v5 = vadd.f32 %v1919_v18, %v4125_v37  ;;  %v4306_v28 = vadd.f32 %v1919_v18, %v4150_v51 }
0x19f1   :  { %v4322_v35 = vadd.f32 %v1919_v18, %v4156_v54 }
0x19f2   :  { %5232 = vst [vmem:[#allocation36_spill] sm:$0xff] %v4292_v29  ;;  %1942 = vperm.xlu0 %3708, %v4289_v26   ;;  %1945 = vperm.xlu1 %3707, %v4292_v29   ;;  %v1916_v50 = vpop.permute.xlu1 %1915  ;;  %5233 = vst [vmem:[#allocation37_spill] sm:$0xff] %v4298_v5 }
0x19f3   :  { %v1920_v4 = vadd.f32 %v1916_v50, %v4286_v49  ;;  %5235 = vst [vmem:[#allocation39_spill] sm:$0xff] %v4306_v28  ;;  %5239 = vst [vmem:[#allocation43_spill] sm:$0xff] %v4322_v35 }
0x19f5   :  { %v4301_v7 = vadd.f32 %v1920_v4, %v4127_v38  ;;  %v4309_v31 = vadd.f32 %v1920_v4, %v4125_v37  ;;  %v4314_v39 = vadd.f32 %v1920_v4, %v4123_v36  ;;  %v4317_v34 = vadd.f32 %v1920_v4, %v4150_v51 }
0x19f6   :  { %1948 = vperm.xlu0 %3708, %v4298_v5   ;;  %v4325_v33 = vadd.f32 %v1920_v4, %v4156_v54 }
0x19f7   :  { %5234 = vst [vmem:[#allocation38_spill] sm:$0xff] %v4301_v7  ;;  %1960 = vperm.xlu1 %3707, %v4301_v7   ;;  %5236 = vst [vmem:[#allocation40_spill] sm:$0xff] %v4309_v31 }
0x19f8   :  { %5237 = vst [vmem:[#allocation41_spill] sm:$0xff] %v4314_v39  ;;  %5238 = vst [vmem:[#allocation42_spill] sm:$0xff] %v4317_v34 }
0x19f9   :  { %5240 = vst [vmem:[#allocation44_spill] sm:$0xff] %v4325_v33 }
0x19fa   :  { %1951 = vperm.xlu0 %3708, %v4306_v28  }
0x19fb   :  { %1963 = vperm.xlu1 %3707, %v4309_v31  }
0x19fe   :  { %1957 = vperm.xlu0 %3708, %v4314_v39  }
0x19ff   :  { %1966 = vperm.xlu1 %3707, %v4317_v34  }
0x1a02   :  { %1954 = vperm.xlu0 %3708, %v4322_v35  }
0x1a03   :  { %1969 = vperm.xlu1 %3707, %v4325_v33  }
0x1a71   :  { %v1943_v62 = vpop.permute.xlu0 %1942  ;;  %v1946_v41 = vpop.permute.xlu1 %1945 }
0x1a72   :  { %v1974_v8 = vrot.slane %v1943_v62, %v4184_v61  ;;  %v1978_v50 = vrot.slane %v1946_v41, %v4184_v61 }
0x1a74   :  { %v2011_v62 = vsel %vm1396_vm5, %v1978_v50, %v1974_v8 }
0x1a75   :  { %v1949_v42 = vpop.permute.xlu0 %1948 }
0x1a76   :  { %v1961_v46 = vpop.permute.xlu1 %1960  ;;  %v1982_v18 = vrot.slane %v1949_v42, %v4184_v61 }
0x1a77   :  { %v1998_v4 = vrot.slane %v1961_v46, %v4184_v61 }
0x1a78   :  { %v2012_v46 = vsel %vm1398_vm6, %v1982_v18, %v2011_v62 }
0x1a79   :  { %v1952_v59 = vpop.permute.xlu0 %1951 }
0x1a7a   :  { %v1964_v11 = vpop.permute.xlu1 %1963  ;;  %v1986_v40 = vrot.slane %v1952_v59, %v4184_v61 }
0x1a7b   :  { %v2002_v12 = vrot.slane %v1964_v11, %v4184_v61 }
0x1a7c   :  { %v2013_v59 = vsel %vm1400_vm7, %v1986_v40, %v2012_v46 }
0x1a7d   :  { %v1958_v30 = vpop.permute.xlu0 %1957 }
0x1a7e   :  { %v1994_v45 = vrot.slane %v1958_v30, %v4184_v61  ;;  %v1967_v27 = vpop.permute.xlu1 %1966 }
0x1a7f   :  { %v2006_v57 = vrot.slane %v1967_v27, %v4184_v61 }
0x1a80   :  { %v2015_v58 = vsel %vm1396_vm5, %v1998_v4, %v1994_v45 }
0x1a81   :  { %v1955_v55 = vpop.permute.xlu0 %1954  ;;  %v2016_v41 = vsel %vm1398_vm6, %v2002_v12, %v2015_v58 }
0x1a82   :  { %v1990_v42 = vrot.slane %v1955_v55, %v4184_v61  ;;  %v1970_v48 = vpop.permute.xlu1 %1969  ;;  %v2017_v45 = vsel %vm1400_vm7, %v2006_v57, %v2016_v41  ;;  %v2218_v55 = vrot.slane %v4065_v1, %v4053_v14 }
0x1a83   :  { %v2010_v30 = vrot.slane %v1970_v48, %v4184_v61  ;;  %v2211_v48 = vrot.slane %v4065_v1, %v4033_v52 }
0x1a84   :  { %v2014_v11 = vsel %vm1402_vm8, %v1990_v42, %v2013_v59 }
0x1a85   :  { %v2021_v27 = vsel %vm1205_vm4, %v2014_v11, -inf  ;;  %v2018_v8 = vsel %vm1402_vm8, %v2010_v30, %v2017_v45 }
0x1a86   :  { %2022 = vmax.xlane.f32.xlu0 %v2021_v27  ;;  %v2024_v58 = vsel %vm1205_vm4, %v2018_v8, -inf }
0x1a87   :  { %2025 = vmax.xlane.f32.xlu1 %v2024_v58 }
0x1a98   :  { %2220 = vbcast.lane.b32.xlu1 %v2218_v55, 256 }
0x1a9c   :  { %2213 = vbcast.lane.b32.xlu0 %v2211_v48, 256 }
0x1b13   :  { %v4353_v40 = vpop.xlane.xlu0 %2022 }
0x1b14   :  { %v4355_v12 = vpop.xlane.xlu1 %2025 }
0x1b17   :  { %v2214_v57 = vpop.permute.xlu0 %2213 }
0x1b18   :  { %v2224_v50 = vadd.f32 %v2214_v57, %v4353_v40  ;;  %v2221_v18 = vpop.permute.xlu1 %2220 }
0x1b19   :  { %v2225_v4 = vadd.f32 %v2221_v18, %v4355_v12 }
0x1b1a   :  { %v4360_v62 = vadd.f32 %v2224_v50, %v4123_v36  ;;  %v4363_v41 = vadd.f32 %v2224_v50, %v4127_v38  ;;  %v4368_v42 = vadd.f32 %v2224_v50, %v4125_v37  ;;  %v4376_v30 = vadd.f32 %v2224_v50, %v4150_v51 }
0x1b1b   :  { %v4371_v46 = vadd.f32 %v2225_v4, %v4127_v38  ;;  %v4379_v59 = vadd.f32 %v2225_v4, %v4125_v37  ;;  %v4384_v11 = vadd.f32 %v2225_v4, %v4150_v51  ;;  %v4387_v45 = vadd.f32 %v2225_v4, %v4123_v36 }
0x1b1c   :  { %2247 = vperm.xlu0 %3708, %v4360_v62   ;;  %2250 = vperm.xlu1 %3707, %v4363_v41   ;;  %v4392_v27 = vadd.f32 %v2225_v4, %v4156_v54  ;;  %v4395_v8 = vadd.f32 %v2224_v50, %v4156_v54 }
0x1b20   :  { %2253 = vperm.xlu0 %3708, %v4368_v42   ;;  %2265 = vperm.xlu1 %3707, %v4371_v46  }
0x1b24   :  { %2256 = vperm.xlu0 %3708, %v4376_v30   ;;  %2268 = vperm.xlu1 %3707, %v4379_v59  }
0x1b28   :  { %2271 = vperm.xlu1 %3707, %v4384_v11   ;;  %2262 = vperm.xlu0 %3708, %v4387_v45  }
0x1b2c   :  { %2274 = vperm.xlu1 %3707, %v4392_v27   ;;  %2259 = vperm.xlu0 %3708, %v4395_v8  }
0x1b9b   :  { %v2248_v58 = vpop.permute.xlu0 %2247  ;;  %v2251_v55 = vpop.permute.xlu1 %2250 }
0x1b9c   :  { %v2279_v17 = vrot.slane %v2248_v58, %v4184_v61  ;;  %v2283_v44 = vrot.slane %v2251_v55, %v4184_v61 }
0x1b9e   :  { %v2316_v58 = vsel %vm1396_vm5, %v2283_v44, %v2279_v17 }
0x1b9f   :  { %v2254_v48 = vpop.permute.xlu0 %2253  ;;  %v2266_v57 = vpop.permute.xlu1 %2265 }
0x1ba0   :  { %v2287_v47 = vrot.slane %v2254_v48, %v4184_v61  ;;  %v2303_v50 = vrot.slane %v2266_v57, %v4184_v61 }
0x1ba3   :  { %v2257_v18 = vpop.permute.xlu0 %2256  ;;  %v2269_v56 = vpop.permute.xlu1 %2268 }
0x1ba4   :  { %v2291_v63 = vrot.slane %v2257_v18, %v4184_v61  ;;  %v2307_v23 = vrot.slane %v2269_v56, %v4184_v61 }
0x1ba7   :  { %v2263_v53 = vpop.permute.xlu0 %2262  ;;  %v2272_v4 = vpop.permute.xlu1 %2271 }
0x1ba8   :  { %v2299_v43 = vrot.slane %v2263_v53, %v4184_v61  ;;  %v2311_v25 = vrot.slane %v2272_v4, %v4184_v61  ;;  %v2317_v53 = vsel %vm1398_vm6, %v2287_v47, %v2316_v58  ;;  %v2515_v47 = vrot.slane %v4065_v1, %v4050_v6 }
0x1ba9   :  { %v2318_v56 = vsel %vm1400_vm7, %v2291_v63, %v2317_v53 }
0x1baa   :  { %v2320_v19 = vsel %vm1396_vm5, %v2303_v50, %v2299_v43 }
0x1bab   :  { %v2260_v24 = vpop.permute.xlu0 %2259  ;;  %v2275_v55 = vpop.permute.xlu1 %2274  ;;  %v2321_v22 = vsel %vm1398_vm6, %v2307_v23, %v2320_v19  ;;  %v2522_v19 = vrot.slane %v4065_v1, %v4063_v0 }
0x1bac   :  { %v2295_v48 = vrot.slane %v2260_v24, %v4184_v61  ;;  %v2315_v57 = vrot.slane %v2275_v55, %v4184_v61  ;;  %v2322_v18 = vsel %vm1400_vm7, %v2311_v25, %v2321_v22 }
0x1bae   :  { %v2319_v43 = vsel %vm1402_vm8, %v2295_v48, %v2318_v56  ;;  %v2323_v4 = vsel %vm1402_vm8, %v2315_v57, %v2322_v18 }
0x1baf   :  { %v2326_v44 = vsel %vm1205_vm4, %v2319_v43, -inf  ;;  %v2329_v17 = vsel %vm1205_vm4, %v2323_v4, -inf }
0x1bb0   :  { %2327 = vmax.xlane.f32.xlu0 %v2326_v44  ;;  %2330 = vmax.xlane.f32.xlu1 %v2329_v17 }
0x1bc1   :  { %2524 = vbcast.lane.b32.xlu1 %v2522_v19, 256 }
0x1bc6   :  { %2517 = vbcast.lane.b32.xlu0 %v2515_v47, 256 }
0x1c3d   :  { %v4423_v22 = vpop.xlane.xlu0 %2327  ;;  %v4425_v63 = vpop.xlane.xlu1 %2330 }
0x1c41   :  { %v2518_v23 = vpop.permute.xlu0 %2517  ;;  %v2525_v24 = vpop.permute.xlu1 %2524 }
0x1c42   :  { %v2528_v25 = vadd.f32 %v2518_v23, %v4423_v22  ;;  %v2529_v50 = vadd.f32 %v2525_v24, %v4425_v63 }
0x1c44   :  { %v4430_v58 = vadd.f32 %v2528_v25, %v4123_v36  ;;  %v4433_v55 = vadd.f32 %v2528_v25, %v4127_v38  ;;  %v4438_v48 = vadd.f32 %v2528_v25, %v4125_v37  ;;  %v4441_v57 = vadd.f32 %v2529_v50, %v4127_v38 }
0x1c45   :  { %v4446_v53 = vadd.f32 %v2528_v25, %v4150_v51  ;;  %v4449_v18 = vadd.f32 %v2529_v50, %v4125_v37  ;;  %v4454_v56 = vadd.f32 %v2529_v50, %v4150_v51  ;;  %v4457_v43 = vadd.f32 %v2529_v50, %v4123_v36 }
0x1c46   :  { %2551 = vperm.xlu0 %3708, %v4430_v58   ;;  %2554 = vperm.xlu1 %3707, %v4433_v55   ;;  %v4462_v4 = vadd.f32 %v2529_v50, %v4156_v54  ;;  %v4465_v44 = vadd.f32 %v2528_v25, %v4156_v54 }
0x1c4a   :  { %2557 = vperm.xlu0 %3708, %v4438_v48   ;;  %2569 = vperm.xlu1 %3707, %v4441_v57  }
0x1c4e   :  { %2560 = vperm.xlu0 %3708, %v4446_v53   ;;  %2572 = vperm.xlu1 %3707, %v4449_v18  }
0x1c52   :  { %2575 = vperm.xlu1 %3707, %v4454_v56   ;;  %2566 = vperm.xlu0 %3708, %v4457_v43  }
0x1c56   :  { %2578 = vperm.xlu1 %3707, %v4462_v4   ;;  %2563 = vperm.xlu0 %3708, %v4465_v44  }
0x1cc5   :  { %v2552_v17 = vpop.permute.xlu0 %2551  ;;  %v2555_v19 = vpop.permute.xlu1 %2554 }
0x1cc6   :  { %v2583_v21 = vrot.slane %v2552_v17, %v4184_v61  ;;  %v2587_v49 = vrot.slane %v2555_v19, %v4184_v61 }
0x1cc8   :  { %v2620_v17 = vsel %vm1396_vm5, %v2587_v49, %v2583_v21 }
0x1cc9   :  { %v2558_v47 = vpop.permute.xlu0 %2557  ;;  %v2570_v23 = vpop.permute.xlu1 %2569 }
0x1cca   :  { %v2591_v3 = vrot.slane %v2558_v47, %v4184_v61  ;;  %v2607_v25 = vrot.slane %v2570_v23, %v4184_v61 }
0x1ccc   :  { %v2621_v47 = vsel %vm1398_vm6, %v2591_v3, %v2620_v17  ;;  %v2819_v3 = vrot.slane %v4065_v1, %v4117_v32 }
0x1ccd   :  { %v2561_v24 = vpop.permute.xlu0 %2560  ;;  %v2573_v20 = vpop.permute.xlu1 %2572 }
0x1cce   :  { %v2595_v2 = vrot.slane %v2561_v24, %v4184_v61  ;;  %v2611_v35 = vrot.slane %v2573_v20, %v4184_v61 }
0x1cd0   :  { %v2622_v20 = vsel %vm1400_vm7, %v2595_v2, %v2621_v47 }
0x1cd1   :  { %v2567_v9 = vpop.permute.xlu0 %2566  ;;  %v2576_v50 = vpop.permute.xlu1 %2575 }
0x1cd2   :  { %v2603_v16 = vrot.slane %v2567_v9, %v4184_v61  ;;  %v2615_v5 = vrot.slane %v2576_v50, %v4184_v61 }
0x1cd4   :  { %v2624_v28 = vsel %vm1396_vm5, %v2607_v25, %v2603_v16 }
0x1cd5   :  { %v2564_v29 = vpop.permute.xlu0 %2563  ;;  %v2579_v19 = vpop.permute.xlu1 %2578  ;;  %v2625_v33 = vsel %vm1398_vm6, %v2611_v35, %v2624_v28 }
0x1cd6   :  { %v2599_v23 = vrot.slane %v2564_v29, %v4184_v61  ;;  %v2619_v9 = vrot.slane %v2579_v19, %v4184_v61  ;;  %v2626_v24 = vsel %vm1400_vm7, %v2615_v5, %v2625_v33 }
0x1cd8   :  { %v2623_v16 = vsel %vm1402_vm8, %v2599_v23, %v2622_v20  ;;  %v2627_v50 = vsel %vm1402_vm8, %v2619_v9, %v2626_v24 }
0x1cd9   :  { %v2630_v21 = vsel %vm1205_vm4, %v2623_v16, -inf  ;;  %v2633_v49 = vsel %vm1205_vm4, %v2627_v50, -inf }
0x1cda   :  { %2631 = vmax.xlane.f32.xlu0 %v2630_v21  ;;  %2634 = vmax.xlane.f32.xlu1 %v2633_v49 }
0x1ceb   :  { %2828 = vbcast.lane.b32.xlu1 %v4087_v10, 256 }
0x1cf0   :  { %2821 = vbcast.lane.b32.xlu0 %v2819_v3, 256 }
0x1d67   :  { %v4492_v29 = vpop.xlane.xlu0 %2631  ;;  %v4494_v5 = vpop.xlane.xlu1 %2634 }
0x1d6b   :  { %v2822_v2 = vpop.permute.xlu0 %2821  ;;  %v2829_v28 = vpop.permute.xlu1 %2828 }
0x1d6c   :  { %v2832_v35 = vadd.f32 %v2822_v2, %v4492_v29  ;;  %v2833_v33 = vadd.f32 %v2829_v28, %v4494_v5 }
0x1d6e   :  { %v4499_v25 = vadd.f32 %v2832_v35, %v4123_v36  ;;  %v4502_v17 = vadd.f32 %v2832_v35, %v4127_v38  ;;  %v4507_v1 = vadd.f32 %v2832_v35, %v4125_v37  ;;  %v4510_v10 = vadd.f32 %v2833_v33, %v4127_v38 }
0x1d6f   :  { %v4515_v19 = vadd.f32 %v2832_v35, %v4150_v51  ;;  %v4518_v47 = vadd.f32 %v2833_v33, %v4125_v37  ;;  %v4523_v23 = vadd.f32 %v2833_v33, %v4150_v51  ;;  %v4526_v38 = vadd.f32 %v2833_v33, %v4123_v36 }
0x1d70   :  { %2855 = vperm.xlu0 %3708, %v4499_v25   ;;  %2858 = vperm.xlu1 %3707, %v4502_v17   ;;  %v4531_v9 = vadd.f32 %v2833_v33, %v4156_v54  ;;  %v4534_v37 = vadd.f32 %v2832_v35, %v4156_v54 }
0x1d74   :  { %2861 = vperm.xlu0 %3708, %v4507_v1   ;;  %2873 = vperm.xlu1 %3707, %v4510_v10  }
0x1d78   :  { %2864 = vperm.xlu0 %3708, %v4515_v19   ;;  %2876 = vperm.xlu1 %3707, %v4518_v47  }
0x1d7c   :  { %2879 = vperm.xlu1 %3707, %v4523_v23   ;;  %2870 = vperm.xlu0 %3708, %v4526_v38  }
0x1d80   :  { %2882 = vperm.xlu1 %3707, %v4531_v9   ;;  %2867 = vperm.xlu0 %3708, %v4534_v37  }
0x1d84   :  { %3125 = vbcast.lane.b32.xlu0 %v4092_v13, 256 }
0x1def   :  { %v2856_v51 = vpop.permute.xlu0 %2855  ;;  %v2859_v24 = vpop.permute.xlu1 %2858 }
0x1df0   :  { %v2887_v21 = vrot.slane %v2856_v51, %v4184_v61  ;;  %v2891_v49 = vrot.slane %v2859_v24, %v4184_v61 }
0x1df2   :  { %v2924_v51 = vsel %vm1396_vm5, %v2891_v49, %v2887_v21 }
0x1df3   :  { %v2862_v36 = vpop.permute.xlu0 %2861  ;;  %v2874_v20 = vpop.permute.xlu1 %2873 }
0x1df4   :  { %v2895_v54 = vrot.slane %v2862_v36, %v4184_v61  ;;  %v2911_v28 = vrot.slane %v2874_v20, %v4184_v61 }
0x1df6   :  { %v2925_v36 = vsel %vm1398_vm6, %v2895_v54, %v2924_v51 }
0x1df7   :  { %v2865_v16 = vpop.permute.xlu0 %2864  ;;  %v2877_v50 = vpop.permute.xlu1 %2876 }
0x1df8   :  { %v2899_v13 = vrot.slane %v2865_v16, %v4184_v61  ;;  %v2915_v33 = vrot.slane %v2877_v50, %v4184_v61 }
0x1dfa   :  { %v2926_v50 = vsel %vm1400_vm7, %v2899_v13, %v2925_v36 }
0x1dfb   :  { %v2871_v3 = vpop.permute.xlu0 %2870  ;;  %v2880_v2 = vpop.permute.xlu1 %2879 }
0x1dfc   :  { %v2907_v35 = vrot.slane %v2871_v3, %v4184_v61  ;;  %v2919_v31 = vrot.slane %v2880_v2, %v4184_v61 }
0x1dfe   :  { %v2928_v34 = vsel %vm1396_vm5, %v2911_v28, %v2907_v35 }
0x1dff   :  { %v2868_v7 = vpop.permute.xlu0 %2867  ;;  %v2883_v24 = vpop.permute.xlu1 %2882  ;;  %v2929_v39 = vsel %vm1398_vm6, %v2915_v33, %v2928_v34 }
0x1e00   :  { %v2903_v20 = vrot.slane %v2868_v7, %v4184_v61  ;;  %v2923_v3 = vrot.slane %v2883_v24, %v4184_v61  ;;  %v2930_v16 = vsel %vm1400_vm7, %v2919_v31, %v2929_v39  ;;  %v3445_v7 = vld [vmem:[%s5160_s9] ss:$0 sm:$0xff]  ;;  %s3804_s9 = smov [#allocation5]  }
0x1e01   :  { %s3409_s2 = sshll.u32 %s3804_s9, 4  ;;  %s3410_s2 = int_to_ptr.vmem [resolvable:$true] %s3409_s2 }
0x1e02   :  { %v2927_v28 = vsel %vm1402_vm8, %v2903_v20, %v2926_v50  ;;  %v2931_v2 = vsel %vm1402_vm8, %v2923_v3, %v2930_v16  ;;  %s3773_s18 = scalar_lea.vmem %s3410_s2, 32  ;;  %p3778_p1 = scmp.lt.s32.totalorder %s3410_s2, %s3410_s2 }
0x1e03   :  { %v2934_v21 = vsel %vm1205_vm4, %v2927_v28, -inf  ;;  %v2937_v49 = vsel %vm1205_vm4, %v2931_v2, -inf  ;;  %v3126_v31 = vpop.permute.xlu0 %3125  ;;  %p3774_p0 = scmp.ne.s32.totalorder %s3410_s2, %s3773_s18  ;;  %p3779_p2 = scmp.lt.s32.totalorder %s3773_s18, %s3773_s18 }
0x1e04   :  { %2935 = vmax.xlane.f32.xlu0 %v2934_v21  ;;  %2938 = vmax.xlane.f32.xlu1 %v2937_v49 }
0x1e05   :  { %p3780_p3 = por %p3779_p2, %p3778_p1 }
0x1e07   :  { %p3781_p4 = pnand %p3780_p3, %p3774_p0 }
0x1e15   :  { %3132 = vbcast.lane.b32.xlu1 %v4097_v15, 256 }
0x1e1a   :  { %3145 = vbcast.lane.b32.xlu0 %v3445_v7, 256 }
0x1e91   :  { %v2936_v39 = vpop.xlane.xlu0 %2935  ;;  %v4563_v34 = vpop.xlane.xlu1 %2938 }
0x1e92   :  { %v3136_v54 = vadd.f32 %v3126_v31, %v2936_v39  ;;  %v2945_v20 = vrot.slane %v2936_v39, %v4033_v52  ;;  %v2949_v21 = vrot.slane %v2936_v39, %v4053_v14  ;;  %v2965_v7 = vrot.slane %v4563_v34, %v4033_v52 }
0x1e94   :  { %vm2992_vm10 = vcmp.ge.f32.partialorder %v4499_v25, %v2945_v20  ;;  %vm2993_vm11 = vcmp.ge.f32.partialorder %v4502_v17, %v2949_v21  ;;  %vm2997_vm12 = vcmp.ge.f32.partialorder %v4526_v38, %v2965_v7  ;;  %v2961_v17 = vrot.slane %v2936_v39, %v4117_v32 }
0x1e95   :  { %v3146_v35 = vpop.permute.xlu0 %3145  ;;  %v3133_v13 = vpop.permute.xlu1 %3132  ;;  %v2973_v38 = vrot.slane %v4563_v34, %v4050_v6  ;;  %v2677_v7 = vrot.slane %v4494_v5, %v4117_v32 }
0x1e96   :  { %v4565_v33 = vadd.f32 %v3146_v35, %v3136_v54  ;;  %v3137_v51 = vadd.f32 %v3133_v13, %v4563_v34  ;;  %v2969_v54 = vrot.slane %v4563_v34, %v4053_v14  ;;  %vm2996_vm15 = vcmp.ge.f32.partialorder %v4534_v37, %v2961_v17 }
0x1e97   :  { %vm2999_vm0 = vcmp.ge.f32.partialorder %v4518_v47, %v2973_v38  ;;  %v2661_v37 = vrot.slane %v4494_v5, %v4033_v52  ;;  %v2977_v47 = vrot.slane %v4563_v34, %v4063_v0 }
0x1e98   :  { %v4568_v24 = vadd.f32 %v3146_v35, %v3137_v51  ;;  %3153 = vperm.xlu1 %3707, %v4565_v33   ;;  %vm2998_vm13 = vcmp.ge.f32.partialorder %v4510_v10, %v2969_v54  ;;  %v2953_v35 = vrot.slane %v2936_v39, %v4050_v6  ;;  %v2645_v51 = vrot.slane %v4492_v29, %v4053_v14 }
0x1e99   :  { %vm2693_vm3 = vcmp.ge.f32.partialorder %v4457_v43, %v2661_v37  ;;  %v2653_v43 = vrot.slane %v4492_v29, %v4063_v0 }
0x1e9a   :  { %3156 = vperm.xlu0 %3708, %v4568_v24   ;;  %vm2994_vm14 = vcmp.ge.f32.partialorder %v4507_v1, %v2953_v35  ;;  %vm2689_vm1 = vcmp.ge.f32.partialorder %v4433_v55, %v2645_v51  ;;  %v2957_v1 = vrot.slane %v2936_v39, %v4063_v0  ;;  %v2649_v55 = vrot.slane %v4492_v29, %v4050_v6 }
0x1e9c   :  { %vm2995_vm2 = vcmp.ge.f32.partialorder %v4515_v19, %v2957_v1  ;;  %v2981_v19 = vrot.slane %v4563_v34, %v4117_v32 }
0x1e9e   :  { %1479 = vbcast.lane.b32.xlu0 %v4180_v60, 256 }
0x1f17   :  { %v3154_v15 = vpop.permute.xlu1 %3153 }
0x1f18   :  { %v3161_v3 = vrot.slane %v3154_v15, %v4184_v61 }
0x1f19   :  { %v3157_v36 = vpop.permute.xlu0 %3156 }
0x1f1a   :  { %v3165_v16 = vrot.slane %v3157_v36, %v4184_v61 }
0x1f1c   :  { %v3166_v50 = vsel %vm1396_vm5, %v3165_v16, %v3161_v3 }
0x1f1d   :  { %v4577_v28 = vpop.permute.xlu0 %1479  ;;  %v3169_v2 = vsel %vm3168_vm9, %v3166_v50, -inf }
0x1f1e   :  { %3170 = vmax.xlane.f32.xlu1 %v3169_v2  ;;  %v3002_v49 = vsel %vm2992_vm10, %v4577_v28, 5  ;;  %v3003_v31 = vsel %vm2993_vm11, %v4577_v28, 5  ;;  %v3007_v25 = vsel %vm2997_vm12, %v4577_v28, 5  ;;  %v3008_v13 = vsel %vm2998_vm13, %v4577_v28, 5 }
0x1f1f   :  { %3013 = vperm.xlu0 %3708, %v3002_v49   ;;  %v3004_v15 = vsel %vm2994_vm14, %v4577_v28, 5  ;;  %v3006_v10 = vsel %vm2996_vm15, %v4577_v28, 5  ;;  %v3009_v36 = vsel %vm2999_vm0, %v4577_v28, 5  ;;  %v2699_v20 = vsel %vm2689_vm1, %v4577_v28, 5 }
0x1f20   :  { %v3005_v39 = vsel %vm2995_vm2, %v4577_v28, 5  ;;  %v2703_v3 = vsel %vm2693_vm3, %v4577_v28, 5  ;;  %vm3000_vm10 = vcmp.ge.f32.partialorder %v4523_v23, %v2977_v47  ;;  %vm2690_vm11 = vcmp.ge.f32.partialorder %v4438_v48, %v2649_v55 }
0x1f21   :  { %v3010_v16 = vsel %vm3000_vm10, %v4577_v28, 5  ;;  %v2700_v50 = vsel %vm2690_vm11, %v4577_v28, 5  ;;  %vm3001_vm12 = vcmp.ge.f32.partialorder %v4531_v9, %v2981_v19  ;;  %vm2691_vm13 = vcmp.ge.f32.partialorder %v4446_v53, %v2653_v43 }
0x1f22   :  { %v2641_v23 = vrot.slane %v4492_v29, %v4033_v52  ;;  %v2657_v48 = vrot.slane %v4492_v29, %v4117_v32  ;;  %v3011_v34 = vsel %vm3001_vm12, %v4577_v28, 5  ;;  %v2701_v2 = vsel %vm2691_vm13, %v4577_v28, 5 }
0x1f23   :  { %3016 = vperm.xlu0 %3708, %v3003_v31   ;;  %v2665_v9 = vrot.slane %v4494_v5, %v4053_v14  ;;  %v2669_v29 = vrot.slane %v4494_v5, %v4050_v6  ;;  %vm2697_vm3 = vcmp.ge.f32.partialorder %v4462_v4, %v2677_v7 }
0x1f24   :  { %vm2688_vm14 = vcmp.ge.f32.partialorder %v4430_v58, %v2641_v23  ;;  %vm2692_vm15 = vcmp.ge.f32.partialorder %v4465_v44, %v2657_v48  ;;  %v2673_v58 = vrot.slane %v4494_v5, %v4063_v0  ;;  %v2707_v31 = vsel %vm2697_vm3, %v4577_v28, 5 }
0x1f25   :  { %v2698_v53 = vsel %vm2688_vm14, %v4577_v28, 5  ;;  %v2702_v21 = vsel %vm2692_vm15, %v4577_v28, 5  ;;  %vm2694_vm0 = vcmp.ge.f32.partialorder %v4441_v57, %v2665_v9  ;;  %vm2695_vm1 = vcmp.ge.f32.partialorder %v4449_v18, %v2669_v29 }
0x1f26   :  { %v2704_v49 = vsel %vm2694_vm0, %v4577_v28, 5  ;;  %v2705_v44 = vsel %vm2695_vm1, %v4577_v28, 5  ;;  %vm2696_vm2 = vcmp.ge.f32.partialorder %v4454_v56, %v2673_v58 }
0x1f27   :  { %3028 = vperm.xlu0 %3708, %v3007_v25   ;;  %v2706_v57 = vsel %vm2696_vm2, %v4577_v28, 5 }
0x1f2b   :  { %3031 = vperm.xlu0 %3708, %v3008_v13  }
0x1f2f   :  { %3019 = vperm.xlu0 %3708, %v3004_v15   ;;  %3025 = vperm.xlu1 %3707, %v3006_v10  }
0x1f33   :  { %3034 = vperm.xlu0 %3708, %v3009_v36   ;;  %2712 = vperm.xlu1 %3707, %v2699_v20  }
0x1f37   :  { %3022 = vperm.xlu0 %3708, %v3005_v39   ;;  %2724 = vperm.xlu1 %3707, %v2703_v3  }
0x1f3b   :  { %3037 = vperm.xlu0 %3708, %v3010_v16   ;;  %2715 = vperm.xlu1 %3707, %v2700_v50  }
0x1f3f   :  { %3040 = vperm.xlu0 %3708, %v3011_v34   ;;  %2718 = vperm.xlu1 %3707, %v2701_v2  }
0x1f43   :  { %2709 = vperm.xlu0 %3708, %v2698_v53   ;;  %2721 = vperm.xlu1 %3707, %v2702_v21  }
0x1f47   :  { %2727 = vperm.xlu0 %3708, %v2704_v49  }
0x1f4b   :  { %2730 = vperm.xlu0 %3708, %v2705_v44  }
0x1f4f   :  { %2733 = vperm.xlu0 %3708, %v2706_v57  }
0x1f53   :  { %2736 = vperm.xlu0 %3708, %v2707_v31  }
0x1f9e   :  { %v3014_v18 = vpop.permute.xlu0 %3013 }
0x1f9f   :  { %v3045_v10 = vrot.slane %v3014_v18, %v4184_v61 }
0x1fa2   :  { %v3017_v54 = vpop.permute.xlu0 %3016 }
0x1fa3   :  { %v3049_v56 = vrot.slane %v3017_v54, %v4184_v61 }
0x1fa5   :  { %v3082_v4 = vsel %vm1396_vm5, %v3049_v56, %v3045_v10 }
0x1fa6   :  { %v3029_v25 = vpop.permute.xlu0 %3028 }
0x1fa7   :  { %v3065_v9 = vrot.slane %v3029_v25, %v4184_v61 }
0x1faa   :  { %v3032_v35 = vpop.permute.xlu0 %3031 }
0x1fab   :  { %v3171_v17 = vpop.xlane.xlu1 %3170  ;;  %v3069_v48 = vrot.slane %v3032_v35, %v4184_v61 }
0x1fad   :  { %v3086_v49 = vsel %vm1396_vm5, %v3069_v48, %v3065_v9 }
0x1fae   :  { %v3020_v13 = vpop.permute.xlu0 %3019 }
0x1faf   :  { %v3026_v38 = vpop.permute.xlu1 %3025  ;;  %v3053_v5 = vrot.slane %v3020_v13, %v4184_v61 }
0x1fb0   :  { %v3061_v47 = vrot.slane %v3026_v38, %v4184_v61 }
0x1fb1   :  { %v3083_v20 = vsel %vm1398_vm6, %v3053_v5, %v3082_v4 }
0x1fb2   :  { %v3035_v51 = vpop.permute.xlu0 %3034 }
0x1fb3   :  { %v2713_v15 = vpop.permute.xlu1 %2712  ;;  %v3073_v2 = vrot.slane %v3035_v51, %v4184_v61 }
0x1fb4   :  { %v2745_v58 = vrot.slane %v2713_v15, %v4184_v61 }
0x1fb5   :  { %v3087_v57 = vsel %vm1398_vm6, %v3073_v2, %v3086_v49 }
0x1fb6   :  { %v3023_v1 = vpop.permute.xlu0 %3022 }
0x1fb7   :  { %v3057_v37 = vrot.slane %v3023_v1, %v4184_v61  ;;  %v4659_v36 = vpop.permute.xlu1 %2724 }
0x1fb9   :  { %v3084_v55 = vsel %vm1400_vm7, %v3057_v37, %v3083_v20  ;;  %v3176_v37 = vrot.slane %v3171_v17, %v4033_v52 }
0x1fba   :  { %v3038_v39 = vpop.permute.xlu0 %3037  ;;  %v3085_v3 = vsel %vm1402_vm8, %v3061_v47, %v3084_v55  ;;  %v3180_v47 = vrot.slane %v3171_v17, %v4053_v14 }
0x1fbb   :  { %v2716_v19 = vpop.permute.xlu1 %2715  ;;  %v4666_v43 = vsel %vm1205_vm4, %v3085_v3, 2147483647  ;;  %v3077_v53 = vrot.slane %v3038_v39, %v4184_v61  ;;  %vm3183_vm10 = vcmp.ge.f32.partialorder %v4565_v33, %v3176_v37  ;;  %v2357_v33 = vrot.slane %v4425_v63, %v4033_v52 }
0x1fbc   :  { %v3092_v16 = vshra.s32 %v4666_v43, 16  ;;  %v2749_v31 = vrot.slane %v2716_v19, %v4184_v61  ;;  %v3185_v39 = vsel %vm3183_vm10, %v4577_v28, 5  ;;  %vm3184_vm11 = vcmp.ge.f32.partialorder %v4568_v24, %v3180_v47 }
0x1fbd   :  { %v3088_v18 = vsel %vm1400_vm7, %v3077_v53, %v3087_v57  ;;  %v3186_v3 = vsel %vm3184_vm11, %v4577_v28, 5  ;;  %vm2389_vm13 = vcmp.ge.f32.partialorder %v4387_v45, %v2357_v33  ;;  %v2361_v24 = vrot.slane %v4425_v63, %v4053_v14 }
0x1fbe   :  { %v3041_v50 = vpop.permute.xlu0 %3040  ;;  %v4669_v23 = vcvt.s32.f32 %v3092_v16  ;;  %v2337_v16 = vrot.slane %v4423_v22, %v4033_v52  ;;  %v2399_v2 = vsel %vm2389_vm13, %v4577_v28, 5  ;;  %v2365_v45 = vrot.slane %v4425_v63, %v4050_v6 }
0x1fbf   :  { %v2719_v34 = vpop.permute.xlu1 %2718  ;;  %v3081_v21 = vrot.slane %v3041_v50, %v4184_v61  ;;  %vm2390_vm14 = vcmp.ge.f32.partialorder %v4371_v46, %v2361_v24 }
0x1fc0   :  { %3095 = vmin.xlane.f32.xlu0 %v4669_v23  ;;  %v2753_v54 = vrot.slane %v2719_v34, %v4184_v61  ;;  %vm2384_vm12 = vcmp.ge.f32.partialorder %v4360_v62, %v2337_v16  ;;  %v2761_v62 = vrot.slane %v4659_v36, %v4184_v61  ;;  %v2400_v49 = vsel %vm2390_vm14, %v4577_v28, 5 }
0x1fc1   :  { %v3089_v35 = vsel %vm1402_vm8, %v3081_v21, %v3088_v18  ;;  %v2394_v17 = vsel %vm2384_vm12, %v4577_v28, 5  ;;  %vm2391_vm15 = vcmp.ge.f32.partialorder %v4379_v59, %v2365_v45  ;;  %v2345_v59 = vrot.slane %v4423_v22, %v4050_v6 }
0x1fc2   :  { %v2710_v29 = vpop.permute.xlu0 %2709  ;;  %v4694_v5 = vsel %vm1205_vm4, %v3089_v35, 2147483647  ;;  %v2401_v46 = vsel %vm2391_vm15, %v4577_v28, 5 }
0x1fc3   :  { %v2741_v44 = vrot.slane %v2710_v29, %v4184_v61  ;;  %v2722_v7 = vpop.permute.xlu1 %2721  ;;  %v3107_v4 = vshra.s32 %v4694_v5, 16  ;;  %vm2386_vm2 = vcmp.ge.f32.partialorder %v4368_v42, %v2345_v59  ;;  %v3091_v42 = vand.u32 65535, %v4666_v43  ;;  %v5241_v59 = vld [vmem:[#allocation41_spill] sm:$0xff] }
0x1fc4   :  { %v2757_v38 = vrot.slane %v2722_v7, %v4184_v61  ;;  %v2369_v7 = vrot.slane %v4425_v63, %v4063_v0  ;;  %v3106_v43 = vand.u32 65535, %v4694_v5 }
0x1fc5   :  { %v2778_v25 = vsel %vm1396_vm5, %v2745_v58, %v2741_v44  ;;  %v4702_v20 = vcvt.s32.f32 %v3107_v4 }
0x1fc6   :  { %v2779_v13 = vsel %vm1398_vm6, %v2749_v31, %v2778_v25  ;;  %v2728_v55 = vpop.permute.xlu0 %2727  ;;  %vm2392_vm0 = vcmp.ge.f32.partialorder %v4384_v11, %v2369_v7  ;;  %v2341_v25 = vrot.slane %v4423_v22, %v4053_v14  ;;  %v2349_v11 = vrot.slane %v4423_v22, %v4063_v0 }
0x1fc7   :  { %v2780_v51 = vsel %vm1400_vm7, %v2753_v54, %v2779_v13  ;;  %v2765_v48 = vrot.slane %v2728_v55, %v4184_v61  ;;  %v2402_v31 = vsel %vm2392_vm0, %v4577_v28, 5  ;;  %v2396_v13 = vsel %vm2386_vm2, %v4577_v28, 5 }
0x1fc8   :  { %v2781_v56 = vsel %vm1402_vm8, %v2757_v38, %v2780_v51  ;;  %vm2385_vm1 = vcmp.ge.f32.partialorder %v4363_v41, %v2341_v25  ;;  %vm2387_vm3 = vcmp.ge.f32.partialorder %v4376_v30, %v2349_v11  ;;  %v2353_v38 = vrot.slane %v4423_v22, %v4117_v32 }
0x1fc9   :  { %v4691_v15 = vsel %vm1205_vm4, %v2781_v56, 2147483647  ;;  %v2782_v29 = vsel %vm1396_vm5, %v2765_v48, %v2761_v62  ;;  %v2395_v35 = vsel %vm2385_vm1, %v4577_v28, 5  ;;  %v2397_v41 = vsel %vm2387_vm3, %v4577_v28, 5 }
0x1fca   :  { %v2788_v10 = vshra.s32 %v4691_v15, 16  ;;  %v2731_v19 = vpop.permute.xlu0 %2730  ;;  %vm2388_vm10 = vcmp.ge.f32.partialorder %v4395_v8, %v2353_v38  ;;  %v2373_v55 = vrot.slane %v4425_v63, %v4117_v32  ;;  %v2787_v5 = vand.u32 65535, %v4691_v15 }
0x1fcb   :  { %v2769_v9 = vrot.slane %v2731_v19, %v4184_v61  ;;  %v2398_v51 = vsel %vm2388_vm10, %v4577_v28, 5  ;;  %v3108_v19 = vcvt.s32.f32 %v3106_v43  ;;  %v2060_v38 = vrot.slane %v4355_v12, %v4050_v6 }
0x1fcc   :  { %v4697_v1 = vcvt.s32.f32 %v2788_v10  ;;  %v3093_v10 = vcvt.s32.f32 %v3091_v42  ;;  %vm2393_vm12 = vcmp.ge.f32.partialorder %v4392_v27, %v2373_v55  ;;  %v2789_v27 = vcvt.s32.f32 %v2787_v5 }
0x1fcd   :  { %v2783_v58 = vsel %vm1398_vm6, %v2769_v9, %v2782_v29  ;;  %v2403_v16 = vsel %vm2393_vm12, %v4577_v28, 5 }
0x1fce   :  { %2791 = vmin.xlane.f32.xlu1 %v4697_v1  ;;  %v2734_v50 = vpop.permute.xlu0 %2733 }
0x1fcf   :  { %v2773_v53 = vrot.slane %v2734_v50, %v4184_v61 }
0x1fd1   :  { %v2784_v44 = vsel %vm1400_vm7, %v2773_v53, %v2783_v58 }
0x1fd2   :  { %3110 = vmin.xlane.f32.xlu1 %v4702_v20  ;;  %v2737_v34 = vpop.permute.xlu0 %2736 }
0x1fd3   :  { %v2777_v21 = vrot.slane %v2737_v34, %v4184_v61 }
0x1fd5   :  { %v2785_v36 = vsel %vm1402_vm8, %v2777_v21, %v2784_v44 }
0x1fd6   :  { %3188 = vperm.xlu0 %3708, %v3185_v39   ;;  %v2801_v57 = vsel %vm1205_vm4, %v2785_v36, 2147483647 }
0x1fd7   :  { %v2803_v18 = vshra.s32 %v2801_v57, 16 }
0x1fd9   :  { %v2805_v54 = vcvt.s32.f32 %v2803_v18  ;;  %v2032_v18 = vrot.slane %v4353_v40, %v4033_v52 }
0x1fda   :  { %3191 = vperm.xlu0 %3708, %v3186_v3  }
0x1fdb   :  { %vm2079_vm0 = vcmp.ge.f32.partialorder %v4289_v26, %v2032_v18  ;;  %v5246_v18 = vld [vmem:[#allocation36_spill] sm:$0xff] }
0x1fdc   :  { %v2089_v25 = vsel %vm2079_vm0, %v4577_v28, 5 }
0x1fe3   :  { %2405 = vperm.xlu1 %3707, %v2394_v17  }
0x1fe7   :  { %2420 = vperm.xlu1 %3707, %v2399_v2  }
0x1feb   :  { %2423 = vperm.xlu1 %3707, %v2400_v49  }
0x1fef   :  { %2426 = vperm.xlu1 %3707, %v2401_v46  }
0x1ff3   :  { %2429 = vperm.xlu1 %3707, %v2402_v31  }
0x1ff9   :  { %2806 = vmin.xlane.f32.xlu0 %v2805_v54 }
0x200f   :  { %2408 = vperm.xlu0 %3708, %v2395_v35   ;;  %v2056_v35 = vrot.slane %v4355_v12, %v4053_v14 }
0x2013   :  { %2411 = vperm.xlu0 %3708, %v2396_v13   ;;  %v5242_v13 = vld [vmem:[#allocation38_spill] sm:$0xff] }
0x2014   :  { %vm2085_vm2 = vcmp.ge.f32.partialorder %v5242_v13, %v2056_v35  ;;  %v2048_v13 = vrot.slane %v4353_v40, %v4117_v32 }
0x2015   :  { %v2095_v26 = vsel %vm2085_vm2, %v4577_v28, 5 }
0x2017   :  { %2414 = vperm.xlu0 %3708, %v2397_v41   ;;  %v5243_v41 = vld [vmem:[#allocation40_spill] sm:$0xff] }
0x2018   :  { %vm2086_vm3 = vcmp.ge.f32.partialorder %v5243_v41, %v2060_v38  ;;  %v5249_v41 = vld [vmem:[#allocation43_spill] sm:$0xff] }
0x2019   :  { %v2096_v42 = vsel %vm2086_vm3, %v4577_v28, 5 }
0x201b   :  { %2417 = vperm.xlu0 %3708, %v2398_v51   ;;  %v2064_v51 = vrot.slane %v4355_v12, %v4063_v0 }
0x204d   :  { %v4758_v56 = vpop.xlane.xlu0 %3095 }
0x204e   :  { %vm3097_vm11 = vcmp.eq.f32.partialorder %v4669_v23, %v4758_v56 }
0x204f   :  { %v3098_v30 = vsel %vm3097_vm11, %v3093_v10, inf  ;;  %v5244_v10 = vld [vmem:[#allocation42_spill] sm:$0xff] }
0x2050   :  { %3099 = vmin.xlane.f32.xlu1 %v3098_v30  ;;  %vm2087_vm10 = vcmp.ge.f32.partialorder %v5244_v10, %v2064_v51  ;;  %v2068_v30 = vrot.slane %v4355_v12, %v4117_v32 }
0x2055   :  { %v3189_v4 = vpop.permute.xlu0 %3188 }
0x2056   :  { %v3196_v37 = vrot.slane %v3189_v4, %v4184_v61  ;;  %v2097_v4 = vsel %vm2087_vm10, %v4577_v28, 5 }
0x2059   :  { %v3192_v22 = vpop.permute.xlu0 %3191 }
0x205a   :  { %v3200_v47 = vrot.slane %v3192_v22, %v4184_v61  ;;  %v5245_v22 = vld [vmem:[#allocation44_spill] sm:$0xff] }
0x205b   :  { %v4764_v8 = vpop.xlane.xlu1 %2791  ;;  %vm2088_vm11 = vcmp.ge.f32.partialorder %v5245_v22, %v2068_v30 }
0x205c   :  { %v3201_v39 = vsel %vm1396_vm5, %v3200_v47, %v3196_v37  ;;  %vm2793_vm14 = vcmp.eq.f32.partialorder %v4697_v1, %v4764_v8  ;;  %v2098_v47 = vsel %vm2088_vm11, %v4577_v28, 5  ;;  %v2798_v10 = vcvt.f32.s32 %v4764_v8 }
0x205d   :  { %v4771_v3 = vsel %vm3168_vm9, %v3201_v39, 2147483647  ;;  %v2794_v17 = vsel %vm2793_vm14, %v2789_v27, inf }
0x205e   :  { %v3204_v50 = vshra.s32 %v4771_v3, 16  ;;  %v2799_v22 = vshll.u32 %v2798_v10, 16 }
0x205f   :  { %v4773_v23 = vpop.xlane.xlu1 %3110 }
0x2060   :  { %vm3112_vm13 = vcmp.eq.f32.partialorder %v4702_v20, %v4773_v23  ;;  %v4781_v33 = vcvt.s32.f32 %v3204_v50  ;;  %v2802_v20 = vand.u32 65535, %v2801_v57 }
0x2061   :  { %2432 = vperm.xlu1 %3707, %v2403_v16   ;;  %v3113_v63 = vsel %vm3112_vm13, %v3108_v19, inf  ;;  %v3102_v19 = vcvt.f32.s32 %v4758_v56 }
0x2062   :  { %3114 = vmin.xlane.f32.xlu0 %v3113_v63  ;;  %v2804_v48 = vcvt.s32.f32 %v2802_v20 }
0x2063   :  { %v2406_v9 = vpop.permute.xlu1 %2405  ;;  %v3103_v63 = vshll.u32 %v3102_v19, 16 }
0x2064   :  { %v2437_v21 = vrot.slane %v2406_v9, %v4184_v61 }
0x2066   :  { %3207 = vmin.xlane.f32.xlu0 %v4781_v33 }
0x2067   :  { %v2421_v37 = vpop.permute.xlu1 %2420 }
0x2068   :  { %v2457_v27 = vrot.slane %v2421_v37, %v4184_v61 }
0x206a   :  { %2795 = vmin.xlane.f32.xlu0 %v2794_v17 }
0x206b   :  { %v2424_v55 = vpop.permute.xlu1 %2423 }
0x206c   :  { %v2461_v16 = vrot.slane %v2424_v55, %v4184_v61 }
0x206f   :  { %v2427_v43 = vpop.permute.xlu1 %2426 }
0x2073   :  { %v2430_v39 = vpop.permute.xlu1 %2429 }
0x2074   :  { %v2469_v17 = vrot.slane %v2430_v39, %v4184_v61 }
0x2086   :  { %v4786_v24 = vpop.xlane.xlu0 %2806 }
0x2087   :  { %vm2808_vm15 = vcmp.eq.f32.partialorder %v2805_v54, %v4786_v24  ;;  %v2052_v54 = vrot.slane %v4355_v12, %v4033_v52  ;;  %v2465_v12 = vrot.slane %v2427_v43, %v4184_v61  ;;  %v2813_v30 = vcvt.f32.s32 %v4786_v24 }
0x2088   :  { %v2809_v34 = vsel %vm2808_vm15, %v2804_v48, inf  ;;  %v2478_v48 = vsel %vm1396_vm5, %v2461_v16, %v2457_v27  ;;  %vm2083_vm15 = vcmp.ge.f32.partialorder %v5249_v41, %v2048_v13 }
0x2089   :  { %2810 = vmin.xlane.f32.xlu1 %v2809_v34  ;;  %vm2084_vm1 = vcmp.ge.f32.partialorder %v5241_v59, %v2052_v54  ;;  %v2040_v54 = vrot.slane %v4353_v40, %v4050_v6  ;;  %v2044_v59 = vrot.slane %v4353_v40, %v4063_v0  ;;  %v2093_v51 = vsel %vm2083_vm15, %v4577_v28, 5 }
0x208a   :  { %v2094_v11 = vsel %vm2084_vm1, %v4577_v28, 5 }
0x208e   :  { %v2409_v2 = vpop.permute.xlu0 %2408 }
0x208f   :  { %v2441_v62 = vrot.slane %v2409_v2, %v4184_v61  ;;  %v2479_v2 = vsel %vm1398_vm6, %v2465_v12, %v2478_v48 }
0x2090   :  { %v2480_v56 = vsel %vm1400_vm7, %v2469_v17, %v2479_v2 }
0x2091   :  { %v2474_v29 = vsel %vm1396_vm5, %v2441_v62, %v2437_v21  ;;  %v3117_v21 = vcvt.f32.s32 %v4773_v23 }
0x2092   :  { %v2412_v15 = vpop.permute.xlu0 %2411 }
0x2093   :  { %v2445_v1 = vrot.slane %v2412_v15, %v4184_v61 }
0x2095   :  { %v2475_v58 = vsel %vm1398_vm6, %v2445_v1, %v2474_v29  ;;  %v3118_v29 = vshll.u32 %v3117_v21, 16 }
0x2096   :  { %v2415_v53 = vpop.permute.xlu0 %2414 }
0x2097   :  { %v2449_v45 = vrot.slane %v2415_v53, %v4184_v61 }
0x2099   :  { %v2476_v36 = vsel %vm1400_vm7, %v2449_v45, %v2475_v58 }
0x209a   :  { %v2418_v49 = vpop.permute.xlu0 %2417 }
0x209b   :  { %v2453_v44 = vrot.slane %v2418_v49, %v4184_v61 }
0x209d   :  { %v2477_v7 = vsel %vm1402_vm8, %v2453_v44, %v2476_v36 }
0x209e   :  { %v4799_v46 = vsel %vm1205_vm4, %v2477_v7, 2147483647 }
0x209f   :  { %v2484_v57 = vshra.s32 %v4799_v46, 16 }
0x20a1   :  { %v4802_v31 = vcvt.s32.f32 %v2484_v57  ;;  %v2036_v57 = vrot.slane %v4353_v40, %v4053_v14 }
0x20a3   :  { %2487 = vmin.xlane.f32.xlu1 %v4802_v31  ;;  %vm2080_vm12 = vcmp.ge.f32.partialorder %v5246_v18, %v2036_v57  ;;  %v5251_v57 = vld [vmem:[#allocation24_spill] sm:$0xff] }
0x20a4   :  { %v2090_v23 = vsel %vm2080_vm12, %v4577_v28, 5 }
0x20b4   :  { %2100 = vperm.xlu1 %3707, %v2089_v25   ;;  %v5247_v25 = vld [vmem:[#allocation37_spill] sm:$0xff] }
0x20b5   :  { %vm2081_vm13 = vcmp.ge.f32.partialorder %v5247_v25, %v2040_v54 }
0x20b6   :  { %v2091_v35 = vsel %vm2081_vm13, %v4577_v28, 5 }
0x20b8   :  { %2115 = vperm.xlu1 %3707, %v2094_v11   ;;  %v5248_v11 = vld [vmem:[#allocation39_spill] sm:$0xff] }
0x20b9   :  { %vm2082_vm14 = vcmp.ge.f32.partialorder %v5248_v11, %v2044_v59 }
0x20ba   :  { %v2092_v38 = vsel %vm2082_vm14, %v4577_v28, 5 }
0x20bc   :  { %2118 = vperm.xlu1 %3707, %v2095_v26  }
0x20c0   :  { %2121 = vperm.xlu1 %3707, %v2096_v42  }
0x20c4   :  { %2124 = vperm.xlu1 %3707, %v2097_v4  }
0x20c8   :  { %2127 = vperm.xlu1 %3707, %v2098_v47   ;;  %v2814_v47 = vshll.u32 %v2813_v30, 16 }
0x20dd   :  { %v3100_v50 = vpop.xlane.xlu1 %3099 }
0x20de   :  { %v3101_v5 = vcvt.f32.s32 %v3100_v50  ;;  %v3203_v50 = vand.u32 65535, %v4771_v3 }
0x20e0   :  { %v3104_v20 = vadd.s32 %v3103_v63, %v3101_v5  ;;  %v3205_v8 = vcvt.s32.f32 %v3203_v50  ;;  %v2483_v63 = vand.u32 65535, %v4799_v46  ;;  %v5253_v50 = vld [vmem:[#allocation23_spill] sm:$0xff] }
0x20e1   :  { %v2433_v34 = vpop.permute.xlu1 %2432 }
0x20e2   :  { %v2473_v15 = vrot.slane %v2433_v34, %v4184_v61  ;;  %v3223_v44 = vrot.slane %v3104_v20, %v4184_v61  ;;  %v2485_v5 = vcvt.s32.f32 %v2483_v63 }
0x20e4   :  { %v2481_v9 = vsel %vm1402_vm8, %v2473_v15, %v2480_v56 }
0x20e5   :  { %v4840_v62 = vsel %vm1205_vm4, %v2481_v9, 2147483647 }
0x20e6   :  { %v2499_v53 = vshra.s32 %v4840_v62, 16  ;;  %v2498_v59 = vand.u32 65535, %v4840_v62 }
0x20e8   :  { %v4843_v1 = vcvt.s32.f32 %v2499_v53  ;;  %v2500_v11 = vcvt.s32.f32 %v2498_v59 }
0x20ea   :  { %2502 = vmin.xlane.f32.xlu0 %v4843_v1 }
0x20ef   :  { %v3115_v45 = vpop.xlane.xlu0 %3114 }
0x20f0   :  { %v3116_v49 = vcvt.f32.s32 %v3115_v45 }
0x20f2   :  { %v3119_v58 = vadd.s32 %v3118_v29, %v3116_v49 }
0x20f3   :  { %v4866_v26 = vpop.xlane.xlu0 %3207 }
0x20f4   :  { %v3227_v36 = vrot.slane %v3119_v58, %v4184_v61  ;;  %vm3209_vm0 = vcmp.eq.f32.partialorder %v4781_v33, %v4866_v26 }
0x20f5   :  { %v3210_v24 = vsel %vm3209_vm0, %v3205_v8, inf  ;;  %v5254_v8 = vld [vmem:[#allocation35_spill] sm:$0xff] }
0x20f6   :  { %v4850_v7 = vsel %vm1396_vm5, %v3227_v36, %v3223_v44  ;;  %v5250_v44 = vld [vmem:[#allocation34_spill] sm:$0xff] }
0x20f7   :  { %v2796_v42 = vpop.xlane.xlu0 %2795  ;;  %v1732_v36 = vrot.slane %v5250_v44, %v4053_v14  ;;  %v1736_v18 = vrot.slane %v5250_v44, %v4050_v6 }
0x20f8   :  { %v2797_v4 = vcvt.f32.s32 %v2796_v42 }
0x20f9   :  { %vm1776_vm2 = vcmp.ge.f32.partialorder %v5251_v57, %v1732_v36 }
0x20fa   :  { %v2800_v40 = vadd.s32 %v2799_v22, %v2797_v4  ;;  %v1786_v54 = vsel %vm1776_vm2, %v4577_v28, 5 }
0x20fc   :  { %v3249_v39 = vrot.slane %v2800_v40, %v4184_v61 }
0x2100   :  { %2103 = vperm.xlu0 %3708, %v2090_v23   ;;  %v5252_v23 = vld [vmem:[#allocation26_spill] sm:$0xff] }
0x2101   :  { %vm1777_vm3 = vcmp.ge.f32.partialorder %v5252_v23, %v1736_v18 }
0x2102   :  { %v1787_v25 = vsel %vm1777_vm3, %v4577_v28, 5 }
0x2104   :  { %2106 = vperm.xlu0 %3708, %v2091_v35  }
0x2108   :  { %2109 = vperm.xlu0 %3708, %v2092_v38  }
0x210c   :  { %2112 = vperm.xlu0 %3708, %v2093_v51  }
0x2116   :  { %v2811_v37 = vpop.xlane.xlu1 %2810 }
0x2117   :  { %v2812_v55 = vcvt.f32.s32 %v2811_v37 }
0x2119   :  { %v2815_v43 = vadd.s32 %v2814_v47, %v2812_v55 }
0x211b   :  { %v3253_v19 = vrot.slane %v2815_v43, %v4184_v61 }
0x211d   :  { %v4875_v16 = vsel %vm1396_vm5, %v3253_v19, %v3249_v39  ;;  %v1728_v19 = vrot.slane %v5250_v44, %v4033_v52 }
0x211f   :  { %vm1775_vm11 = vcmp.ge.f32.partialorder %v5253_v50, %v1728_v19 }
0x2120   :  { %v1785_v63 = vsel %vm1775_vm11, %v4577_v28, 5  ;;  %vm3243_vm11 = vcmp.eq.s32.totalorder %v4180_v60, 6 }
0x212b   :  { %3211 = vmin.xlane.f32.xlu0 %v3210_v24  ;;  %v1748_v24 = vrot.slane %v5254_v8, %v4033_v52 }
0x2130   :  { %v4881_v12 = vpop.xlane.xlu1 %2487 }
0x2131   :  { %vm2489_vm1 = vcmp.eq.f32.partialorder %v4802_v31, %v4881_v12  ;;  %v2494_v57 = vcvt.f32.s32 %v4881_v12 }
0x2132   :  { %v2490_v27 = vsel %vm2489_vm1, %v2485_v5, inf  ;;  %v5255_v5 = vld [vmem:[#allocation29_spill] sm:$0xff] }
0x2133   :  { %2491 = vmin.xlane.f32.xlu0 %v2490_v27  ;;  %vm1780_vm12 = vcmp.ge.f32.partialorder %v5255_v5, %v1748_v24  ;;  %v1752_v27 = vrot.slane %v5254_v8, %v4053_v14 }
0x2134   :  { %v2101_v17 = vpop.permute.xlu1 %2100 }
0x2135   :  { %v2132_v30 = vrot.slane %v2101_v17, %v4184_v61  ;;  %v1790_v17 = vsel %vm1780_vm12, %v4577_v28, 5 }
0x2138   :  { %v2116_v20 = vpop.permute.xlu1 %2115 }
0x2139   :  { %v2152_v15 = vrot.slane %v2116_v20, %v4184_v61  ;;  %v5256_v20 = vld [vmem:[#allocation28_spill] sm:$0xff] }
0x213a   :  { %vm1781_vm13 = vcmp.ge.f32.partialorder %v5256_v20, %v1752_v27 }
0x213c   :  { %v2119_v48 = vpop.permute.xlu1 %2118 }
0x213d   :  { %v2156_v34 = vrot.slane %v2119_v48, %v4184_v61  ;;  %v1756_v48 = vrot.slane %v5254_v8, %v4050_v6 }
0x213f   :  { %v2173_v56 = vsel %vm1396_vm5, %v2156_v34, %v2152_v15  ;;  %v5257_v34 = vld [vmem:[#allocation30_spill] sm:$0xff]  ;;  %v5258_v15 = vld [vmem:[#allocation32_spill] sm:$0xff] }
0x2140   :  { %v2122_v3 = vpop.permute.xlu1 %2121  ;;  %vm1782_vm14 = vcmp.ge.f32.partialorder %v5257_v34, %v1756_v48 }
0x2141   :  { %v2160_v2 = vrot.slane %v2122_v3, %v4184_v61  ;;  %v1791_v3 = vsel %vm1781_vm13, %v4577_v28, 5 }
0x2143   :  { %v2174_v31 = vsel %vm1398_vm6, %v2160_v2, %v2173_v56  ;;  %v1792_v2 = vsel %vm1782_vm14, %v4577_v28, 5 }
0x2144   :  { %v2125_v33 = vpop.permute.xlu1 %2124 }
0x2145   :  { %v2164_v46 = vrot.slane %v2125_v33, %v4184_v61  ;;  %v1760_v33 = vrot.slane %v5254_v8, %v4063_v0 }
0x2147   :  { %v2175_v21 = vsel %vm1400_vm7, %v2164_v46, %v2174_v31  ;;  %vm1783_vm15 = vcmp.ge.f32.partialorder %v5258_v15, %v1760_v33  ;;  %v1764_v46 = vrot.slane %v5254_v8, %v4117_v32  ;;  %v5259_v31 = vld [vmem:[#allocation33_spill] sm:$0xff] }
0x2148   :  { %v2128_v9 = vpop.permute.xlu1 %2127  ;;  %v1793_v56 = vsel %vm1783_vm15, %v4577_v28, 5 }
0x2149   :  { %v2168_v53 = vrot.slane %v2128_v9, %v4184_v61  ;;  %v3214_v9 = vcvt.f32.s32 %v4866_v26  ;;  %vm1784_vm0 = vcmp.ge.f32.partialorder %v5259_v31, %v1764_v46 }
0x214b   :  { %v2176_v45 = vsel %vm1402_vm8, %v2168_v53, %v2175_v21  ;;  %v1794_v21 = vsel %vm1784_vm0, %v4577_v28, 5 }
0x214c   :  { %v4895_v29 = vsel %vm1205_vm4, %v2176_v45, 2147483647  ;;  %v3215_v45 = vshll.u32 %v3214_v9, 16 }
0x214d   :  { %v2194_v49 = vshra.s32 %v4895_v29, 16  ;;  %v2193_v12 = vand.u32 65535, %v4895_v29 }
0x214f   :  { %v4898_v58 = vcvt.s32.f32 %v2194_v49 }
0x2151   :  { %2197 = vmin.xlane.f32.xlu0 %v4898_v58 }
0x2167   :  { %1799 = vperm.xlu0 %3708, %v1786_v54  }
0x216b   :  { %1802 = vperm.xlu0 %3708, %v1787_v25   ;;  %v2495_v25 = vshll.u32 %v2494_v57, 16 }
0x2177   :  { %v4910_v35 = vpop.xlane.xlu0 %2502 }
0x2178   :  { %vm2504_vm10 = vcmp.eq.f32.partialorder %v4843_v1, %v4910_v35 }
0x2179   :  { %v2505_v13 = vsel %vm2504_vm10, %v2500_v11, inf  ;;  %vm3217_vm10 = vcmp.eq.s32.totalorder %v4180_v60, 7 }
0x217a   :  { %2506 = vmin.xlane.f32.xlu1 %v2505_v13 }
0x217f   :  { %v2104_v38 = vpop.permute.xlu0 %2103 }
0x2180   :  { %v2136_v51 = vrot.slane %v2104_v38, %v4184_v61 }
0x2182   :  { %v2169_v62 = vsel %vm1396_vm5, %v2136_v51, %v2132_v30  ;;  %v1740_v51 = vrot.slane %v5250_v44, %v4063_v0  ;;  %v2195_v30 = vcvt.s32.f32 %v2193_v12 }
0x2183   :  { %v2107_v41 = vpop.permute.xlu0 %2106 }
0x2184   :  { %v2140_v10 = vrot.slane %v2107_v41, %v4184_v61 }
0x2186   :  { %v2170_v37 = vsel %vm1398_vm6, %v2140_v10, %v2169_v62  ;;  %v2509_v62 = vcvt.f32.s32 %v4910_v35 }
0x2187   :  { %v2110_v42 = vpop.permute.xlu0 %2109 }
0x2188   :  { %v2144_v4 = vrot.slane %v2110_v42, %v4184_v61  ;;  %v5260_v42 = vld [vmem:[#allocation27_spill] sm:$0xff] }
0x2189   :  { %vm1778_vm2 = vcmp.ge.f32.partialorder %v5260_v42, %v1740_v51 }
0x218a   :  { %v2171_v47 = vsel %vm1400_vm7, %v2144_v4, %v2170_v37  ;;  %v2510_v37 = vshll.u32 %v2509_v62, 16 }
0x218b   :  { %v2113_v22 = vpop.permute.xlu0 %2112 }
0x218c   :  { %v2148_v1 = vrot.slane %v2113_v22, %v4184_v61 }
0x218e   :  { %v2172_v40 = vsel %vm1402_vm8, %v2148_v1, %v2171_v47 }
0x218f   :  { %v4924_v55 = vsel %vm1205_vm4, %v2172_v40, 2147483647 }
0x2190   :  { %v2179_v43 = vshra.s32 %v4924_v55, 16 }
0x2192   :  { %v4927_v39 = vcvt.s32.f32 %v2179_v43 }
0x2194   :  { %2182 = vmin.xlane.f32.xlu1 %v4927_v39 }
0x21a5   :  { %1796 = vperm.xlu1 %3707, %v1785_v63  }
0x21a9   :  { %1811 = vperm.xlu1 %3707, %v1790_v17  }
0x21ad   :  { %1814 = vperm.xlu1 %3707, %v1791_v3  }
0x21b1   :  { %1817 = vperm.xlu1 %3707, %v1792_v2  }
0x21b5   :  { %1820 = vperm.xlu1 %3707, %v1793_v56  }
0x21b8   :  { %v3212_v53 = vpop.xlane.xlu0 %3211 }
0x21b9   :  { %v3213_v49 = vcvt.f32.s32 %v3212_v53  ;;  %1823 = vperm.xlu1 %3707, %v1794_v21   ;;  %v1744_v21 = vrot.slane %v5250_v44, %v4117_v32 }
0x21bb   :  { %v3216_v36 = vadd.s32 %v3215_v45, %v3213_v49  ;;  %v5261_v49 = vld [vmem:[#allocation31_spill] sm:$0xff] }
0x21bc   :  { %vm1779_vm13 = vcmp.ge.f32.partialorder %v5261_v49, %v1744_v21 }
0x21bd   :  { %vm3219_vm1 = vcmp.eq.s32.totalorder %v4180_v60, %v3216_v36  ;;  %v3218_v34 = vsel %vm3217_vm10, %v3216_v36, 0  ;;  %v1789_v36 = vsel %vm1779_vm13, %v4577_v28, 5 }
0x21be   :  { %v3229_v18 = vsel %vm3219_vm1, %v4850_v7, 0  ;;  %v1788_v7 = vsel %vm1778_vm2, %v4577_v28, 5  ;;  %vm3269_vm2 = vcmp.eq.s32.totalorder %v4180_v60, 5 }
0x21bf   :  { %v3230_v54 = vsel %vm3168_vm9, %v3229_v18, 0 }
0x21c0   :  { %v2492_v23 = vpop.xlane.xlu0 %2491  ;;  %v3232_v26 = vshrl.u32 %v3230_v54, 16  ;;  %v3231_v13 = vand.u32 65535, %v3230_v54 }
0x21c1   :  { %v2493_v59 = vcvt.f32.s32 %v2492_v23 }
0x21c2   :  { %v3234_v11 = vcvt.s32.f32 %v3232_v26  ;;  %v3233_v41 = vcvt.s32.f32 %v3231_v13 }
0x21c3   :  { %v2496_v38 = vadd.s32 %v2495_v25, %v2493_v59 }
0x21c4   :  { %3237 = vadd.xlane.f32.xlu0 %v3234_v11 }
0x21c5   :  { %v3275_v29 = vrot.slane %v2496_v38, %v4184_v61 }
0x21c8   :  { %3235 = vadd.xlane.f32.xlu0 %v3233_v41  ;;  %v2178_v41 = vand.u32 65535, %v4924_v55 }
0x21ca   :  { %v2180_v12 = vcvt.s32.f32 %v2178_v41 }
0x21de   :  { %1805 = vperm.xlu0 %3708, %v1788_v7   ;;  %v4964_v10 = vpop.xlane.xlu0 %2197 }
0x21df   :  { %vm2199_vm3 = vcmp.eq.f32.partialorder %v4898_v58, %v4964_v10 }
0x21e0   :  { %v2200_v4 = vsel %vm2199_vm3, %v2195_v30, inf }
0x21e1   :  { %2201 = vmin.xlane.f32.xlu1 %v2200_v4  ;;  %v5262_v4 = vld [vmem:[#allocation22_spill] sm:$0xff] }
0x21e2   :  { %v1425_v62 = vrot.slane %v5262_v4, %v4053_v14  ;;  %v1429_v55 = vrot.slane %v5262_v4, %v4050_v6 }
0x21e6   :  { %v1800_v50 = vpop.permute.xlu0 %1799 }
0x21e7   :  { %v1832_v58 = vrot.slane %v1800_v50, %v4184_v61 }
0x21ea   :  { %v4981_v63 = vpop.permute.xlu0 %1802 }
0x2207   :  { %v2507_v22 = vpop.xlane.xlu1 %2506 }
0x2208   :  { %v2508_v1 = vcvt.f32.s32 %v2507_v22  ;;  %v5263_v22 = vld [vmem:[#allocation11_spill] sm:$0xff] }
0x2209   :  { %vm1469_vm15 = vcmp.ge.f32.partialorder %v5263_v22, %v1425_v62 }
0x220a   :  { %v2511_v47 = vadd.s32 %v2510_v37, %v2508_v1  ;;  %v1482_v37 = vsel %vm1469_vm15, %v4577_v28, 5  ;;  %v1433_v1 = vrot.slane %v5262_v4, %v4063_v0 }
0x220c   :  { %v3279_v40 = vrot.slane %v2511_v47, %v4184_v61 }
0x220e   :  { %v4972_v43 = vsel %vm1396_vm5, %v3279_v40, %v3275_v29  ;;  %v5265_v29 = vld [vmem:[#allocation16_spill] sm:$0xff] }
0x220f   :  { %vm1471_vm1 = vcmp.ge.f32.partialorder %v5265_v29, %v1433_v1 }
0x2210   :  { %v1484_v40 = vsel %vm1471_vm1, %v4577_v28, 5 }
0x2221   :  { %v4974_v19 = vpop.xlane.xlu1 %2182 }
0x2222   :  { %vm2184_vm14 = vcmp.eq.f32.partialorder %v4927_v39, %v4974_v19  ;;  %v5264_v39 = vld [vmem:[#allocation14_spill] sm:$0xff]  ;;  %v2189_v62 = vcvt.f32.s32 %v4974_v19 }
0x2223   :  { %v2185_v7 = vsel %vm2184_vm14, %v2180_v12, inf  ;;  %vm1470_vm0 = vcmp.ge.f32.partialorder %v5264_v39, %v1429_v55 }
0x2224   :  { %v1483_v47 = vsel %vm1470_vm0, %v4577_v28, 5  ;;  %v2190_v1 = vshll.u32 %v2189_v62, 16 }
0x2225   :  { %v1797_v8 = vpop.permute.xlu1 %1796 }
0x2226   :  { %v1828_v24 = vrot.slane %v1797_v8, %v4184_v61 }
0x2228   :  { %v4979_v35 = vsel %vm1396_vm5, %v1832_v58, %v1828_v24 }
0x2229   :  { %v1812_v53 = vpop.permute.xlu1 %1811 }
0x222a   :  { %v1848_v26 = vrot.slane %v1812_v53, %v4184_v61 }
0x222d   :  { %v1815_v45 = vpop.permute.xlu1 %1814 }
0x222e   :  { %v1852_v18 = vrot.slane %v1815_v45, %v4184_v61 }
0x2230   :  { %v1869_v44 = vsel %vm1396_vm5, %v1852_v18, %v1848_v26  ;;  %v5269_v26 = vld [vmem:[#allocation15_spill] sm:$0xff] }
0x2231   :  { %v1818_v57 = vpop.permute.xlu1 %1817 }
0x2232   :  { %v1856_v23 = vrot.slane %v1818_v57, %v4184_v61  ;;  %v1437_v57 = vrot.slane %v5262_v4, %v4117_v32 }
0x2234   :  { %v1870_v11 = vsel %vm1398_vm6, %v1856_v23, %v1869_v44  ;;  %v5268_v23 = vld [vmem:[#allocation18_spill] sm:$0xff] }
0x2251   :  { %v3238_v5 = vpop.xlane.xlu0 %3237 }
0x2252   :  { %v3240_v27 = vcvt.f32.s32 %v3238_v5 }
0x2254   :  { %v3241_v20 = vshll.u32 %v3240_v27, 16 }
0x2255   :  { %v3236_v17 = vpop.xlane.xlu0 %3235 }
0x2256   :  { %v3239_v48 = vcvt.f32.s32 %v3236_v17 }
0x2258   :  { %v3242_v3 = vadd.s32 %v3241_v20, %v3239_v48 }
0x225a   :  { %v3244_v33 = vsel %vm3243_vm11, %v3242_v3, %v3218_v34  ;;  %vm3245_vm12 = vcmp.eq.s32.totalorder %v4180_v60, %v3242_v3  ;;  %v1836_v34 = vrot.slane %v4981_v63, %v4184_v61  ;;  %vm1472_vm11 = vcmp.ge.f32.partialorder %v5268_v23, %v1437_v57 }
0x225b   :  { %v3255_v2 = vsel %vm3245_vm12, %v4875_v16, 0  ;;  %v1821_v16 = vpop.permute.xlu1 %1820 }
0x225c   :  { %v3256_v15 = vsel %vm3168_vm9, %v3255_v2, 0  ;;  %v1860_v25 = vrot.slane %v1821_v16, %v4184_v61  ;;  %v5267_v16 = vld [vmem:[#allocation25_spill] sm:$0xff] }
0x225d   :  { %v3258_v46 = vshrl.u32 %v3256_v15, 16  ;;  %v3257_v9 = vand.u32 65535, %v3256_v15  ;;  %v1806_v50 = vpop.permute.xlu0 %1805  ;;  %v1441_v18 = vrot.slane %v5267_v16, %v4033_v52  ;;  %v1453_v41 = vrot.slane %v5267_v16, %v4063_v0 }
0x225e   :  { %v1871_v13 = vsel %vm1400_vm7, %v1860_v25, %v1870_v11  ;;  %v1840_v48 = vrot.slane %v1806_v50, %v4184_v61  ;;  %v1445_v25 = vrot.slane %v5267_v16, %v4053_v14  ;;  %v5270_v11 = vld [vmem:[#allocation17_spill] sm:$0xff] }
0x225f   :  { %v3260_v56 = vcvt.s32.f32 %v3258_v46  ;;  %v3259_v31 = vcvt.s32.f32 %v3257_v9  ;;  %v1824_v54 = vpop.permute.xlu1 %1823  ;;  %vm1473_vm12 = vcmp.ge.f32.partialorder %v5269_v26, %v1441_v18 }
0x2260   :  { %v1864_v59 = vrot.slane %v1824_v54, %v4184_v61  ;;  %v1486_v44 = vsel %vm1473_vm12, %v4577_v28, 5  ;;  %vm1474_vm13 = vcmp.ge.f32.partialorder %v5270_v11, %v1445_v25 }
0x2261   :  { %3263 = vadd.xlane.f32.xlu0 %v3260_v56  ;;  %v1866_v56 = vsel %vm1398_vm6, %v1836_v34, %v4979_v35  ;;  %v1421_v35 = vrot.slane %v5262_v4, %v4033_v52  ;;  %v1449_v52 = vrot.slane %v5267_v16, %v4050_v6  ;;  %v1457_v4 = vrot.slane %v5267_v16, %v4117_v32 }
0x2262   :  { %v1872_v38 = vsel %vm1402_vm8, %v1864_v59, %v1871_v13  ;;  %v1485_v59 = vsel %vm1472_vm11, %v4577_v28, 5  ;;  %v1487_v13 = vsel %vm1474_vm13, %v4577_v28, 5 }
0x2263   :  { %v5003_v51 = vsel %vm1205_vm4, %v1872_v38, 2147483647  ;;  %v5271_v38 = vld [vmem:[#allocation19_spill] sm:$0xff] }
0x2264   :  { %v1890_v42 = vshra.s32 %v5003_v51, 16  ;;  %vm1475_vm14 = vcmp.ge.f32.partialorder %v5271_v38, %v1449_v52 }
0x2265   :  { %3261 = vadd.xlane.f32.xlu0 %v3259_v31  ;;  %v1488_v14 = vsel %vm1475_vm14, %v4577_v28, 5 }
0x2266   :  { %v5008_v30 = vcvt.s32.f32 %v1890_v42  ;;  %v2204_v42 = vcvt.f32.s32 %v4964_v10 }
0x2268   :  { %v2205_v55 = vshll.u32 %v2204_v42, 16 }
0x226e   :  { %v2202_v12 = vpop.xlane.xlu1 %2201 }
0x226f   :  { %v2203_v22 = vcvt.f32.s32 %v2202_v12 }
0x227b   :  { %1808 = vperm.xlu0 %3708, %v1789_v36   ;;  %v5266_v36 = vld [vmem:[#allocation12_spill] sm:$0xff] }
0x227c   :  { %vm1468_vm10 = vcmp.ge.f32.partialorder %v5266_v36, %v1421_v35 }
0x227d   :  { %v1481_v54 = vsel %vm1468_vm10, %v4577_v28, 5 }
0x229a   :  { %2186 = vmin.xlane.f32.xlu0 %v2185_v7  ;;  %v5272_v7 = vld [vmem:[#allocation20_spill] sm:$0xff] }
0x229b   :  { %vm1476_vm15 = vcmp.ge.f32.partialorder %v5272_v7, %v1453_v41 }
0x229c   :  { %v1489_v6 = vsel %vm1476_vm15, %v4577_v28, 5 }
0x229e   :  { %1893 = vmin.xlane.f32.xlu0 %v5008_v30 }
0x22b4   :  { %1495 = vperm.xlu0 %3708, %v1482_v37   ;;  %v5273_v37 = vld [vmem:[#allocation21_spill] sm:$0xff] }
0x22b5   :  { %vm1477_vm0 = vcmp.ge.f32.partialorder %v5273_v37, %v1457_v4 }
0x22b6   :  { %v1490_v39 = vsel %vm1477_vm0, %v4577_v28, 5 }
0x22b8   :  { %1498 = vperm.xlu0 %3708, %v1483_v47   ;;  %v2206_v47 = vadd.s32 %v2205_v55, %v2203_v22 }
0x22bc   :  { %1501 = vperm.xlu0 %3708, %v1484_v40   ;;  %v3305_v40 = vrot.slane %v2206_v47, %v4184_v61 }
0x22ee   :  { %v3264_v8 = vpop.xlane.xlu0 %3263 }
0x22ef   :  { %v3266_v58 = vcvt.f32.s32 %v3264_v8  ;;  %v1889_v8 = vand.u32 65535, %v5003_v51 }
0x22f1   :  { %v3267_v5 = vshll.u32 %v3266_v58, 16  ;;  %v1891_v58 = vcvt.s32.f32 %v1889_v8 }
0x22f2   :  { %v3262_v24 = vpop.xlane.xlu0 %3261 }
0x22f3   :  { %v3265_v27 = vcvt.f32.s32 %v3262_v24 }
0x22f5   :  { %v3268_v17 = vadd.s32 %v3267_v5, %v3265_v27 }
0x22f7   :  { %v5024_v20 = vsel %vm3269_vm2, %v3268_v17, %v3244_v33  ;;  %vm3271_vm3 = vcmp.eq.s32.totalorder %v4180_v60, %v3268_v17  ;;  %v1867_v33 = vsel %vm1400_vm7, %v1840_v48, %v1866_v56  ;;  %vm3295_vm2 = vcmp.eq.s32.totalorder %v4180_v60, 4 }
0x22f8   :  { %v3281_v3 = vsel %vm3271_vm3, %v4972_v43, 0 }
0x22f9   :  { %v3282_v2 = vsel %vm3168_vm9, %v3281_v3, 0 }
0x22fa   :  { %v1809_v15 = vpop.permute.xlu0 %1808  ;;  %v3284_v46 = vshrl.u32 %v3282_v2, 16  ;;  %v3283_v53 = vand.u32 65535, %v3282_v2 }
0x22fb   :  { %v1844_v9 = vrot.slane %v1809_v15, %v4184_v61 }
0x22fc   :  { %v3286_v31 = vcvt.s32.f32 %v3284_v46  ;;  %v3285_v45 = vcvt.s32.f32 %v3283_v53 }
0x22fd   :  { %v1868_v21 = vsel %vm1402_vm8, %v1844_v9, %v1867_v33 }
0x22fe   :  { %3289 = vadd.xlane.f32.xlu0 %v3286_v31  ;;  %v5038_v43 = vsel %vm1205_vm4, %v1868_v21, 2147483647 }
0x22ff   :  { %v1875_v63 = vshra.s32 %v5038_v43, 16  ;;  %v1874_v3 = vand.u32 65535, %v5038_v43 }
0x2301   :  { %v5041_v49 = vcvt.s32.f32 %v1875_v63  ;;  %v1876_v56 = vcvt.s32.f32 %v1874_v3 }
0x2302   :  { %3287 = vadd.xlane.f32.xlu0 %v3285_v45 }
0x2303   :  { %1878 = vmin.xlane.f32.xlu1 %v5041_v49 }
0x2314   :  { %1492 = vperm.xlu1 %3707, %v1481_v54  }
0x2318   :  { %1504 = vperm.xlu0 %3708, %v1485_v59   ;;  %1507 = vperm.xlu1 %3707, %v1486_v44  }
0x231c   :  { %1510 = vperm.xlu1 %3707, %v1487_v13  }
0x2320   :  { %1513 = vperm.xlu1 %3707, %v1488_v14  }
0x2324   :  { %1516 = vperm.xlu1 %3707, %v1489_v6  }
0x2327   :  { %v2187_v0 = vpop.xlane.xlu0 %2186 }
0x2328   :  { %v2188_v10 = vcvt.f32.s32 %v2187_v0  ;;  %1519 = vperm.xlu1 %3707, %v1490_v39  }
0x232a   :  { %v2191_v29 = vadd.s32 %v2190_v1, %v2188_v10 }
0x232b   :  { %v5077_v19 = vpop.xlane.xlu0 %1893 }
0x232c   :  { %v3301_v32 = vrot.slane %v2191_v29, %v4184_v61  ;;  %vm1895_vm1 = vcmp.eq.f32.partialorder %v5008_v30, %v5077_v19  ;;  %v1900_v47 = vcvt.f32.s32 %v5077_v19  ;;  %v5275_v19 = vld [vmem:[#allocation8_spill] sm:$0xff] }
0x232d   :  { %v1896_v28 = vsel %vm1895_vm1, %v1891_v58, inf  ;;  %vm3373_vm1 = vcmp.eq.s32.totalorder %v4180_v60, 1 }
0x232e   :  { %v3306_v50 = vsel %vm1396_vm5, %v3305_v40, %v3301_v32  ;;  %v1901_v40 = vshll.u32 %v1900_v47, 16 }
0x2333   :  { %v1496_v24 = vpop.permute.xlu0 %1495 }
0x2334   :  { %v1528_v31 = vrot.slane %v1496_v24, %v4184_v61 }
0x2337   :  { %v1499_v5 = vpop.permute.xlu0 %1498 }
0x2338   :  { %v1532_v43 = vrot.slane %v1499_v5, %v4184_v61 }
0x233b   :  { %v1502_v27 = vpop.permute.xlu0 %1501 }
0x233c   :  { %v1536_v45 = vrot.slane %v1502_v27, %v4184_v61 }
0x234c   :  { %1897 = vmin.xlane.f32.xlu1 %v1896_v28 }
0x238b   :  { %v3290_v17 = vpop.xlane.xlu0 %3289 }
0x238c   :  { %v3292_v48 = vcvt.f32.s32 %v3290_v17 }
0x238e   :  { %v3293_v2 = vshll.u32 %v3292_v48, 16 }
0x238f   :  { %v3288_v34 = vpop.xlane.xlu0 %3287 }
0x2390   :  { %v3291_v15 = vcvt.f32.s32 %v3288_v34  ;;  %v1879_v46 = vpop.xlane.xlu1 %1878 }
0x2391   :  { %vm1880_vm3 = vcmp.eq.f32.partialorder %v5041_v49, %v1879_v46  ;;  %v1885_v10 = vcvt.f32.s32 %v1879_v46 }
0x2392   :  { %v3294_v51 = vadd.s32 %v3293_v2, %v3291_v15  ;;  %v1881_v30 = vsel %vm1880_vm3, %v1876_v56, inf  ;;  %v5274_v2 = vld [vmem:[#allocation10_spill] sm:$0xff]  ;;  %vm3401_vm3 = vcmask 58368  }
0x2393   :  { %1882 = vmin.xlane.f32.xlu0 %v1881_v30 }
0x2394   :  { %v5086_v9 = vsel %vm3295_vm2, %v3294_v51, %v5024_v20  ;;  %vm3297_vm10 = vcmp.eq.s32.totalorder %v4180_v60, %v3294_v51  ;;  %v1493_v33 = vpop.permute.xlu1 %1492 }
0x2395   :  { %v3307_v53 = vsel %vm3297_vm10, %v3306_v50, 0  ;;  %v1524_v21 = vrot.slane %v1493_v33, %v4184_v61  ;;  %v1886_v50 = vshll.u32 %v1885_v10, 16 }
0x2396   :  { %v3308_v63 = vsel %vm3168_vm9, %v3307_v53, 0 }
0x2397   :  { %v1561_v49 = vsel %vm1396_vm5, %v1528_v31, %v1524_v21  ;;  %v1505_v35 = vpop.permute.xlu0 %1504  ;;  %v3310_v36 = vshrl.u32 %v3308_v63, 16  ;;  %v3309_v23 = vand.u32 65535, %v3308_v63 }
0x2398   :  { %v1562_v20 = vsel %vm1398_vm6, %v1532_v43, %v1561_v49  ;;  %v1540_v57 = vrot.slane %v1505_v35, %v4184_v61  ;;  %v1508_v16 = vpop.permute.xlu1 %1507 }
0x2399   :  { %v1563_v18 = vsel %vm1400_vm7, %v1536_v45, %v1562_v20  ;;  %v3312_v54 = vcvt.s32.f32 %v3310_v36  ;;  %v3311_v11 = vcvt.s32.f32 %v3309_v23  ;;  %v1544_v12 = vrot.slane %v1508_v16, %v4184_v61  ;;  %v5276_v36 = vld [vmem:[#allocation13_spill] sm:$0xff] }
0x239a   :  { %v1564_v26 = vsel %vm1402_vm8, %v1540_v57, %v1563_v18  ;;  %v5277_v20 = vld [vmem:[#allocation9_spill] sm:$0xff] }
0x239b   :  { %3315 = vadd.xlane.f32.xlu0 %v3312_v54  ;;  %v1569_v25 = vsel %vm1205_vm4, %v1564_v26, 2147483647  ;;  %vm1213_vm12 = vcmp.ge.f32.partialorder %v5277_v20, %v5276_v36 }
0x239c   :  { %v1511_v59 = vpop.permute.xlu1 %1510  ;;  %v1571_v44 = vshra.s32 %v1569_v25, 16  ;;  %v1570_v3 = vand.u32 65535, %v1569_v25  ;;  %v1215_v18 = vsel %vm1213_vm12, %v4180_v60, 5 }
0x239d   :  { %v1548_v38 = vrot.slane %v1511_v59, %v4184_v61  ;;  %v1231_v25 = vsel %vm1205_vm4, %v1215_v18, 2147483647 }
0x239e   :  { %v1573_v52 = vcvt.s32.f32 %v1571_v44  ;;  %v1572_v51 = vcvt.s32.f32 %v1570_v3  ;;  %v1233_v44 = vshra.s32 %v1231_v25, 16  ;;  %v1232_v47 = vand.u32 65535, %v1231_v25 }
0x239f   :  { %3313 = vadd.xlane.f32.xlu0 %v3311_v11  ;;  %v1565_v7 = vsel %vm1396_vm5, %v1548_v38, %v1544_v12 }
0x23a0   :  { %v1514_v13 = vpop.permute.xlu1 %1513  ;;  %1574 = vmin.xlane.f32.xlu1 %v1573_v52  ;;  %v1235_v11 = vcvt.s32.f32 %v1233_v44 }
0x23a1   :  { %v1552_v14 = vrot.slane %v1514_v13, %v4184_v61 }
0x23a3   :  { %v1566_v6 = vsel %vm1398_vm6, %v1552_v14, %v1565_v7  ;;  %vm1212_vm6 = vcmp.ge.f32.partialorder %v5275_v19, %v5274_v2 }
0x23a4   :  { %v1517_v41 = vpop.permute.xlu1 %1516  ;;  %v1214_v31 = vsel %vm1212_vm6, %v4180_v60, 5 }
0x23a5   :  { %v1556_v42 = vrot.slane %v1517_v41, %v4184_v61  ;;  %v1216_v63 = vsel %vm1205_vm4, %v1214_v31, 2147483647 }
0x23a6   :  { %v1218_v35 = vshra.s32 %v1216_v63, 16  ;;  %v1217_v38 = vand.u32 65535, %v1216_v63 }
0x23a7   :  { %v1567_v22 = vsel %vm1400_vm7, %v1556_v42, %v1566_v6  ;;  %vm3321_vm7 = vcmp.eq.s32.totalorder %v4180_v60, 3 }
0x23a8   :  { %v1520_v4 = vpop.permute.xlu1 %1519  ;;  %v1220_v57 = vcvt.s32.f32 %v1218_v35  ;;  %v1219_v14 = vcvt.s32.f32 %v1217_v38 }
0x23a9   :  { %v1560_v62 = vrot.slane %v1520_v4, %v4184_v61 }
0x23ab   :  { %v1568_v55 = vsel %vm1402_vm8, %v1560_v62, %v1567_v22 }
0x23ac   :  { %v1584_v37 = vsel %vm1205_vm4, %v1568_v55, 2147483647  ;;  %vm3347_vm4 = vcmp.eq.s32.totalorder %v4180_v60, 2 }
0x23ad   :  { %v1586_v0 = vshra.s32 %v1584_v37, 16  ;;  %v1585_v16 = vand.u32 65535, %v1584_v37 }
0x23af   :  { %v1588_v39 = vcvt.s32.f32 %v1586_v0  ;;  %v1587_v54 = vcvt.s32.f32 %v1585_v16 }
0x23b1   :  { %1589 = vmin.xlane.f32.xlu0 %v1588_v39 }
0x23d9   :  { %v1898_v1 = vpop.xlane.xlu1 %1897 }
0x23da   :  { %v1899_v29 = vcvt.f32.s32 %v1898_v1 }
0x23dc   :  { %v1902_v8 = vadd.s32 %v1901_v40, %v1899_v29 }
0x23de   :  { %v3331_v24 = vrot.slane %v1902_v8, %v4184_v61 }
0x2420   :  { %v1883_v32 = vpop.xlane.xlu0 %1882 }
0x2421   :  { %v1884_v58 = vcvt.f32.s32 %v1883_v32 }
0x2423   :  { %v1887_v28 = vadd.s32 %v1886_v50, %v1884_v58  ;;  %v1234_v58 = vcvt.s32.f32 %v1232_v47 }
0x2425   :  { %v3327_v5 = vrot.slane %v1887_v28, %v4184_v61 }
0x2427   :  { %v3332_v27 = vsel %vm1396_vm5, %v3331_v24, %v3327_v5 }
0x2428   :  { %v3316_v17 = vpop.xlane.xlu0 %3315 }
0x2429   :  { %v3318_v48 = vcvt.f32.s32 %v3316_v17 }
0x242b   :  { %v3319_v15 = vshll.u32 %v3318_v48, 16 }
0x242c   :  { %v3314_v34 = vpop.xlane.xlu0 %3313 }
0x242d   :  { %v3317_v46 = vcvt.f32.s32 %v3314_v34  ;;  %v1575_v56 = vpop.xlane.xlu1 %1574 }
0x242e   :  { %vm1576_vm8 = vcmp.eq.f32.partialorder %v1573_v52, %v1575_v56  ;;  %v1581_v12 = vcvt.f32.s32 %v1575_v56 }
0x242f   :  { %v3320_v30 = vadd.s32 %v3319_v15, %v3317_v46  ;;  %v1577_v33 = vsel %vm1576_vm8, %v1572_v51, inf }
0x2430   :  { %1578 = vmin.xlane.f32.xlu1 %v1577_v33  ;;  %v1582_v62 = vshll.u32 %v1581_v12, 16 }
0x2431   :  { %v3322_v53 = vsel %vm3321_vm7, %v3320_v30, %v5086_v9  ;;  %vm3323_vm11 = vcmp.eq.s32.totalorder %v4180_v60, %v3320_v30 }
0x2432   :  { %v3333_v21 = vsel %vm3323_vm11, %v3332_v27, 0 }
0x2433   :  { %v3334_v43 = vsel %vm3168_vm9, %v3333_v21, 0 }
0x2434   :  { %v3336_v45 = vshrl.u32 %v3334_v43, 16  ;;  %v3335_v23 = vand.u32 65535, %v3334_v43 }
0x2436   :  { %v3338_v49 = vcvt.s32.f32 %v3336_v45  ;;  %v3337_v59 = vcvt.s32.f32 %v3335_v23 }
0x2438   :  { %3341 = vadd.xlane.f32.xlu1 %v3338_v49 }
0x243c   :  { %1221 = vmin.xlane.f32.xlu1 %v1220_v57 }
0x243e   :  { %v1590_v9 = vpop.xlane.xlu0 %1589 }
0x243f   :  { %vm1591_vm13 = vcmp.eq.f32.partialorder %v1588_v39, %v1590_v9  ;;  %v1596_v42 = vcvt.f32.s32 %v1590_v9 }
0x2440   :  { %v1592_v26 = vsel %vm1591_vm13, %v1587_v54, inf }
0x2441   :  { %1593 = vmin.xlane.f32.xlu0 %v1592_v26  ;;  %v1597_v22 = vshll.u32 %v1596_v42, 16 }
0x2445   :  { %3339 = vadd.xlane.f32.xlu0 %v3337_v59 }
0x2449   :  { %1236 = vmin.xlane.f32.xlu0 %v1235_v11 }
0x24bd   :  { %v1579_v52 = vpop.xlane.xlu1 %1578 }
0x24be   :  { %v1580_v4 = vcvt.f32.s32 %v1579_v52 }
0x24c0   :  { %v1583_v0 = vadd.s32 %v1582_v62, %v1580_v4 }
0x24c2   :  { %v3353_v32 = vrot.slane %v1583_v0, %v4184_v61 }
0x24c5   :  { %v3342_v13 = vpop.xlane.xlu1 %3341 }
0x24c6   :  { %v3344_v55 = vcvt.f32.s32 %v3342_v13 }
0x24c8   :  { %v3345_v10 = vshll.u32 %v3344_v55, 16 }
0x24c9   :  { %v1222_v41 = vpop.xlane.xlu1 %1221 }
0x24ca   :  { %vm1223_vm14 = vcmp.eq.f32.partialorder %v1220_v57, %v1222_v41  ;;  %v1228_v46 = vcvt.f32.s32 %v1222_v41 }
0x24cb   :  { %v1224_v7 = vsel %vm1223_vm14, %v1219_v14, inf }
0x24cc   :  { %1225 = vmin.xlane.f32.xlu1 %v1224_v7  ;;  %v1229_v31 = vshll.u32 %v1228_v46, 16 }
0x24ce   :  { %v1594_v6 = vpop.xlane.xlu0 %1593 }
0x24cf   :  { %v1595_v37 = vcvt.f32.s32 %v1594_v6 }
0x24d1   :  { %v1598_v39 = vadd.s32 %v1597_v22, %v1595_v37 }
0x24d2   :  { %v3340_v1 = vpop.xlane.xlu0 %3339 }
0x24d3   :  { %v3357_v29 = vrot.slane %v1598_v39, %v4184_v61  ;;  %v3343_v40 = vcvt.f32.s32 %v3340_v1 }
0x24d5   :  { %v3346_v50 = vadd.s32 %v3345_v10, %v3343_v40  ;;  %v3358_v28 = vsel %vm1396_vm5, %v3357_v29, %v3353_v32 }
0x24d6   :  { %v1237_v8 = vpop.xlane.xlu0 %1236 }
0x24d7   :  { %v3348_v24 = vsel %vm3347_vm4, %v3346_v50, %v3322_v53  ;;  %vm3349_vm15 = vcmp.eq.s32.totalorder %v4180_v60, %v3346_v50  ;;  %vm1238_vm0 = vcmp.eq.f32.partialorder %v1235_v11, %v1237_v8  ;;  %v1243_v19 = vcvt.f32.s32 %v1237_v8 }
0x24d8   :  { %v3359_v5 = vsel %vm3349_vm15, %v3358_v28, 0  ;;  %v1239_v27 = vsel %vm1238_vm0, %v1234_v58, inf }
0x24d9   :  { %1240 = vmin.xlane.f32.xlu0 %v1239_v27  ;;  %v3360_v17 = vsel %vm3168_vm9, %v3359_v5, 0  ;;  %v1244_v30 = vshll.u32 %v1243_v19, 16 }
0x24da   :  { %v3362_v48 = vshrl.u32 %v3360_v17, 16  ;;  %v3361_v3 = vand.u32 65535, %v3360_v17 }
0x24dc   :  { %v3364_v34 = vcvt.s32.f32 %v3362_v48  ;;  %v3363_v2 = vcvt.s32.f32 %v3361_v3 }
0x24de   :  { %3367 = vadd.xlane.f32.xlu1 %v3364_v34  ;;  %3365 = vadd.xlane.f32.xlu0 %v3363_v2 }
0x2559   :  { %v1226_v15 = vpop.xlane.xlu1 %1225 }
0x255a   :  { %v1227_v33 = vcvt.f32.s32 %v1226_v15 }
0x255c   :  { %v1230_v63 = vadd.s32 %v1229_v31, %v1227_v33 }
0x255e   :  { %v3379_v20 = vrot.slane %v1230_v63, %v4184_v61 }
0x2566   :  { %v1241_v56 = vpop.xlane.xlu0 %1240 }
0x2567   :  { %v1242_v51 = vcvt.f32.s32 %v1241_v56 }
0x2569   :  { %v1245_v53 = vadd.s32 %v1244_v30, %v1242_v51 }
0x256b   :  { %v3368_v21 = vpop.xlane.xlu1 %3367  ;;  %v3366_v43 = vpop.xlane.xlu0 %3365  ;;  %v3383_v49 = vrot.slane %v1245_v53, %v4184_v61 }
0x256c   :  { %v3370_v45 = vcvt.f32.s32 %v3368_v21  ;;  %v3369_v36 = vcvt.f32.s32 %v3366_v43 }
0x256d   :  { %v3384_v16 = vsel %vm1396_vm5, %v3383_v49, %v3379_v20  ;;  %vm3399_vm5 = vcmp.eq.s32.totalorder %v4180_v60, 0 }
0x256e   :  { %v3371_v35 = vshll.u32 %v3370_v45, 16 }
0x2570   :  { %v3372_v57 = vadd.s32 %v3371_v35, %v3369_v36 }
0x2572   :  { %vm3375_vm2 = vcmp.eq.s32.totalorder %v4180_v60, %v3372_v57  ;;  %v3374_v18 = vsel %vm3373_vm1, %v3372_v57, %v3348_v24 }
0x2573   :  { %v3385_v9 = vsel %vm3375_vm2, %v3384_v16, 0 }
0x2574   :  { %v3386_v54 = vsel %vm3168_vm9, %v3385_v9, 0 }
0x2575   :  { %v3388_v23 = vshrl.u32 %v3386_v54, 16  ;;  %v3387_v26 = vand.u32 65535, %v3386_v54 }
0x2577   :  { %v3390_v25 = vcvt.s32.f32 %v3388_v23  ;;  %v3389_v59 = vcvt.s32.f32 %v3387_v26 }
0x2579   :  { %3393 = vadd.xlane.f32.xlu1 %v3390_v25  ;;  %3391 = vadd.xlane.f32.xlu0 %v3389_v59 }
0x2606   :  { %v3394_v44 = vpop.xlane.xlu1 %3393  ;;  %v3392_v11 = vpop.xlane.xlu0 %3391 }
0x2607   :  { %v3396_v52 = vcvt.f32.s32 %v3394_v44  ;;  %v3395_v61 = vcvt.f32.s32 %v3392_v11 }
0x2609   :  { %v3397_v13 = vshll.u32 %v3396_v52, 16 }
0x260b   :  { %v3398_v38 = vadd.s32 %v3397_v13, %v3395_v61 }
0x260d   :  { %v3400_v41 = vsel %vm3399_vm5, %v3398_v38, %v3374_v18 }
0x260e   :  { %3402 = vst.msk [vmem:[#allocation5] sm:$0x3] %vm3401_vm3, %v3400_v41 }
0x260f   :  { %3784 = shalt.err (!%p3781_p4)
}
0x2610   :  { %s3785_s21 = scalar_lea.hbm %s5161_s10, 32 }
0x2611   :  { %p3786_p5 = scmp.ne.s32.totalorder %s5161_s10, %s3785_s21  ;;  %p3789_p6 = scmp.lt.u32.totalorder %s3785_s21, %s5161_s10 }
0x2613   :  { %p3791_p7 = pnand %p3789_p6, %p3786_p5 }
0x2615   :  { %3794 = shalt.err (!%p3791_p7)
}
0x2616   :  { %3412 = dma.vmem_to_hbm [thread:$0]  %s3410_s2, 32, %s5161_s10, [#allocation6]  }
0x2617   :  { %3795 = dma.done.wait [#allocation6], 32  }
0x2618   :  { %3796 = vsyncadd [#allocation6], 4294967264 }
0x2619   :  { %3420 = vsyncpa [#allocation6], 1 }

</bundles_post_ra>
